<compile_context>
chip_gen: v7x
topology: tpu7x:2x2x1
jax: 0.10.0
libtpu: 0.0.40
codegen_flags: <defaults>
</compile_context>

<pallas_src>
import functools

import jax
import jax.numpy as jnp
from jax import lax
from jax.experimental import pallas as pl
from jax.experimental.pallas import tpu as pltpu


def _shapelet_transform_kernel(lengths_smem, tspan_smem, shp_smem,        # SMEM
                               p0_ref, dp_ref, tmx_ref,                   # VMEM (grid-invariant)
                               out_ref,                                   # VMEM (1, TJ, Bp)
                               acc_ref,                                   # VMEM scratch (Gpad, Bp)
                               *, S, C, G, TJ, GT, NGT):
    blk = pl.program_id(0)
    _, Bp, Tm1p = p0_ref.shape
    Sm1 = S - 1
    Gpad = NGT * GT

    t0 = tspan_smem[0]
    t_last = tspan_smem[1]

    tmx = tmx_ref[...]                     # (8, Tm1p): rows 0/1/2 = tm_lo / tm_hi / safe 1/w
    tm_lo = tmx[0:1, :]
    tm_hi = tmx[1:2, :]
    inv_w = tmx[2:3, :]

    # Per-channel path-segment data, lane-dense (Bp, Tm1p); channel is the leading "page"
    # axis so these reads never relayout.
    p0c = [p0_ref[c] for c in range(C)]
    dpc = [dp_ref[c] for c in range(C)]

    # Shapelet-independent channel contraction sum_c dp^2; transposed once for the MXU rhs.
    P_b = dpc[0] * dpc[0]
    for c in range(1, C):
        P_b = P_b + dpc[c] * dpc[c]
    P_T = P_b.T                            # (Tm1p, Bp)

    ig = lax.broadcasted_iota(jnp.int32, (GT, 1), 0).astype(jnp.float32)   # (GT, 1)
    gid = lax.broadcasted_iota(jnp.int32, (Gpad, 1), 0)                    # (Gpad, 1)
    row_j = lax.broadcasted_iota(jnp.int32, (TJ, 1), 0)                    # (TJ, 1)

    def shapelet_body(jj, out_acc):        # one shapelet at a time -> bounded live set
        j = blk * TJ + jj
        length = lengths_smem[j]
        dt_s = length / jnp.float32(Sm1)
        inv_dt = jnp.where(dt_s > 0, 1.0 / jnp.maximum(dt_s, jnp.float32(1e-30)),
                           jnp.float32(0.0))
        if G > 1:
            step = (t_last - length - t0) / jnp.float32(G - 1)
        else:
            step = jnp.float32(0.0)
        base = j * (S * C)

        acc_ref[...] = jnp.zeros_like(acc_ref)

        for k in range(Sm1):               # shapelet segments (static unroll)
            # Shapelet knot values for segment k (SMEM scalars).
            s0 = [shp_smem[base + k * C + c] for c in range(C)]
            s1 = [shp_smem[base + (k + 1) * C + c] for c in range(C)]
            ds = [s1[c] - s0[c] for c in range(C)]

            # Channel contractions (C unrolled, lane-dense VPU), scale factors folded in,
            # transposed once per (shapelet, segment) so the g-loop dots are plain matmuls.
            e = p0c[0] - s0[0]
            E_k = e * e
            Dep_k = e * dpc[0]
            Des_k = e * ds[0]
            Dps_k = dpc[0] * ds[0]
            S_k = ds[0] * ds[0]
            for c in range(1, C):
                e = p0c[c] - s0[c]
                E_k = E_k + e * e
                Dep_k = Dep_k + e * dpc[c]
                Des_k = Des_k + e * ds[c]
                Dps_k = Dps_k + dpc[c] * ds[c]
                S_k = S_k + ds[c] * ds[c]
            E3_T = (3.0 * E_k).T           # (Tm1p, Bp)
            Dep3_T = (3.0 * Dep_k).T
            Des3n_T = (-3.0 * Des_k).T
            Dpsn_T = (-1.0 * Dps_k).T
            k_off = jnp.float32(k) * dt_s

            def g_tile_body(gt, carry):
                # Window starts for this G-tile (sublane axis of size GT).
                start = t0 + ((gt * GT).astype(jnp.float32) + ig) * step   # (GT, 1)
                tau_lo = start + k_off
                lo = jnp.maximum(tau_lo, tm_lo)             # (GT, Tm1p)
                hi = jnp.minimum(tau_lo + dt_s, tm_hi)
                seg = jnp.maximum(hi - lo, 0.0)             # 0 for non-overlapping pairs
                u = (lo - tm_lo) * inv_w
                w = u + seg * inv_w                          # == (hi - tm_lo)/w when seg > 0
                v = (lo - tau_lo) * inv_dt
                x = v + seg * inv_dt
                q_uw = u + w
                q_vx = v + x
                q_p = q_uw * q_uw - u * w
                q_s = q_vx * q_vx - v * x
                q_ps = q_uw * q_vx + (u * v + w * x)

                # B-scaled accumulation on the MXU: contract the lane-dense Tm1 axis.
                contrib = jnp.dot(seg, E3_T, preferred_element_type=jnp.float32)
                contrib = contrib + jnp.dot(seg * q_p, P_T,
                                            preferred_element_type=jnp.float32)
                contrib = contrib + jnp.dot(seg * q_uw, Dep3_T,
                                            preferred_element_type=jnp.float32)
                contrib = contrib + jnp.dot(seg * q_vx, Des3n_T,
                                            preferred_element_type=jnp.float32)
                contrib = contrib + jnp.dot(seg * q_ps, Dpsn_T,
                                            preferred_element_type=jnp.float32)
                # B-independent |ds|^2 term: scalar * lane reduction (XLU), broadcast over B.
                contrib = contrib + S_k * jnp.sum(seg * q_s, axis=-1, keepdims=True)

                if NGT == 1:
                    acc_ref[...] = acc_ref[...] + contrib
                else:
                    row0 = pl.multiple_of(gt * GT, GT)
                    acc_ref[pl.ds(row0, GT), :] = acc_ref[pl.ds(row0, GT), :] + contrib
                return carry

            lax.fori_loop(0, NGT, g_tile_body, 0)

        integral = acc_ref[...] * jnp.float32(1.0 / 3.0)                   # (Gpad, Bp)
        integral = jnp.where(gid < G, integral, jnp.float32(jnp.inf))      # mask padded g
        min_int = jnp.min(integral, axis=0, keepdims=True)                 # (1, Bp)
        disc = jnp.sqrt(jnp.maximum(min_int, 0.0))                         # clamp fp rounding
        return jnp.where(row_j == jj, disc, out_acc)

    out0 = jnp.zeros((TJ, Bp), jnp.float32)
    out_ref[0] = lax.fori_loop(0, TJ, shapelet_body, out0)   # single aligned block store


def shapelet_transform_pallas(times, path, lengths, shapelets_repeated, linear,
                              num_continuous_samples, *, shapelet_block=8, g_tile=None):
    """times (T,), path (B,T,C), lengths (N,), shapelets (N,S,C), linear (C,C) -> (B, N)."""
    times = jnp.asarray(times, jnp.float32)
    path = jnp.asarray(path, jnp.float32)
    lengths = jnp.asarray(lengths, jnp.float32)
    shapelets = jnp.asarray(shapelets_repeated, jnp.float32)
    linear = jnp.asarray(linear, jnp.float32)

    T = times.shape[0]
    B, _, C = path.shape
    n_total, S, _ = shapelets.shape
    G = int(num_continuous_samples)
    Tm1 = T - 1
    assert T >= 2 and S >= 2 and G >= 1

    # --- hoisted, shapelet-independent preprocessing (plain XLA, done once) ---
    pathA = jnp.einsum('btc,dc->btd', path, linear, precision=lax.Precision.HIGHEST)
    shpA = jnp.einsum('nsc,dc->nsd', shapelets, linear, precision=lax.Precision.HIGHEST)

    # Lane-dense, tile-aligned layout: path-segment axis padded to a multiple of 128 on
    # lanes, batch padded to a multiple of 8 on sublanes, channel as the leading page axis.
    Tm1p = ((Tm1 + 127) // 128) * 128
    B_pad = ((B + 7) // 8) * 8
    p0 = jnp.transpose(pathA[:, :-1, :], (2, 0, 1))                       # (C, B, Tm1)
    dp = jnp.transpose(pathA[:, 1:, :] - pathA[:, :-1, :], (2, 0, 1))
    p0 = jnp.pad(p0, ((0, 0), (0, B_pad - B), (0, Tm1p - Tm1)))
    dp = jnp.pad(dp, ((0, 0), (0, B_pad - B), (0, Tm1p - Tm1)))

    tm_lo = times[:-1]
    tm_hi = times[1:]
    seg_w = tm_hi - tm_lo
    inv_w = jnp.where(seg_w > 0, 1.0 / jnp.maximum(seg_w, 1e-30), 0.0)    # duplicate-knot safe
    # Merged (8, Tm1p) table: rows 0/1/2 = tm_lo / tm_hi / 1/w.  Padded columns keep
    # tm_lo == tm_hi == 0 and inv_w == 0, i.e. zero-width segments that contribute nothing.
    tmx = jnp.zeros((8, Tm1p), jnp.float32)
    tmx = tmx.at[0, :Tm1].set(tm_lo).at[1, :Tm1].set(tm_hi).at[2, :Tm1].set(inv_w)
    tspan = jnp.stack([times[0], times[-1]])

    # --- shapelet blocking: keep >= 2 grid steps so both v7x TensorCores get work ---
    TJ = max(1, int(shapelet_block))
    TJ = min(TJ, max(1, n_total))
    if 2 <= n_total < 2 * TJ:
        TJ = max(1, (n_total + 1) // 2)
    n_pad = ((n_total + TJ - 1) // TJ) * TJ
    pad = n_pad - n_total
    lengths_p = jnp.pad(lengths, (0, pad))
    shp_flat = jnp.pad(shpA, ((0, pad), (0, 0), (0, 0))).reshape(-1)
    n_blocks = n_pad // TJ

    # --- window-start tile: budgeted so the g-tile working set stays VMEM resident on
    #     every generation (v7x has only 64 MiB of VMEM). ---
    Gr = ((G + 7) // 8) * 8
    if g_tile is None:
        per_gt_bytes = 18 * Tm1p * 4                 # ~live (GT, Tm1p) f32 coefficient maps
        GT = min(256, max(8, (8 * 1024 * 1024) // per_gt_bytes), Gr)
    else:
        GT = min(max(8, int(g_tile)), Gr)
    GT = max(8, (GT // 8) * 8)
    NGT = -(-G // GT)

    kernel = functools.partial(_shapelet_transform_kernel,
                               S=S, C=C, G=G, TJ=TJ, GT=GT, NGT=NGT)
    out = pl.pallas_call(
        kernel,
        grid=(n_blocks,),
        in_specs=[
            pl.BlockSpec(memory_space=pltpu.MemorySpace.SMEM),           # lengths   (n_pad,)
            pl.BlockSpec(memory_space=pltpu.MemorySpace.SMEM),           # tspan     (2,)
            pl.BlockSpec(memory_space=pltpu.MemorySpace.SMEM),           # shapelets, flat
            pl.BlockSpec((C, B_pad, Tm1p), lambda j: (0, 0, 0)),         # p0
            pl.BlockSpec((C, B_pad, Tm1p), lambda j: (0, 0, 0)),         # dp
            pl.BlockSpec((8, Tm1p), lambda j: (0, 0)),                   # tm_lo / tm_hi / 1/w
        ],
        out_specs=pl.BlockSpec((1, TJ, B_pad), lambda j: (j, 0, 0)),
        out_shape=jax.ShapeDtypeStruct((n_blocks, TJ, B_pad), jnp.float32),
        scratch_shapes=[pltpu.VMEM((NGT * GT, B_pad), jnp.float32)],
        compiler_params=pltpu.CompilerParams(
            dimension_semantics=("parallel",),    # independent shapelet blocks (2 TCs on v7x)
            vmem_limit_bytes=48 * 1024 * 1024),
    )(lengths_p, tspan, shp_flat, p0, dp, tmx)

    out = out.reshape(n_pad, B_pad)[:n_total, :B]
    return out.T                                   # (B, N), PyTorch convention


class GeneralisedShapeletTransform:
    """JAX/Pallas port of torchshapelets.GeneralisedShapeletTransform (forward only).

    The `discrepancy_fn` is fixed to the L2 pseudometric discrepancy
    ||A (f - g)||_{L2} with a learnable (in_channels, in_channels) matrix A.
    """
    # TODO(synk): the lengths.register_hook gradient scaling is autograd-only (no forward effect).
    # TODO(synk): extract_random_shapelets / set_shapelets / clip_length helpers are not ported.

    def __init__(self, key, in_channels, num_shapelets, num_shapelet_samples,
                 max_shapelet_length, init_min_length=None, init_max_length=None,
                 lengths_per_shapelet=1, num_continuous_samples=None):
        self.in_channels = in_channels
        self.num_shapelets = num_shapelets
        self.num_shapelet_samples = num_shapelet_samples
        self.max_shapelet_length = max_shapelet_length
        self.lengths_per_shapelet = lengths_per_shapelet
        self.num_continuous_samples = (int(num_continuous_samples)
                                       if num_continuous_samples is not None else None)
        init_min = max_shapelet_length / 2 if init_min_length is None else init_min_length
        init_max = max_shapelet_length if init_max_length is None else init_max_length

        k1, k2, k3 = jax.random.split(key, 3)
        # reset_parameters(): lengths ~ U(init_min, init_max), shapelets ~ U(-1, 1)
        self.lengths = jax.random.uniform(
            k1, (num_shapelets * lengths_per_shapelet,), jnp.float32, init_min, init_max)
        self.shapelets = jax.random.uniform(
            k2, (num_shapelets, num_shapelet_samples, in_channels), jnp.float32, -1.0, 1.0)
        # Deterministic init of the discrepancy's pseudometric matrix A.
        self.discrepancy_linear = (jax.random.normal(k3, (in_channels, in_channels), jnp.float32)
                                   / jnp.sqrt(jnp.float32(in_channels)))

    def __call__(self, times, path, *, validate_finite=False):
        # The original module raises if `not torch.isfinite(path).any()`; doing that host-side
        # forces a device->host sync every call, so it is opt-in here (keeps the call jittable).
        if validate_finite and not bool(jnp.isfinite(path).any()):
            raise ValueError('path cannot have non-finite values.')
        G = len(times) if self.num_continuous_samples is None else self.num_continuous_samples
        times = jnp.asarray(times, dtype=path.dtype)
        shapelets_repeated = jnp.tile(self.shapelets, (self.lengths_per_shapelet, 1, 1))
        return shapelet_transform_pallas(times, path, self.lengths, shapelets_repeated,
                                         self.discrepancy_linear, G)


def shapelet_transform_reference(times, path, lengths, shapelets, linear, G):
    """Plain-JAX reference of the same math (for validation)."""
    B, T, C = path.shape
    N, S, _ = shapelets.shape
    t0, t_last = times[0], times[-1]
    pathA = jnp.einsum('btc,dc->btd', path, linear, precision=lax.Precision.HIGHEST)
    shpA = jnp.einsum('nsc,dc->nsd', shapelets, linear, precision=lax.Precision.HIGHEST)

    i_idx = jnp.arange(G, dtype=jnp.float32)[None, :, None]
    k_idx = jnp.arange(S, dtype=jnp.float32)[None, None, :]
    ln = lengths[:, None, None]
    step = (t_last - ln - t0) / (G - 1) if G > 1 else 0.0
    dt_s = ln / (S - 1)
    tau = t0 + i_idx * step + k_idx * dt_s                       # (N, G, S)
    tau_lo, tau_hi = tau[..., :-1], tau[..., 1:]
    tm_lo, tm_hi = times[:-1], times[1:]
    seg_w = tm_hi - tm_lo

    lo = jnp.maximum(tau_lo[..., None], tm_lo)                   # (N, G, S-1, T-1)
    hi = jnp.minimum(tau_hi[..., None], tm_hi)
    seg_len = jnp.maximum(hi - lo, 0.0)
    r_p_lo = (lo - tm_lo) / seg_w
    r_p_hi = (hi - tm_lo) / seg_w
    r_s_lo = (lo - tau_lo[..., None]) / dt_s[..., None]
    r_s_hi = (hi - tau_lo[..., None]) / dt_s[..., None]

    p0, dp = pathA[:, :-1], pathA[:, 1:] - pathA[:, :-1]          # (B, T-1, C)
    s0, ds = shpA[:, :-1], shpA[:, 1:] - shpA[:, :-1]             # (N, S-1, C)
    p_lo = p0[:, None, None, None] + r_p_lo[None, ..., None] * dp[:, None, None, None]
    p_hi = p0[:, None, None, None] + r_p_hi[None, ..., None] * dp[:, None, None, None]
    s_lo = s0[:, None, :, None] + r_s_lo[..., None] * ds[:, None, :, None]
    s_hi = s0[:, None, :, None] + r_s_hi[..., None] * ds[:, None, :, None]
    a = p_lo - s_lo[None]
    b = p_hi - s_hi[None]
    quad = jnp.sum(a * a + a * b + b * b, axis=-1)
    integral = jnp.sum(seg_len[None] * quad, axis=(-2, -1)) / 3.0
    return jnp.sqrt(jnp.min(integral, axis=-1))                   # (B, N)


if __name__ == "__main__":
    key = jax.random.PRNGKey(0)
    k_path, k_mod = jax.random.split(key)

    B, T, C = 2, 16, 4
    num_shapelets, S, lengths_per = 4, 8, 2

    times = jnp.linspace(0.0, 1.0, T, dtype=jnp.float32)
    path = jax.random.normal(k_path, (B, T, C), dtype=jnp.float32)

    module = GeneralisedShapeletTransform(
        k_mod, in_channels=C, num_shapelets=num_shapelets, num_shapelet_samples=S,
        max_shapelet_length=0.5, lengths_per_shapelet=lengths_per)

    out = module(times, path)
    out = jax.block_until_ready(out)
    assert out.shape == (B, num_shapelets * lengths_per), out.shape

    ref = shapelet_transform_reference(
        times, path, module.lengths,
        jnp.tile(module.shapelets, (lengths_per, 1, 1)),
        module.discrepancy_linear, T)
    assert jnp.allclose(out, ref, rtol=2e-3, atol=2e-3), (out, ref)

    print("KERNEL_OK")
</pallas_src>

<mosaic_0001>
module attributes {stable_mosaic.version = 11 : i64} {
  func.func @_shapelet_transform_kernel(%arg0: i32, %arg1: memref<8xf32, #tpu.memory_space<smem>>, %arg2: memref<2xf32, #tpu.memory_space<smem>>, %arg3: memref<256xf32, #tpu.memory_space<smem>>, %arg4: memref<4x8x128xf32, #tpu.memory_space<vmem>>, %arg5: memref<4x8x128xf32, #tpu.memory_space<vmem>>, %arg6: memref<8x128xf32, #tpu.memory_space<vmem>>, %arg7: memref<1x4x8xf32, #tpu.memory_space<vmem>>, %arg8: memref<16x8xf32, #tpu.memory_space<vmem>>) attributes {dimension_semantics = [#tpu.dimension_semantics<parallel>], iteration_bounds = array<i64: 2>, scalar_prefetch = 0 : i64, scratch_operands = 1 : i64, tpu.core_type = #tpu.core_type<tc>, window_params = [{transform_indices = @transform_0, window_bounds = array<i64: 8>}, {transform_indices = @transform_1, window_bounds = array<i64: 2>}, {transform_indices = @transform_2, window_bounds = array<i64: 256>}, {pipeline_mode = #tpu.pipeline_mode<synchronous>, transform_indices = @transform_3, window_bounds = array<i64: 4, 8, 128>}, {pipeline_mode = #tpu.pipeline_mode<synchronous>, transform_indices = @transform_4, window_bounds = array<i64: 4, 8, 128>}, {pipeline_mode = #tpu.pipeline_mode<synchronous>, transform_indices = @transform_5, window_bounds = array<i64: 8, 128>}, {transform_indices = @transform_6, window_bounds = array<i64: 1, 4, 8>}]} {
    %c0 = arith.constant 0 : index
    %0 = memref.load %arg2[%c0] : memref<2xf32, #tpu.memory_space<smem>>
    %c1 = arith.constant 1 : index
    %1 = memref.load %arg2[%c1] : memref<2xf32, #tpu.memory_space<smem>>
    %c0_0 = arith.constant 0 : index
    %c0_1 = arith.constant 0 : index
    %2 = vector.load %arg6[%c0_0, %c0_1] : memref<8x128xf32, #tpu.memory_space<vmem>>, vector<8x128xf32>
    %3 = vector.extract_strided_slice %2 {offsets = [0, 0], sizes = [1, 128], strides = [1, 1]} : vector<8x128xf32> to vector<1x128xf32>
    %4 = vector.extract_strided_slice %2 {offsets = [1, 0], sizes = [1, 128], strides = [1, 1]} : vector<8x128xf32> to vector<1x128xf32>
    %5 = vector.extract_strided_slice %2 {offsets = [2, 0], sizes = [1, 128], strides = [1, 1]} : vector<8x128xf32> to vector<1x128xf32>
    %c0_2 = arith.constant 0 : index
    %c0_3 = arith.constant 0 : index
    %c0_4 = arith.constant 0 : index
    %6 = vector.load %arg4[%c0_2, %c0_3, %c0_4] : memref<4x8x128xf32, #tpu.memory_space<vmem>>, vector<1x8x128xf32>
    %7 = vector.shape_cast %6 : vector<1x8x128xf32> to vector<8x128xf32>
    %c1_5 = arith.constant 1 : index
    %c0_6 = arith.constant 0 : index
    %c0_7 = arith.constant 0 : index
    %8 = vector.load %arg4[%c1_5, %c0_6, %c0_7] : memref<4x8x128xf32, #tpu.memory_space<vmem>>, vector<1x8x128xf32>
    %9 = vector.shape_cast %8 : vector<1x8x128xf32> to vector<8x128xf32>
    %c2 = arith.constant 2 : index
    %c0_8 = arith.constant 0 : index
    %c0_9 = arith.constant 0 : index
    %10 = vector.load %arg4[%c2, %c0_8, %c0_9] : memref<4x8x128xf32, #tpu.memory_space<vmem>>, vector<1x8x128xf32>
    %11 = vector.shape_cast %10 : vector<1x8x128xf32> to vector<8x128xf32>
    %c3 = arith.constant 3 : index
    %c0_10 = arith.constant 0 : index
    %c0_11 = arith.constant 0 : index
    %12 = vector.load %arg4[%c3, %c0_10, %c0_11] : memref<4x8x128xf32, #tpu.memory_space<vmem>>, vector<1x8x128xf32>
    %13 = vector.shape_cast %12 : vector<1x8x128xf32> to vector<8x128xf32>
    %c0_12 = arith.constant 0 : index
    %c0_13 = arith.constant 0 : index
    %c0_14 = arith.constant 0 : index
    %14 = vector.load %arg5[%c0_12, %c0_13, %c0_14] : memref<4x8x128xf32, #tpu.memory_space<vmem>>, vector<1x8x128xf32>
    %15 = vector.shape_cast %14 : vector<1x8x128xf32> to vector<8x128xf32>
    %c1_15 = arith.constant 1 : index
    %c0_16 = arith.constant 0 : index
    %c0_17 = arith.constant 0 : index
    %16 = vector.load %arg5[%c1_15, %c0_16, %c0_17] : memref<4x8x128xf32, #tpu.memory_space<vmem>>, vector<1x8x128xf32>
    %17 = vector.shape_cast %16 : vector<1x8x128xf32> to vector<8x128xf32>
    %c2_18 = arith.constant 2 : index
    %c0_19 = arith.constant 0 : index
    %c0_20 = arith.constant 0 : index
    %18 = vector.load %arg5[%c2_18, %c0_19, %c0_20] : memref<4x8x128xf32, #tpu.memory_space<vmem>>, vector<1x8x128xf32>
    %19 = vector.shape_cast %18 : vector<1x8x128xf32> to vector<8x128xf32>
    %c3_21 = arith.constant 3 : index
    %c0_22 = arith.constant 0 : index
    %c0_23 = arith.constant 0 : index
    %20 = vector.load %arg5[%c3_21, %c0_22, %c0_23] : memref<4x8x128xf32, #tpu.memory_space<vmem>>, vector<1x8x128xf32>
    %21 = vector.shape_cast %20 : vector<1x8x128xf32> to vector<8x128xf32>
    %22 = arith.mulf %15, %15 : vector<8x128xf32>
    %23 = arith.mulf %17, %17 : vector<8x128xf32>
    %24 = arith.addf %22, %23 : vector<8x128xf32>
    %25 = arith.mulf %19, %19 : vector<8x128xf32>
    %26 = arith.addf %24, %25 : vector<8x128xf32>
    %27 = arith.mulf %21, %21 : vector<8x128xf32>
    %28 = arith.addf %26, %27 : vector<8x128xf32>
    %29 = tpu.transpose %28, [1, 0] : vector<8x128xf32> -> vector<128x8xf32>
    %30 = tpu.iota {dimensions = array<i32: 0>} : vector<16x1xi32>
    %31 = arith.sitofp %30 : vector<16x1xi32> to vector<16x1xf32>
    %32 = tpu.iota {dimensions = array<i32: 0>} : vector<16x1xi32>
    %33 = tpu.iota {dimensions = array<i32: 0>} : vector<4x1xi32>
    %cst = arith.constant 0.000000e+00 : f32
    %34 = vector.broadcast %cst : f32 to vector<4x8xf32>
    %c0_i32 = arith.constant 0 : i32
    %c4_i32 = arith.constant 4 : i32
    %35 = arith.addi %c0_i32, %c4_i32 : i32
    %c1_i32 = arith.constant 1 : i32
    %36 = scf.for %arg9 = %c0_i32 to %35 step %c1_i32 iter_args(%arg10 = %34) -> (vector<4x8xf32>)  : i32 {
      %c4_i32_28 = arith.constant 4 : i32
      %40 = arith.muli %arg0, %c4_i32_28 : i32
      %41 = arith.addi %40, %arg9 : i32
      %42 = arith.index_cast %41 : i32 to index
      %43 = memref.load %arg1[%42] : memref<8xf32, #tpu.memory_space<smem>>
      %cst_29 = arith.constant 7.000000e+00 : f32
      %44 = arith.divf %43, %cst_29 : f32
      %cst_30 = arith.constant 0.000000e+00 : f32
      %45 = arith.cmpf ogt, %44, %cst_30 : f32
      %cst_31 = arith.constant 1.000000e-30 : f32
      %46 = arith.maximumf %44, %cst_31 : f32
      %cst_32 = arith.constant 1.000000e+00 : f32
      %47 = arith.divf %cst_32, %46 : f32
      %cst_33 = arith.constant 0.000000e+00 : f32
      %48 = arith.select %45, %47, %cst_33 : f32
      %49 = arith.subf %1, %43 : f32
      %50 = arith.subf %49, %0 : f32
      %cst_34 = arith.constant 1.500000e+01 : f32
      %51 = arith.divf %50, %cst_34 : f32
      %c32_i32 = arith.constant 32 : i32
      %52 = arith.muli %41, %c32_i32 : i32
      %cst_35 = arith.constant 0.000000e+00 : f32
      %53 = vector.broadcast %cst_35 : f32 to vector<16x8xf32>
      %c0_36 = arith.constant 0 : index
      %c0_37 = arith.constant 0 : index
      %54 = vector.load %arg8[%c0_36, %c0_37] : memref<16x8xf32, #tpu.memory_space<vmem>>, vector<16x8xf32>
      tpu.vector_store %arg8[%c0_36, %c0_37], %53 {strides = array<i32>} : memref<16x8xf32, #tpu.memory_space<vmem>>, vector<16x8xf32>,
      %c0_i32_38 = arith.constant 0 : i32
      %55 = arith.addi %52, %c0_i32_38 : i32
      %c0_i32_39 = arith.constant 0 : i32
      %56 = arith.addi %55, %c0_i32_39 : i32
      %57 = arith.index_cast %56 : i32 to index
      %58 = memref.load %arg3[%57] : memref<256xf32, #tpu.memory_space<smem>>
      %c0_i32_40 = arith.constant 0 : i32
      %59 = arith.addi %52, %c0_i32_40 : i32
      %c1_i32_41 = arith.constant 1 : i32
      %60 = arith.addi %59, %c1_i32_41 : i32
      %61 = arith.index_cast %60 : i32 to index
      %62 = memref.load %arg3[%61] : memref<256xf32, #tpu.memory_space<smem>>
      %c0_i32_42 = arith.constant 0 : i32
      %63 = arith.addi %52, %c0_i32_42 : i32
      %c2_i32 = arith.constant 2 : i32
      %64 = arith.addi %63, %c2_i32 : i32
      %65 = arith.index_cast %64 : i32 to index
      %66 = memref.load %arg3[%65] : memref<256xf32, #tpu.memory_space<smem>>
      %c0_i32_43 = arith.constant 0 : i32
      %67 = arith.addi %52, %c0_i32_43 : i32
      %c3_i32 = arith.constant 3 : i32
      %68 = arith.addi %67, %c3_i32 : i32
      %69 = arith.index_cast %68 : i32 to index
      %70 = memref.load %arg3[%69] : memref<256xf32, #tpu.memory_space<smem>>
      %c4_i32_44 = arith.constant 4 : i32
      %71 = arith.addi %52, %c4_i32_44 : i32
      %c0_i32_45 = arith.constant 0 : i32
      %72 = arith.addi %71, %c0_i32_45 : i32
      %73 = arith.index_cast %72 : i32 to index
      %74 = memref.load %arg3[%73] : memref<256xf32, #tpu.memory_space<smem>>
      %c4_i32_46 = arith.constant 4 : i32
      %75 = arith.addi %52, %c4_i32_46 : i32
      %c1_i32_47 = arith.constant 1 : i32
      %76 = arith.addi %75, %c1_i32_47 : i32
      %77 = arith.index_cast %76 : i32 to index
      %78 = memref.load %arg3[%77] : memref<256xf32, #tpu.memory_space<smem>>
      %c4_i32_48 = arith.constant 4 : i32
      %79 = arith.addi %52, %c4_i32_48 : i32
      %c2_i32_49 = arith.constant 2 : i32
      %80 = arith.addi %79, %c2_i32_49 : i32
      %81 = arith.index_cast %80 : i32 to index
      %82 = memref.load %arg3[%81] : memref<256xf32, #tpu.memory_space<smem>>
      %c4_i32_50 = arith.constant 4 : i32
      %83 = arith.addi %52, %c4_i32_50 : i32
      %c3_i32_51 = arith.constant 3 : i32
      %84 = arith.addi %83, %c3_i32_51 : i32
      %85 = arith.index_cast %84 : i32 to index
      %86 = memref.load %arg3[%85] : memref<256xf32, #tpu.memory_space<smem>>
      %87 = arith.subf %74, %58 : f32
      %88 = arith.subf %78, %62 : f32
      %89 = arith.subf %82, %66 : f32
      %90 = arith.subf %86, %70 : f32
      %91 = vector.broadcast %58 : f32 to vector<8x128xf32>
      %92 = arith.subf %7, %91 : vector<8x128xf32>
      %93 = arith.mulf %92, %92 : vector<8x128xf32>
      %94 = arith.mulf %92, %15 : vector<8x128xf32>
      %95 = vector.broadcast %87 : f32 to vector<8x128xf32>
      %96 = arith.mulf %92, %95 : vector<8x128xf32>
      %97 = vector.broadcast %87 : f32 to vector<8x128xf32>
      %98 = arith.mulf %15, %97 : vector<8x128xf32>
      %99 = arith.mulf %87, %87 : f32
      %100 = vector.broadcast %62 : f32 to vector<8x128xf32>
      %101 = arith.subf %9, %100 : vector<8x128xf32>
      %102 = arith.mulf %101, %101 : vector<8x128xf32>
      %103 = arith.addf %93, %102 : vector<8x128xf32>
      %104 = arith.mulf %101, %17 : vector<8x128xf32>
      %105 = arith.addf %94, %104 : vector<8x128xf32>
      %106 = vector.broadcast %88 : f32 to vector<8x128xf32>
      %107 = arith.mulf %101, %106 : vector<8x128xf32>
      %108 = arith.addf %96, %107 : vector<8x128xf32>
      %109 = vector.broadcast %88 : f32 to vector<8x128xf32>
      %110 = arith.mulf %17, %109 : vector<8x128xf32>
      %111 = arith.addf %98, %110 : vector<8x128xf32>
      %112 = arith.mulf %88, %88 : f32
      %113 = arith.addf %99, %112 : f32
      %114 = vector.broadcast %66 : f32 to vector<8x128xf32>
      %115 = arith.subf %11, %114 : vector<8x128xf32>
      %116 = arith.mulf %115, %115 : vector<8x128xf32>
      %117 = arith.addf %103, %116 : vector<8x128xf32>
      %118 = arith.mulf %115, %19 : vector<8x128xf32>
      %119 = arith.addf %105, %118 : vector<8x128xf32>
      %120 = vector.broadcast %89 : f32 to vector<8x128xf32>
      %121 = arith.mulf %115, %120 : vector<8x128xf32>
      %122 = arith.addf %108, %121 : vector<8x128xf32>
      %123 = vector.broadcast %89 : f32 to vector<8x128xf32>
      %124 = arith.mulf %19, %123 : vector<8x128xf32>
      %125 = arith.addf %111, %124 : vector<8x128xf32>
      %126 = arith.mulf %89, %89 : f32
      %127 = arith.addf %113, %126 : f32
      %128 = vector.broadcast %70 : f32 to vector<8x128xf32>
      %129 = arith.subf %13, %128 : vector<8x128xf32>
      %130 = arith.mulf %129, %129 : vector<8x128xf32>
      %131 = arith.addf %117, %130 : vector<8x128xf32>
      %132 = arith.mulf %129, %21 : vector<8x128xf32>
      %133 = arith.addf %119, %132 : vector<8x128xf32>
      %134 = vector.broadcast %90 : f32 to vector<8x128xf32>
      %135 = arith.mulf %129, %134 : vector<8x128xf32>
      %136 = arith.addf %122, %135 : vector<8x128xf32>
      %137 = vector.broadcast %90 : f32 to vector<8x128xf32>
      %138 = arith.mulf %21, %137 : vector<8x128xf32>
      %139 = arith.addf %125, %138 : vector<8x128xf32>
      %140 = arith.mulf %90, %90 : f32
      %141 = arith.addf %127, %140 : f32
      %cst_52 = arith.constant 3.000000e+00 : f32
      %142 = vector.broadcast %cst_52 : f32 to vector<8x128xf32>
      %143 = arith.mulf %142, %131 : vector<8x128xf32>
      %144 = tpu.transpose %143, [1, 0] : vector<8x128xf32> -> vector<128x8xf32>
      %cst_53 = arith.constant 3.000000e+00 : f32
      %145 = vector.broadcast %cst_53 : f32 to vector<8x128xf32>
      %146 = arith.mulf %145, %133 : vector<8x128xf32>
      %147 = tpu.transpose %146, [1, 0] : vector<8x128xf32> -> vector<128x8xf32>
      %cst_54 = arith.constant -3.000000e+00 : f32
      %148 = vector.broadcast %cst_54 : f32 to vector<8x128xf32>
      %149 = arith.mulf %148, %136 : vector<8x128xf32>
      %150 = tpu.transpose %149, [1, 0] : vector<8x128xf32> -> vector<128x8xf32>
      %cst_55 = arith.constant -1.000000e+00 : f32
      %151 = vector.broadcast %cst_55 : f32 to vector<8x128xf32>
      %152 = arith.mulf %151, %139 : vector<8x128xf32>
      %153 = tpu.transpose %152, [1, 0] : vector<8x128xf32> -> vector<128x8xf32>
      %cst_56 = arith.constant 0.000000e+00 : f32
      %154 = arith.mulf %cst_56, %44 : f32
      %c0_i32_57 = arith.constant 0 : i32
      %c16_i32 = arith.constant 16 : i32
      %155 = arith.muli %c0_i32_57, %c16_i32 : i32
      %156 = arith.sitofp %155 : i32 to f32
      %157 = vector.broadcast %156 : f32 to vector<16x1xf32>
      %158 = arith.addf %157, %31 : vector<16x1xf32>
      %159 = vector.broadcast %51 : f32 to vector<16x1xf32>
      %160 = arith.mulf %158, %159 : vector<16x1xf32>
      %161 = vector.broadcast %0 : f32 to vector<16x1xf32>
      %162 = arith.addf %161, %160 : vector<16x1xf32>
      %163 = vector.broadcast %154 : f32 to vector<16x1xf32>
      %164 = arith.addf %162, %163 : vector<16x1xf32>
      %165 = vector.broadcast %164 : vector<16x1xf32> to vector<16x128xf32>
      %166 = vector.broadcast %3 : vector<1x128xf32> to vector<16x128xf32>
      %167 = arith.maximumf %165, %166 : vector<16x128xf32>
      %168 = vector.broadcast %44 : f32 to vector<16x1xf32>
      %169 = arith.addf %164, %168 : vector<16x1xf32>
      %170 = vector.broadcast %169 : vector<16x1xf32> to vector<16x128xf32>
      %171 = vector.broadcast %4 : vector<1x128xf32> to vector<16x128xf32>
      %172 = arith.minimumf %170, %171 : vector<16x128xf32>
      %173 = arith.subf %172, %167 : vector<16x128xf32>
      %cst_58 = arith.constant 0.000000e+00 : f32
      %174 = vector.broadcast %cst_58 : f32 to vector<16x128xf32>
      %175 = arith.maximumf %173, %174 : vector<16x128xf32>
      %176 = vector.broadcast %3 : vector<1x128xf32> to vector<16x128xf32>
      %177 = arith.subf %167, %176 : vector<16x128xf32>
      %178 = vector.broadcast %5 : vector<1x128xf32> to vector<16x128xf32>
      %179 = arith.mulf %177, %178 : vector<16x128xf32>
      %180 = vector.broadcast %5 : vector<1x128xf32> to vector<16x128xf32>
      %181 = arith.mulf %175, %180 : vector<16x128xf32>
      %182 = arith.addf %179, %181 : vector<16x128xf32>
      %183 = vector.broadcast %164 : vector<16x1xf32> to vector<16x128xf32>
      %184 = arith.subf %167, %183 : vector<16x128xf32>
      %185 = vector.broadcast %48 : f32 to vector<16x128xf32>
      %186 = arith.mulf %184, %185 : vector<16x128xf32>
      %187 = vector.broadcast %48 : f32 to vector<16x128xf32>
      %188 = arith.mulf %175, %187 : vector<16x128xf32>
      %189 = arith.addf %186, %188 : vector<16x128xf32>
      %190 = arith.addf %179, %182 : vector<16x128xf32>
      %191 = arith.addf %186, %189 : vector<16x128xf32>
      %192 = arith.mulf %190, %190 : vector<16x128xf32>
      %193 = arith.mulf %179, %182 : vector<16x128xf32>
      %194 = arith.subf %192, %193 : vector<16x128xf32>
      %195 = arith.mulf %191, %191 : vector<16x128xf32>
      %196 = arith.mulf %186, %189 : vector<16x128xf32>
      %197 = arith.subf %195, %196 : vector<16x128xf32>
      %198 = arith.mulf %190, %191 : vector<16x128xf32>
      %199 = arith.mulf %179, %186 : vector<16x128xf32>
      %200 = arith.mulf %182, %189 : vector<16x128xf32>
      %201 = arith.addf %199, %200 : vector<16x128xf32>
      %202 = arith.addf %198, %201 : vector<16x128xf32>
      %cst_59 = arith.constant dense<0.000000e+00> : vector<16x8xf32>
      %203 = tpu.matmul %175, %144, %cst_59 {dimension_numbers = #tpu.dot_dimension_numbers<[1], [0], [0], [1], [0, 0, 1, 1], [], []>} : vector<16x128xf32>, vector<128x8xf32>, vector<16x8xf32> -> vector<16x8xf32>
      %204 = arith.mulf %175, %194 : vector<16x128xf32>
      %cst_60 = arith.constant dense<0.000000e+00> : vector<16x8xf32>
      %205 = tpu.matmul %204, %29, %cst_60 {dimension_numbers = #tpu.dot_dimension_numbers<[1], [0], [0], [1], [0, 0, 1, 1], [], []>} : vector<16x128xf32>, vector<128x8xf32>, vector<16x8xf32> -> vector<16x8xf32>
      %206 = arith.addf %203, %205 : vector<16x8xf32>
      %207 = arith.mulf %175, %190 : vector<16x128xf32>
      %cst_61 = arith.constant dense<0.000000e+00> : vector<16x8xf32>
      %208 = tpu.matmul %207, %147, %cst_61 {dimension_numbers = #tpu.dot_dimension_numbers<[1], [0], [0], [1], [0, 0, 1, 1], [], []>} : vector<16x128xf32>, vector<128x8xf32>, vector<16x8xf32> -> vector<16x8xf32>
      %209 = arith.addf %206, %208 : vector<16x8xf32>
      %210 = arith.mulf %175, %191 : vector<16x128xf32>
      %cst_62 = arith.constant dense<0.000000e+00> : vector<16x8xf32>
      %211 = tpu.matmul %210, %150, %cst_62 {dimension_numbers = #tpu.dot_dimension_numbers<[1], [0], [0], [1], [0, 0, 1, 1], [], []>} : vector<16x128xf32>, vector<128x8xf32>, vector<16x8xf32> -> vector<16x8xf32>
      %212 = arith.addf %209, %211 : vector<16x8xf32>
      %213 = arith.mulf %175, %202 : vector<16x128xf32>
      %cst_63 = arith.constant dense<0.000000e+00> : vector<16x8xf32>
      %214 = tpu.matmul %213, %153, %cst_63 {dimension_numbers = #tpu.dot_dimension_numbers<[1], [0], [0], [1], [0, 0, 1, 1], [], []>} : vector<16x128xf32>, vector<128x8xf32>, vector<16x8xf32> -> vector<16x8xf32>
      %215 = arith.addf %212, %214 : vector<16x8xf32>
      %216 = arith.mulf %175, %197 : vector<16x128xf32>
      %cst_64 = arith.constant dense<0.000000e+00> : vector<16xf32>
      %217 = vector.multi_reduction <add>, %216, %cst_64 [1] : vector<16x128xf32> to vector<16xf32>
      %218 = vector.shape_cast %217 : vector<16xf32> to vector<16x1xf32>
      %219 = vector.broadcast %141 : f32 to vector<16x1xf32>
      %220 = arith.mulf %219, %218 : vector<16x1xf32>
      %221 = vector.broadcast %220 : vector<16x1xf32> to vector<16x8xf32>
      %222 = arith.addf %215, %221 : vector<16x8xf32>
      %c0_65 = arith.constant 0 : index
      %c0_66 = arith.constant 0 : index
      %223 = vector.load %arg8[%c0_65, %c0_66] : memref<16x8xf32, #tpu.memory_space<vmem>>, vector<16x8xf32>
      %224 = arith.addf %223, %222 : vector<16x8xf32>
      %c0_67 = arith.constant 0 : index
      %c0_68 = arith.constant 0 : index
      %225 = vector.load %arg8[%c0_67, %c0_68] : memref<16x8xf32, #tpu.memory_space<vmem>>, vector<16x8xf32>
      tpu.vector_store %arg8[%c0_67, %c0_68], %224 {strides = array<i32>} : memref<16x8xf32, #tpu.memory_space<vmem>>, vector<16x8xf32>,
      %c1_i32_69 = arith.constant 1 : i32
      %c4_i32_70 = arith.constant 4 : i32
      %226 = arith.addi %52, %c4_i32_70 : i32
      %c0_i32_71 = arith.constant 0 : i32
      %227 = arith.addi %226, %c0_i32_71 : i32
      %228 = arith.index_cast %227 : i32 to index
      %229 = memref.load %arg3[%228] : memref<256xf32, #tpu.memory_space<smem>>
      %c4_i32_72 = arith.constant 4 : i32
      %230 = arith.addi %52, %c4_i32_72 : i32
      %c1_i32_73 = arith.constant 1 : i32
      %231 = arith.addi %230, %c1_i32_73 : i32
      %232 = arith.index_cast %231 : i32 to index
      %233 = memref.load %arg3[%232] : memref<256xf32, #tpu.memory_space<smem>>
      %c4_i32_74 = arith.constant 4 : i32
      %234 = arith.addi %52, %c4_i32_74 : i32
      %c2_i32_75 = arith.constant 2 : i32
      %235 = arith.addi %234, %c2_i32_75 : i32
      %236 = arith.index_cast %235 : i32 to index
      %237 = memref.load %arg3[%236] : memref<256xf32, #tpu.memory_space<smem>>
      %c4_i32_76 = arith.constant 4 : i32
      %238 = arith.addi %52, %c4_i32_76 : i32
      %c3_i32_77 = arith.constant 3 : i32
      %239 = arith.addi %238, %c3_i32_77 : i32
      %240 = arith.index_cast %239 : i32 to index
      %241 = memref.load %arg3[%240] : memref<256xf32, #tpu.memory_space<smem>>
      %c8_i32 = arith.constant 8 : i32
      %242 = arith.addi %52, %c8_i32 : i32
      %c0_i32_78 = arith.constant 0 : i32
      %243 = arith.addi %242, %c0_i32_78 : i32
      %244 = arith.index_cast %243 : i32 to index
      %245 = memref.load %arg3[%244] : memref<256xf32, #tpu.memory_space<smem>>
      %c8_i32_79 = arith.constant 8 : i32
      %246 = arith.addi %52, %c8_i32_79 : i32
      %c1_i32_80 = arith.constant 1 : i32
      %247 = arith.addi %246, %c1_i32_80 : i32
      %248 = arith.index_cast %247 : i32 to index
      %249 = memref.load %arg3[%248] : memref<256xf32, #tpu.memory_space<smem>>
      %c8_i32_81 = arith.constant 8 : i32
      %250 = arith.addi %52, %c8_i32_81 : i32
      %c2_i32_82 = arith.constant 2 : i32
      %251 = arith.addi %250, %c2_i32_82 : i32
      %252 = arith.index_cast %251 : i32 to index
      %253 = memref.load %arg3[%252] : memref<256xf32, #tpu.memory_space<smem>>
      %c8_i32_83 = arith.constant 8 : i32
      %254 = arith.addi %52, %c8_i32_83 : i32
      %c3_i32_84 = arith.constant 3 : i32
      %255 = arith.addi %254, %c3_i32_84 : i32
      %256 = arith.index_cast %255 : i32 to index
      %257 = memref.load %arg3[%256] : memref<256xf32, #tpu.memory_space<smem>>
      %258 = arith.subf %245, %229 : f32
      %259 = arith.subf %249, %233 : f32
      %260 = arith.subf %253, %237 : f32
      %261 = arith.subf %257, %241 : f32
      %262 = vector.broadcast %229 : f32 to vector<8x128xf32>
      %263 = arith.subf %7, %262 : vector<8x128xf32>
      %264 = arith.mulf %263, %263 : vector<8x128xf32>
      %265 = arith.mulf %263, %15 : vector<8x128xf32>
      %266 = vector.broadcast %258 : f32 to vector<8x128xf32>
      %267 = arith.mulf %263, %266 : vector<8x128xf32>
      %268 = vector.broadcast %258 : f32 to vector<8x128xf32>
      %269 = arith.mulf %15, %268 : vector<8x128xf32>
      %270 = arith.mulf %258, %258 : f32
      %271 = vector.broadcast %233 : f32 to vector<8x128xf32>
      %272 = arith.subf %9, %271 : vector<8x128xf32>
      %273 = arith.mulf %272, %272 : vector<8x128xf32>
      %274 = arith.addf %264, %273 : vector<8x128xf32>
      %275 = arith.mulf %272, %17 : vector<8x128xf32>
      %276 = arith.addf %265, %275 : vector<8x128xf32>
      %277 = vector.broadcast %259 : f32 to vector<8x128xf32>
      %278 = arith.mulf %272, %277 : vector<8x128xf32>
      %279 = arith.addf %267, %278 : vector<8x128xf32>
      %280 = vector.broadcast %259 : f32 to vector<8x128xf32>
      %281 = arith.mulf %17, %280 : vector<8x128xf32>
      %282 = arith.addf %269, %281 : vector<8x128xf32>
      %283 = arith.mulf %259, %259 : f32
      %284 = arith.addf %270, %283 : f32
      %285 = vector.broadcast %237 : f32 to vector<8x128xf32>
      %286 = arith.subf %11, %285 : vector<8x128xf32>
      %287 = arith.mulf %286, %286 : vector<8x128xf32>
      %288 = arith.addf %274, %287 : vector<8x128xf32>
      %289 = arith.mulf %286, %19 : vector<8x128xf32>
      %290 = arith.addf %276, %289 : vector<8x128xf32>
      %291 = vector.broadcast %260 : f32 to vector<8x128xf32>
      %292 = arith.mulf %286, %291 : vector<8x128xf32>
      %293 = arith.addf %279, %292 : vector<8x128xf32>
      %294 = vector.broadcast %260 : f32 to vector<8x128xf32>
      %295 = arith.mulf %19, %294 : vector<8x128xf32>
      %296 = arith.addf %282, %295 : vector<8x128xf32>
      %297 = arith.mulf %260, %260 : f32
      %298 = arith.addf %284, %297 : f32
      %299 = vector.broadcast %241 : f32 to vector<8x128xf32>
      %300 = arith.subf %13, %299 : vector<8x128xf32>
      %301 = arith.mulf %300, %300 : vector<8x128xf32>
      %302 = arith.addf %288, %301 : vector<8x128xf32>
      %303 = arith.mulf %300, %21 : vector<8x128xf32>
      %304 = arith.addf %290, %303 : vector<8x128xf32>
      %305 = vector.broadcast %261 : f32 to vector<8x128xf32>
      %306 = arith.mulf %300, %305 : vector<8x128xf32>
      %307 = arith.addf %293, %306 : vector<8x128xf32>
      %308 = vector.broadcast %261 : f32 to vector<8x128xf32>
      %309 = arith.mulf %21, %308 : vector<8x128xf32>
      %310 = arith.addf %296, %309 : vector<8x128xf32>
      %311 = arith.mulf %261, %261 : f32
      %312 = arith.addf %298, %311 : f32
      %cst_85 = arith.constant 3.000000e+00 : f32
      %313 = vector.broadcast %cst_85 : f32 to vector<8x128xf32>
      %314 = arith.mulf %313, %302 : vector<8x128xf32>
      %315 = tpu.transpose %314, [1, 0] : vector<8x128xf32> -> vector<128x8xf32>
      %cst_86 = arith.constant 3.000000e+00 : f32
      %316 = vector.broadcast %cst_86 : f32 to vector<8x128xf32>
      %317 = arith.mulf %316, %304 : vector<8x128xf32>
      %318 = tpu.transpose %317, [1, 0] : vector<8x128xf32> -> vector<128x8xf32>
      %cst_87 = arith.constant -3.000000e+00 : f32
      %319 = vector.broadcast %cst_87 : f32 to vector<8x128xf32>
      %320 = arith.mulf %319, %307 : vector<8x128xf32>
      %321 = tpu.transpose %320, [1, 0] : vector<8x128xf32> -> vector<128x8xf32>
      %cst_88 = arith.constant -1.000000e+00 : f32
      %322 = vector.broadcast %cst_88 : f32 to vector<8x128xf32>
      %323 = arith.mulf %322, %310 : vector<8x128xf32>
      %324 = tpu.transpose %323, [1, 0] : vector<8x128xf32> -> vector<128x8xf32>
      %cst_89 = arith.constant 1.000000e+00 : f32
      %325 = arith.mulf %cst_89, %44 : f32
      %c0_i32_90 = arith.constant 0 : i32
      %c16_i32_91 = arith.constant 16 : i32
      %326 = arith.muli %c0_i32_90, %c16_i32_91 : i32
      %327 = arith.sitofp %326 : i32 to f32
      %328 = vector.broadcast %327 : f32 to vector<16x1xf32>
      %329 = arith.addf %328, %31 : vector<16x1xf32>
      %330 = vector.broadcast %51 : f32 to vector<16x1xf32>
      %331 = arith.mulf %329, %330 : vector<16x1xf32>
      %332 = vector.broadcast %0 : f32 to vector<16x1xf32>
      %333 = arith.addf %332, %331 : vector<16x1xf32>
      %334 = vector.broadcast %325 : f32 to vector<16x1xf32>
      %335 = arith.addf %333, %334 : vector<16x1xf32>
      %336 = vector.broadcast %335 : vector<16x1xf32> to vector<16x128xf32>
      %337 = vector.broadcast %3 : vector<1x128xf32> to vector<16x128xf32>
      %338 = arith.maximumf %336, %337 : vector<16x128xf32>
      %339 = vector.broadcast %44 : f32 to vector<16x1xf32>
      %340 = arith.addf %335, %339 : vector<16x1xf32>
      %341 = vector.broadcast %340 : vector<16x1xf32> to vector<16x128xf32>
      %342 = vector.broadcast %4 : vector<1x128xf32> to vector<16x128xf32>
      %343 = arith.minimumf %341, %342 : vector<16x128xf32>
      %344 = arith.subf %343, %338 : vector<16x128xf32>
      %cst_92 = arith.constant 0.000000e+00 : f32
      %345 = vector.broadcast %cst_92 : f32 to vector<16x128xf32>
      %346 = arith.maximumf %344, %345 : vector<16x128xf32>
      %347 = vector.broadcast %3 : vector<1x128xf32> to vector<16x128xf32>
      %348 = arith.subf %338, %347 : vector<16x128xf32>
      %349 = vector.broadcast %5 : vector<1x128xf32> to vector<16x128xf32>
      %350 = arith.mulf %348, %349 : vector<16x128xf32>
      %351 = vector.broadcast %5 : vector<1x128xf32> to vector<16x128xf32>
      %352 = arith.mulf %346, %351 : vector<16x128xf32>
      %353 = arith.addf %350, %352 : vector<16x128xf32>
      %354 = vector.broadcast %335 : vector<16x1xf32> to vector<16x128xf32>
      %355 = arith.subf %338, %354 : vector<16x128xf32>
      %356 = vector.broadcast %48 : f32 to vector<16x128xf32>
      %357 = arith.mulf %355, %356 : vector<16x128xf32>
      %358 = vector.broadcast %48 : f32 to vector<16x128xf32>
      %359 = arith.mulf %346, %358 : vector<16x128xf32>
      %360 = arith.addf %357, %359 : vector<16x128xf32>
      %361 = arith.addf %350, %353 : vector<16x128xf32>
      %362 = arith.addf %357, %360 : vector<16x128xf32>
      %363 = arith.mulf %361, %361 : vector<16x128xf32>
      %364 = arith.mulf %350, %353 : vector<16x128xf32>
      %365 = arith.subf %363, %364 : vector<16x128xf32>
      %366 = arith.mulf %362, %362 : vector<16x128xf32>
      %367 = arith.mulf %357, %360 : vector<16x128xf32>
      %368 = arith.subf %366, %367 : vector<16x128xf32>
      %369 = arith.mulf %361, %362 : vector<16x128xf32>
      %370 = arith.mulf %350, %357 : vector<16x128xf32>
      %371 = arith.mulf %353, %360 : vector<16x128xf32>
      %372 = arith.addf %370, %371 : vector<16x128xf32>
      %373 = arith.addf %369, %372 : vector<16x128xf32>
      %cst_93 = arith.constant dense<0.000000e+00> : vector<16x8xf32>
      %374 = tpu.matmul %346, %315, %cst_93 {dimension_numbers = #tpu.dot_dimension_numbers<[1], [0], [0], [1], [0, 0, 1, 1], [], []>} : vector<16x128xf32>, vector<128x8xf32>, vector<16x8xf32> -> vector<16x8xf32>
      %375 = arith.mulf %346, %365 : vector<16x128xf32>
      %cst_94 = arith.constant dense<0.000000e+00> : vector<16x8xf32>
      %376 = tpu.matmul %375, %29, %cst_94 {dimension_numbers = #tpu.dot_dimension_numbers<[1], [0], [0], [1], [0, 0, 1, 1], [], []>} : vector<16x128xf32>, vector<128x8xf32>, vector<16x8xf32> -> vector<16x8xf32>
      %377 = arith.addf %374, %376 : vector<16x8xf32>
      %378 = arith.mulf %346, %361 : vector<16x128xf32>
      %cst_95 = arith.constant dense<0.000000e+00> : vector<16x8xf32>
      %379 = tpu.matmul %378, %318, %cst_95 {dimension_numbers = #tpu.dot_dimension_numbers<[1], [0], [0], [1], [0, 0, 1, 1], [], []>} : vector<16x128xf32>, vector<128x8xf32>, vector<16x8xf32> -> vector<16x8xf32>
      %380 = arith.addf %377, %379 : vector<16x8xf32>
      %381 = arith.mulf %346, %362 : vector<16x128xf32>
      %cst_96 = arith.constant dense<0.000000e+00> : vector<16x8xf32>
      %382 = tpu.matmul %381, %321, %cst_96 {dimension_numbers = #tpu.dot_dimension_numbers<[1], [0], [0], [1], [0, 0, 1, 1], [], []>} : vector<16x128xf32>, vector<128x8xf32>, vector<16x8xf32> -> vector<16x8xf32>
      %383 = arith.addf %380, %382 : vector<16x8xf32>
      %384 = arith.mulf %346, %373 : vector<16x128xf32>
      %cst_97 = arith.constant dense<0.000000e+00> : vector<16x8xf32>
      %385 = tpu.matmul %384, %324, %cst_97 {dimension_numbers = #tpu.dot_dimension_numbers<[1], [0], [0], [1], [0, 0, 1, 1], [], []>} : vector<16x128xf32>, vector<128x8xf32>, vector<16x8xf32> -> vector<16x8xf32>
      %386 = arith.addf %383, %385 : vector<16x8xf32>
      %387 = arith.mulf %346, %368 : vector<16x128xf32>
      %cst_98 = arith.constant dense<0.000000e+00> : vector<16xf32>
      %388 = vector.multi_reduction <add>, %387, %cst_98 [1] : vector<16x128xf32> to vector<16xf32>
      %389 = vector.shape_cast %388 : vector<16xf32> to vector<16x1xf32>
      %390 = vector.broadcast %312 : f32 to vector<16x1xf32>
      %391 = arith.mulf %390, %389 : vector<16x1xf32>
      %392 = vector.broadcast %391 : vector<16x1xf32> to vector<16x8xf32>
      %393 = arith.addf %386, %392 : vector<16x8xf32>
      %c0_99 = arith.constant 0 : index
      %c0_100 = arith.constant 0 : index
      %394 = vector.load %arg8[%c0_99, %c0_100] : memref<16x8xf32, #tpu.memory_space<vmem>>, vector<16x8xf32>
      %395 = arith.addf %394, %393 : vector<16x8xf32>
      %c0_101 = arith.constant 0 : index
      %c0_102 = arith.constant 0 : index
      %396 = vector.load %arg8[%c0_101, %c0_102] : memref<16x8xf32, #tpu.memory_space<vmem>>, vector<16x8xf32>
      tpu.vector_store %arg8[%c0_101, %c0_102], %395 {strides = array<i32>} : memref<16x8xf32, #tpu.memory_space<vmem>>, vector<16x8xf32>,
      %c1_i32_103 = arith.constant 1 : i32
      %c8_i32_104 = arith.constant 8 : i32
      %397 = arith.addi %52, %c8_i32_104 : i32
      %c0_i32_105 = arith.constant 0 : i32
      %398 = arith.addi %397, %c0_i32_105 : i32
      %399 = arith.index_cast %398 : i32 to index
      %400 = memref.load %arg3[%399] : memref<256xf32, #tpu.memory_space<smem>>
      %c8_i32_106 = arith.constant 8 : i32
      %401 = arith.addi %52, %c8_i32_106 : i32
      %c1_i32_107 = arith.constant 1 : i32
      %402 = arith.addi %401, %c1_i32_107 : i32
      %403 = arith.index_cast %402 : i32 to index
      %404 = memref.load %arg3[%403] : memref<256xf32, #tpu.memory_space<smem>>
      %c8_i32_108 = arith.constant 8 : i32
      %405 = arith.addi %52, %c8_i32_108 : i32
      %c2_i32_109 = arith.constant 2 : i32
      %406 = arith.addi %405, %c2_i32_109 : i32
      %407 = arith.index_cast %406 : i32 to index
      %408 = memref.load %arg3[%407] : memref<256xf32, #tpu.memory_space<smem>>
      %c8_i32_110 = arith.constant 8 : i32
      %409 = arith.addi %52, %c8_i32_110 : i32
      %c3_i32_111 = arith.constant 3 : i32
      %410 = arith.addi %409, %c3_i32_111 : i32
      %411 = arith.index_cast %410 : i32 to index
      %412 = memref.load %arg3[%411] : memref<256xf32, #tpu.memory_space<smem>>
      %c12_i32 = arith.constant 12 : i32
      %413 = arith.addi %52, %c12_i32 : i32
      %c0_i32_112 = arith.constant 0 : i32
      %414 = arith.addi %413, %c0_i32_112 : i32
      %415 = arith.index_cast %414 : i32 to index
      %416 = memref.load %arg3[%415] : memref<256xf32, #tpu.memory_space<smem>>
      %c12_i32_113 = arith.constant 12 : i32
      %417 = arith.addi %52, %c12_i32_113 : i32
      %c1_i32_114 = arith.constant 1 : i32
      %418 = arith.addi %417, %c1_i32_114 : i32
      %419 = arith.index_cast %418 : i32 to index
      %420 = memref.load %arg3[%419] : memref<256xf32, #tpu.memory_space<smem>>
      %c12_i32_115 = arith.constant 12 : i32
      %421 = arith.addi %52, %c12_i32_115 : i32
      %c2_i32_116 = arith.constant 2 : i32
      %422 = arith.addi %421, %c2_i32_116 : i32
      %423 = arith.index_cast %422 : i32 to index
      %424 = memref.load %arg3[%423] : memref<256xf32, #tpu.memory_space<smem>>
      %c12_i32_117 = arith.constant 12 : i32
      %425 = arith.addi %52, %c12_i32_117 : i32
      %c3_i32_118 = arith.constant 3 : i32
      %426 = arith.addi %425, %c3_i32_118 : i32
      %427 = arith.index_cast %426 : i32 to index
      %428 = memref.load %arg3[%427] : memref<256xf32, #tpu.memory_space<smem>>
      %429 = arith.subf %416, %400 : f32
      %430 = arith.subf %420, %404 : f32
      %431 = arith.subf %424, %408 : f32
      %432 = arith.subf %428, %412 : f32
      %433 = vector.broadcast %400 : f32 to vector<8x128xf32>
      %434 = arith.subf %7, %433 : vector<8x128xf32>
      %435 = arith.mulf %434, %434 : vector<8x128xf32>
      %436 = arith.mulf %434, %15 : vector<8x128xf32>
      %437 = vector.broadcast %429 : f32 to vector<8x128xf32>
      %438 = arith.mulf %434, %437 : vector<8x128xf32>
      %439 = vector.broadcast %429 : f32 to vector<8x128xf32>
      %440 = arith.mulf %15, %439 : vector<8x128xf32>
      %441 = arith.mulf %429, %429 : f32
      %442 = vector.broadcast %404 : f32 to vector<8x128xf32>
      %443 = arith.subf %9, %442 : vector<8x128xf32>
      %444 = arith.mulf %443, %443 : vector<8x128xf32>
      %445 = arith.addf %435, %444 : vector<8x128xf32>
      %446 = arith.mulf %443, %17 : vector<8x128xf32>
      %447 = arith.addf %436, %446 : vector<8x128xf32>
      %448 = vector.broadcast %430 : f32 to vector<8x128xf32>
      %449 = arith.mulf %443, %448 : vector<8x128xf32>
      %450 = arith.addf %438, %449 : vector<8x128xf32>
      %451 = vector.broadcast %430 : f32 to vector<8x128xf32>
      %452 = arith.mulf %17, %451 : vector<8x128xf32>
      %453 = arith.addf %440, %452 : vector<8x128xf32>
      %454 = arith.mulf %430, %430 : f32
      %455 = arith.addf %441, %454 : f32
      %456 = vector.broadcast %408 : f32 to vector<8x128xf32>
      %457 = arith.subf %11, %456 : vector<8x128xf32>
      %458 = arith.mulf %457, %457 : vector<8x128xf32>
      %459 = arith.addf %445, %458 : vector<8x128xf32>
      %460 = arith.mulf %457, %19 : vector<8x128xf32>
      %461 = arith.addf %447, %460 : vector<8x128xf32>
      %462 = vector.broadcast %431 : f32 to vector<8x128xf32>
      %463 = arith.mulf %457, %462 : vector<8x128xf32>
      %464 = arith.addf %450, %463 : vector<8x128xf32>
      %465 = vector.broadcast %431 : f32 to vector<8x128xf32>
      %466 = arith.mulf %19, %465 : vector<8x128xf32>
      %467 = arith.addf %453, %466 : vector<8x128xf32>
      %468 = arith.mulf %431, %431 : f32
      %469 = arith.addf %455, %468 : f32
      %470 = vector.broadcast %412 : f32 to vector<8x128xf32>
      %471 = arith.subf %13, %470 : vector<8x128xf32>
      %472 = arith.mulf %471, %471 : vector<8x128xf32>
      %473 = arith.addf %459, %472 : vector<8x128xf32>
      %474 = arith.mulf %471, %21 : vector<8x128xf32>
      %475 = arith.addf %461, %474 : vector<8x128xf32>
      %476 = vector.broadcast %432 : f32 to vector<8x128xf32>
      %477 = arith.mulf %471, %476 : vector<8x128xf32>
      %478 = arith.addf %464, %477 : vector<8x128xf32>
      %479 = vector.broadcast %432 : f32 to vector<8x128xf32>
      %480 = arith.mulf %21, %479 : vector<8x128xf32>
      %481 = arith.addf %467, %480 : vector<8x128xf32>
      %482 = arith.mulf %432, %432 : f32
      %483 = arith.addf %469, %482 : f32
      %cst_119 = arith.constant 3.000000e+00 : f32
      %484 = vector.broadcast %cst_119 : f32 to vector<8x128xf32>
      %485 = arith.mulf %484, %473 : vector<8x128xf32>
      %486 = tpu.transpose %485, [1, 0] : vector<8x128xf32> -> vector<128x8xf32>
      %cst_120 = arith.constant 3.000000e+00 : f32
      %487 = vector.broadcast %cst_120 : f32 to vector<8x128xf32>
      %488 = arith.mulf %487, %475 : vector<8x128xf32>
      %489 = tpu.transpose %488, [1, 0] : vector<8x128xf32> -> vector<128x8xf32>
      %cst_121 = arith.constant -3.000000e+00 : f32
      %490 = vector.broadcast %cst_121 : f32 to vector<8x128xf32>
      %491 = arith.mulf %490, %478 : vector<8x128xf32>
      %492 = tpu.transpose %491, [1, 0] : vector<8x128xf32> -> vector<128x8xf32>
      %cst_122 = arith.constant -1.000000e+00 : f32
      %493 = vector.broadcast %cst_122 : f32 to vector<8x128xf32>
      %494 = arith.mulf %493, %481 : vector<8x128xf32>
      %495 = tpu.transpose %494, [1, 0] : vector<8x128xf32> -> vector<128x8xf32>
      %cst_123 = arith.constant 2.000000e+00 : f32
      %496 = arith.mulf %cst_123, %44 : f32
      %c0_i32_124 = arith.constant 0 : i32
      %c16_i32_125 = arith.constant 16 : i32
      %497 = arith.muli %c0_i32_124, %c16_i32_125 : i32
      %498 = arith.sitofp %497 : i32 to f32
      %499 = vector.broadcast %498 : f32 to vector<16x1xf32>
      %500 = arith.addf %499, %31 : vector<16x1xf32>
      %501 = vector.broadcast %51 : f32 to vector<16x1xf32>
      %502 = arith.mulf %500, %501 : vector<16x1xf32>
      %503 = vector.broadcast %0 : f32 to vector<16x1xf32>
      %504 = arith.addf %503, %502 : vector<16x1xf32>
      %505 = vector.broadcast %496 : f32 to vector<16x1xf32>
      %506 = arith.addf %504, %505 : vector<16x1xf32>
      %507 = vector.broadcast %506 : vector<16x1xf32> to vector<16x128xf32>
      %508 = vector.broadcast %3 : vector<1x128xf32> to vector<16x128xf32>
      %509 = arith.maximumf %507, %508 : vector<16x128xf32>
      %510 = vector.broadcast %44 : f32 to vector<16x1xf32>
      %511 = arith.addf %506, %510 : vector<16x1xf32>
      %512 = vector.broadcast %511 : vector<16x1xf32> to vector<16x128xf32>
      %513 = vector.broadcast %4 : vector<1x128xf32> to vector<16x128xf32>
      %514 = arith.minimumf %512, %513 : vector<16x128xf32>
      %515 = arith.subf %514, %509 : vector<16x128xf32>
      %cst_126 = arith.constant 0.000000e+00 : f32
      %516 = vector.broadcast %cst_126 : f32 to vector<16x128xf32>
      %517 = arith.maximumf %515, %516 : vector<16x128xf32>
      %518 = vector.broadcast %3 : vector<1x128xf32> to vector<16x128xf32>
      %519 = arith.subf %509, %518 : vector<16x128xf32>
      %520 = vector.broadcast %5 : vector<1x128xf32> to vector<16x128xf32>
      %521 = arith.mulf %519, %520 : vector<16x128xf32>
      %522 = vector.broadcast %5 : vector<1x128xf32> to vector<16x128xf32>
      %523 = arith.mulf %517, %522 : vector<16x128xf32>
      %524 = arith.addf %521, %523 : vector<16x128xf32>
      %525 = vector.broadcast %506 : vector<16x1xf32> to vector<16x128xf32>
      %526 = arith.subf %509, %525 : vector<16x128xf32>
      %527 = vector.broadcast %48 : f32 to vector<16x128xf32>
      %528 = arith.mulf %526, %527 : vector<16x128xf32>
      %529 = vector.broadcast %48 : f32 to vector<16x128xf32>
      %530 = arith.mulf %517, %529 : vector<16x128xf32>
      %531 = arith.addf %528, %530 : vector<16x128xf32>
      %532 = arith.addf %521, %524 : vector<16x128xf32>
      %533 = arith.addf %528, %531 : vector<16x128xf32>
      %534 = arith.mulf %532, %532 : vector<16x128xf32>
      %535 = arith.mulf %521, %524 : vector<16x128xf32>
      %536 = arith.subf %534, %535 : vector<16x128xf32>
      %537 = arith.mulf %533, %533 : vector<16x128xf32>
      %538 = arith.mulf %528, %531 : vector<16x128xf32>
      %539 = arith.subf %537, %538 : vector<16x128xf32>
      %540 = arith.mulf %532, %533 : vector<16x128xf32>
      %541 = arith.mulf %521, %528 : vector<16x128xf32>
      %542 = arith.mulf %524, %531 : vector<16x128xf32>
      %543 = arith.addf %541, %542 : vector<16x128xf32>
      %544 = arith.addf %540, %543 : vector<16x128xf32>
      %cst_127 = arith.constant dense<0.000000e+00> : vector<16x8xf32>
      %545 = tpu.matmul %517, %486, %cst_127 {dimension_numbers = #tpu.dot_dimension_numbers<[1], [0], [0], [1], [0, 0, 1, 1], [], []>} : vector<16x128xf32>, vector<128x8xf32>, vector<16x8xf32> -> vector<16x8xf32>
      %546 = arith.mulf %517, %536 : vector<16x128xf32>
      %cst_128 = arith.constant dense<0.000000e+00> : vector<16x8xf32>
      %547 = tpu.matmul %546, %29, %cst_128 {dimension_numbers = #tpu.dot_dimension_numbers<[1], [0], [0], [1], [0, 0, 1, 1], [], []>} : vector<16x128xf32>, vector<128x8xf32>, vector<16x8xf32> -> vector<16x8xf32>
      %548 = arith.addf %545, %547 : vector<16x8xf32>
      %549 = arith.mulf %517, %532 : vector<16x128xf32>
      %cst_129 = arith.constant dense<0.000000e+00> : vector<16x8xf32>
      %550 = tpu.matmul %549, %489, %cst_129 {dimension_numbers = #tpu.dot_dimension_numbers<[1], [0], [0], [1], [0, 0, 1, 1], [], []>} : vector<16x128xf32>, vector<128x8xf32>, vector<16x8xf32> -> vector<16x8xf32>
      %551 = arith.addf %548, %550 : vector<16x8xf32>
      %552 = arith.mulf %517, %533 : vector<16x128xf32>
      %cst_130 = arith.constant dense<0.000000e+00> : vector<16x8xf32>
      %553 = tpu.matmul %552, %492, %cst_130 {dimension_numbers = #tpu.dot_dimension_numbers<[1], [0], [0], [1], [0, 0, 1, 1], [], []>} : vector<16x128xf32>, vector<128x8xf32>, vector<16x8xf32> -> vector<16x8xf32>
      %554 = arith.addf %551, %553 : vector<16x8xf32>
      %555 = arith.mulf %517, %544 : vector<16x128xf32>
      %cst_131 = arith.constant dense<0.000000e+00> : vector<16x8xf32>
      %556 = tpu.matmul %555, %495, %cst_131 {dimension_numbers = #tpu.dot_dimension_numbers<[1], [0], [0], [1], [0, 0, 1, 1], [], []>} : vector<16x128xf32>, vector<128x8xf32>, vector<16x8xf32> -> vector<16x8xf32>
      %557 = arith.addf %554, %556 : vector<16x8xf32>
      %558 = arith.mulf %517, %539 : vector<16x128xf32>
      %cst_132 = arith.constant dense<0.000000e+00> : vector<16xf32>
      %559 = vector.multi_reduction <add>, %558, %cst_132 [1] : vector<16x128xf32> to vector<16xf32>
      %560 = vector.shape_cast %559 : vector<16xf32> to vector<16x1xf32>
      %561 = vector.broadcast %483 : f32 to vector<16x1xf32>
      %562 = arith.mulf %561, %560 : vector<16x1xf32>
      %563 = vector.broadcast %562 : vector<16x1xf32> to vector<16x8xf32>
      %564 = arith.addf %557, %563 : vector<16x8xf32>
      %c0_133 = arith.constant 0 : index
      %c0_134 = arith.constant 0 : index
      %565 = vector.load %arg8[%c0_133, %c0_134] : memref<16x8xf32, #tpu.memory_space<vmem>>, vector<16x8xf32>
      %566 = arith.addf %565, %564 : vector<16x8xf32>
      %c0_135 = arith.constant 0 : index
      %c0_136 = arith.constant 0 : index
      %567 = vector.load %arg8[%c0_135, %c0_136] : memref<16x8xf32, #tpu.memory_space<vmem>>, vector<16x8xf32>
      tpu.vector_store %arg8[%c0_135, %c0_136], %566 {strides = array<i32>} : memref<16x8xf32, #tpu.memory_space<vmem>>, vector<16x8xf32>,
      %c1_i32_137 = arith.constant 1 : i32
      %c12_i32_138 = arith.constant 12 : i32
      %568 = arith.addi %52, %c12_i32_138 : i32
      %c0_i32_139 = arith.constant 0 : i32
      %569 = arith.addi %568, %c0_i32_139 : i32
      %570 = arith.index_cast %569 : i32 to index
      %571 = memref.load %arg3[%570] : memref<256xf32, #tpu.memory_space<smem>>
      %c12_i32_140 = arith.constant 12 : i32
      %572 = arith.addi %52, %c12_i32_140 : i32
      %c1_i32_141 = arith.constant 1 : i32
      %573 = arith.addi %572, %c1_i32_141 : i32
      %574 = arith.index_cast %573 : i32 to index
      %575 = memref.load %arg3[%574] : memref<256xf32, #tpu.memory_space<smem>>
      %c12_i32_142 = arith.constant 12 : i32
      %576 = arith.addi %52, %c12_i32_142 : i32
      %c2_i32_143 = arith.constant 2 : i32
      %577 = arith.addi %576, %c2_i32_143 : i32
      %578 = arith.index_cast %577 : i32 to index
      %579 = memref.load %arg3[%578] : memref<256xf32, #tpu.memory_space<smem>>
      %c12_i32_144 = arith.constant 12 : i32
      %580 = arith.addi %52, %c12_i32_144 : i32
      %c3_i32_145 = arith.constant 3 : i32
      %581 = arith.addi %580, %c3_i32_145 : i32
      %582 = arith.index_cast %581 : i32 to index
      %583 = memref.load %arg3[%582] : memref<256xf32, #tpu.memory_space<smem>>
      %c16_i32_146 = arith.constant 16 : i32
      %584 = arith.addi %52, %c16_i32_146 : i32
      %c0_i32_147 = arith.constant 0 : i32
      %585 = arith.addi %584, %c0_i32_147 : i32
      %586 = arith.index_cast %585 : i32 to index
      %587 = memref.load %arg3[%586] : memref<256xf32, #tpu.memory_space<smem>>
      %c16_i32_148 = arith.constant 16 : i32
      %588 = arith.addi %52, %c16_i32_148 : i32
      %c1_i32_149 = arith.constant 1 : i32
      %589 = arith.addi %588, %c1_i32_149 : i32
      %590 = arith.index_cast %589 : i32 to index
      %591 = memref.load %arg3[%590] : memref<256xf32, #tpu.memory_space<smem>>
      %c16_i32_150 = arith.constant 16 : i32
      %592 = arith.addi %52, %c16_i32_150 : i32
      %c2_i32_151 = arith.constant 2 : i32
      %593 = arith.addi %592, %c2_i32_151 : i32
      %594 = arith.index_cast %593 : i32 to index
      %595 = memref.load %arg3[%594] : memref<256xf32, #tpu.memory_space<smem>>
      %c16_i32_152 = arith.constant 16 : i32
      %596 = arith.addi %52, %c16_i32_152 : i32
      %c3_i32_153 = arith.constant 3 : i32
      %597 = arith.addi %596, %c3_i32_153 : i32
      %598 = arith.index_cast %597 : i32 to index
      %599 = memref.load %arg3[%598] : memref<256xf32, #tpu.memory_space<smem>>
      %600 = arith.subf %587, %571 : f32
      %601 = arith.subf %591, %575 : f32
      %602 = arith.subf %595, %579 : f32
      %603 = arith.subf %599, %583 : f32
      %604 = vector.broadcast %571 : f32 to vector<8x128xf32>
      %605 = arith.subf %7, %604 : vector<8x128xf32>
      %606 = arith.mulf %605, %605 : vector<8x128xf32>
      %607 = arith.mulf %605, %15 : vector<8x128xf32>
      %608 = vector.broadcast %600 : f32 to vector<8x128xf32>
      %609 = arith.mulf %605, %608 : vector<8x128xf32>
      %610 = vector.broadcast %600 : f32 to vector<8x128xf32>
      %611 = arith.mulf %15, %610 : vector<8x128xf32>
      %612 = arith.mulf %600, %600 : f32
      %613 = vector.broadcast %575 : f32 to vector<8x128xf32>
      %614 = arith.subf %9, %613 : vector<8x128xf32>
      %615 = arith.mulf %614, %614 : vector<8x128xf32>
      %616 = arith.addf %606, %615 : vector<8x128xf32>
      %617 = arith.mulf %614, %17 : vector<8x128xf32>
      %618 = arith.addf %607, %617 : vector<8x128xf32>
      %619 = vector.broadcast %601 : f32 to vector<8x128xf32>
      %620 = arith.mulf %614, %619 : vector<8x128xf32>
      %621 = arith.addf %609, %620 : vector<8x128xf32>
      %622 = vector.broadcast %601 : f32 to vector<8x128xf32>
      %623 = arith.mulf %17, %622 : vector<8x128xf32>
      %624 = arith.addf %611, %623 : vector<8x128xf32>
      %625 = arith.mulf %601, %601 : f32
      %626 = arith.addf %612, %625 : f32
      %627 = vector.broadcast %579 : f32 to vector<8x128xf32>
      %628 = arith.subf %11, %627 : vector<8x128xf32>
      %629 = arith.mulf %628, %628 : vector<8x128xf32>
      %630 = arith.addf %616, %629 : vector<8x128xf32>
      %631 = arith.mulf %628, %19 : vector<8x128xf32>
      %632 = arith.addf %618, %631 : vector<8x128xf32>
      %633 = vector.broadcast %602 : f32 to vector<8x128xf32>
      %634 = arith.mulf %628, %633 : vector<8x128xf32>
      %635 = arith.addf %621, %634 : vector<8x128xf32>
      %636 = vector.broadcast %602 : f32 to vector<8x128xf32>
      %637 = arith.mulf %19, %636 : vector<8x128xf32>
      %638 = arith.addf %624, %637 : vector<8x128xf32>
      %639 = arith.mulf %602, %602 : f32
      %640 = arith.addf %626, %639 : f32
      %641 = vector.broadcast %583 : f32 to vector<8x128xf32>
      %642 = arith.subf %13, %641 : vector<8x128xf32>
      %643 = arith.mulf %642, %642 : vector<8x128xf32>
      %644 = arith.addf %630, %643 : vector<8x128xf32>
      %645 = arith.mulf %642, %21 : vector<8x128xf32>
      %646 = arith.addf %632, %645 : vector<8x128xf32>
      %647 = vector.broadcast %603 : f32 to vector<8x128xf32>
      %648 = arith.mulf %642, %647 : vector<8x128xf32>
      %649 = arith.addf %635, %648 : vector<8x128xf32>
      %650 = vector.broadcast %603 : f32 to vector<8x128xf32>
      %651 = arith.mulf %21, %650 : vector<8x128xf32>
      %652 = arith.addf %638, %651 : vector<8x128xf32>
      %653 = arith.mulf %603, %603 : f32
      %654 = arith.addf %640, %653 : f32
      %cst_154 = arith.constant 3.000000e+00 : f32
      %655 = vector.broadcast %cst_154 : f32 to vector<8x128xf32>
      %656 = arith.mulf %655, %644 : vector<8x128xf32>
      %657 = tpu.transpose %656, [1, 0] : vector<8x128xf32> -> vector<128x8xf32>
      %cst_155 = arith.constant 3.000000e+00 : f32
      %658 = vector.broadcast %cst_155 : f32 to vector<8x128xf32>
      %659 = arith.mulf %658, %646 : vector<8x128xf32>
      %660 = tpu.transpose %659, [1, 0] : vector<8x128xf32> -> vector<128x8xf32>
      %cst_156 = arith.constant -3.000000e+00 : f32
      %661 = vector.broadcast %cst_156 : f32 to vector<8x128xf32>
      %662 = arith.mulf %661, %649 : vector<8x128xf32>
      %663 = tpu.transpose %662, [1, 0] : vector<8x128xf32> -> vector<128x8xf32>
      %cst_157 = arith.constant -1.000000e+00 : f32
      %664 = vector.broadcast %cst_157 : f32 to vector<8x128xf32>
      %665 = arith.mulf %664, %652 : vector<8x128xf32>
      %666 = tpu.transpose %665, [1, 0] : vector<8x128xf32> -> vector<128x8xf32>
      %cst_158 = arith.constant 3.000000e+00 : f32
      %667 = arith.mulf %cst_158, %44 : f32
      %c0_i32_159 = arith.constant 0 : i32
      %c16_i32_160 = arith.constant 16 : i32
      %668 = arith.muli %c0_i32_159, %c16_i32_160 : i32
      %669 = arith.sitofp %668 : i32 to f32
      %670 = vector.broadcast %669 : f32 to vector<16x1xf32>
      %671 = arith.addf %670, %31 : vector<16x1xf32>
      %672 = vector.broadcast %51 : f32 to vector<16x1xf32>
      %673 = arith.mulf %671, %672 : vector<16x1xf32>
      %674 = vector.broadcast %0 : f32 to vector<16x1xf32>
      %675 = arith.addf %674, %673 : vector<16x1xf32>
      %676 = vector.broadcast %667 : f32 to vector<16x1xf32>
      %677 = arith.addf %675, %676 : vector<16x1xf32>
      %678 = vector.broadcast %677 : vector<16x1xf32> to vector<16x128xf32>
      %679 = vector.broadcast %3 : vector<1x128xf32> to vector<16x128xf32>
      %680 = arith.maximumf %678, %679 : vector<16x128xf32>
      %681 = vector.broadcast %44 : f32 to vector<16x1xf32>
      %682 = arith.addf %677, %681 : vector<16x1xf32>
      %683 = vector.broadcast %682 : vector<16x1xf32> to vector<16x128xf32>
      %684 = vector.broadcast %4 : vector<1x128xf32> to vector<16x128xf32>
      %685 = arith.minimumf %683, %684 : vector<16x128xf32>
      %686 = arith.subf %685, %680 : vector<16x128xf32>
      %cst_161 = arith.constant 0.000000e+00 : f32
      %687 = vector.broadcast %cst_161 : f32 to vector<16x128xf32>
      %688 = arith.maximumf %686, %687 : vector<16x128xf32>
      %689 = vector.broadcast %3 : vector<1x128xf32> to vector<16x128xf32>
      %690 = arith.subf %680, %689 : vector<16x128xf32>
      %691 = vector.broadcast %5 : vector<1x128xf32> to vector<16x128xf32>
      %692 = arith.mulf %690, %691 : vector<16x128xf32>
      %693 = vector.broadcast %5 : vector<1x128xf32> to vector<16x128xf32>
      %694 = arith.mulf %688, %693 : vector<16x128xf32>
      %695 = arith.addf %692, %694 : vector<16x128xf32>
      %696 = vector.broadcast %677 : vector<16x1xf32> to vector<16x128xf32>
      %697 = arith.subf %680, %696 : vector<16x128xf32>
      %698 = vector.broadcast %48 : f32 to vector<16x128xf32>
      %699 = arith.mulf %697, %698 : vector<16x128xf32>
      %700 = vector.broadcast %48 : f32 to vector<16x128xf32>
      %701 = arith.mulf %688, %700 : vector<16x128xf32>
      %702 = arith.addf %699, %701 : vector<16x128xf32>
      %703 = arith.addf %692, %695 : vector<16x128xf32>
      %704 = arith.addf %699, %702 : vector<16x128xf32>
      %705 = arith.mulf %703, %703 : vector<16x128xf32>
      %706 = arith.mulf %692, %695 : vector<16x128xf32>
      %707 = arith.subf %705, %706 : vector<16x128xf32>
      %708 = arith.mulf %704, %704 : vector<16x128xf32>
      %709 = arith.mulf %699, %702 : vector<16x128xf32>
      %710 = arith.subf %708, %709 : vector<16x128xf32>
      %711 = arith.mulf %703, %704 : vector<16x128xf32>
      %712 = arith.mulf %692, %699 : vector<16x128xf32>
      %713 = arith.mulf %695, %702 : vector<16x128xf32>
      %714 = arith.addf %712, %713 : vector<16x128xf32>
      %715 = arith.addf %711, %714 : vector<16x128xf32>
      %cst_162 = arith.constant dense<0.000000e+00> : vector<16x8xf32>
      %716 = tpu.matmul %688, %657, %cst_162 {dimension_numbers = #tpu.dot_dimension_numbers<[1], [0], [0], [1], [0, 0, 1, 1], [], []>} : vector<16x128xf32>, vector<128x8xf32>, vector<16x8xf32> -> vector<16x8xf32>
      %717 = arith.mulf %688, %707 : vector<16x128xf32>
      %cst_163 = arith.constant dense<0.000000e+00> : vector<16x8xf32>
      %718 = tpu.matmul %717, %29, %cst_163 {dimension_numbers = #tpu.dot_dimension_numbers<[1], [0], [0], [1], [0, 0, 1, 1], [], []>} : vector<16x128xf32>, vector<128x8xf32>, vector<16x8xf32> -> vector<16x8xf32>
      %719 = arith.addf %716, %718 : vector<16x8xf32>
      %720 = arith.mulf %688, %703 : vector<16x128xf32>
      %cst_164 = arith.constant dense<0.000000e+00> : vector<16x8xf32>
      %721 = tpu.matmul %720, %660, %cst_164 {dimension_numbers = #tpu.dot_dimension_numbers<[1], [0], [0], [1], [0, 0, 1, 1], [], []>} : vector<16x128xf32>, vector<128x8xf32>, vector<16x8xf32> -> vector<16x8xf32>
      %722 = arith.addf %719, %721 : vector<16x8xf32>
      %723 = arith.mulf %688, %704 : vector<16x128xf32>
      %cst_165 = arith.constant dense<0.000000e+00> : vector<16x8xf32>
      %724 = tpu.matmul %723, %663, %cst_165 {dimension_numbers = #tpu.dot_dimension_numbers<[1], [0], [0], [1], [0, 0, 1, 1], [], []>} : vector<16x128xf32>, vector<128x8xf32>, vector<16x8xf32> -> vector<16x8xf32>
      %725 = arith.addf %722, %724 : vector<16x8xf32>
      %726 = arith.mulf %688, %715 : vector<16x128xf32>
      %cst_166 = arith.constant dense<0.000000e+00> : vector<16x8xf32>
      %727 = tpu.matmul %726, %666, %cst_166 {dimension_numbers = #tpu.dot_dimension_numbers<[1], [0], [0], [1], [0, 0, 1, 1], [], []>} : vector<16x128xf32>, vector<128x8xf32>, vector<16x8xf32> -> vector<16x8xf32>
      %728 = arith.addf %725, %727 : vector<16x8xf32>
      %729 = arith.mulf %688, %710 : vector<16x128xf32>
      %cst_167 = arith.constant dense<0.000000e+00> : vector<16xf32>
      %730 = vector.multi_reduction <add>, %729, %cst_167 [1] : vector<16x128xf32> to vector<16xf32>
      %731 = vector.shape_cast %730 : vector<16xf32> to vector<16x1xf32>
      %732 = vector.broadcast %654 : f32 to vector<16x1xf32>
      %733 = arith.mulf %732, %731 : vector<16x1xf32>
      %734 = vector.broadcast %733 : vector<16x1xf32> to vector<16x8xf32>
      %735 = arith.addf %728, %734 : vector<16x8xf32>
      %c0_168 = arith.constant 0 : index
      %c0_169 = arith.constant 0 : index
      %736 = vector.load %arg8[%c0_168, %c0_169] : memref<16x8xf32, #tpu.memory_space<vmem>>, vector<16x8xf32>
      %737 = arith.addf %736, %735 : vector<16x8xf32>
      %c0_170 = arith.constant 0 : index
      %c0_171 = arith.constant 0 : index
      %738 = vector.load %arg8[%c0_170, %c0_171] : memref<16x8xf32, #tpu.memory_space<vmem>>, vector<16x8xf32>
      tpu.vector_store %arg8[%c0_170, %c0_171], %737 {strides = array<i32>} : memref<16x8xf32, #tpu.memory_space<vmem>>, vector<16x8xf32>,
      %c1_i32_172 = arith.constant 1 : i32
      %c16_i32_173 = arith.constant 16 : i32
      %739 = arith.addi %52, %c16_i32_173 : i32
      %c0_i32_174 = arith.constant 0 : i32
      %740 = arith.addi %739, %c0_i32_174 : i32
      %741 = arith.index_cast %740 : i32 to index
      %742 = memref.load %arg3[%741] : memref<256xf32, #tpu.memory_space<smem>>
      %c16_i32_175 = arith.constant 16 : i32
      %743 = arith.addi %52, %c16_i32_175 : i32
      %c1_i32_176 = arith.constant 1 : i32
      %744 = arith.addi %743, %c1_i32_176 : i32
      %745 = arith.index_cast %744 : i32 to index
      %746 = memref.load %arg3[%745] : memref<256xf32, #tpu.memory_space<smem>>
      %c16_i32_177 = arith.constant 16 : i32
      %747 = arith.addi %52, %c16_i32_177 : i32
      %c2_i32_178 = arith.constant 2 : i32
      %748 = arith.addi %747, %c2_i32_178 : i32
      %749 = arith.index_cast %748 : i32 to index
      %750 = memref.load %arg3[%749] : memref<256xf32, #tpu.memory_space<smem>>
      %c16_i32_179 = arith.constant 16 : i32
      %751 = arith.addi %52, %c16_i32_179 : i32
      %c3_i32_180 = arith.constant 3 : i32
      %752 = arith.addi %751, %c3_i32_180 : i32
      %753 = arith.index_cast %752 : i32 to index
      %754 = memref.load %arg3[%753] : memref<256xf32, #tpu.memory_space<smem>>
      %c20_i32 = arith.constant 20 : i32
      %755 = arith.addi %52, %c20_i32 : i32
      %c0_i32_181 = arith.constant 0 : i32
      %756 = arith.addi %755, %c0_i32_181 : i32
      %757 = arith.index_cast %756 : i32 to index
      %758 = memref.load %arg3[%757] : memref<256xf32, #tpu.memory_space<smem>>
      %c20_i32_182 = arith.constant 20 : i32
      %759 = arith.addi %52, %c20_i32_182 : i32
      %c1_i32_183 = arith.constant 1 : i32
      %760 = arith.addi %759, %c1_i32_183 : i32
      %761 = arith.index_cast %760 : i32 to index
      %762 = memref.load %arg3[%761] : memref<256xf32, #tpu.memory_space<smem>>
      %c20_i32_184 = arith.constant 20 : i32
      %763 = arith.addi %52, %c20_i32_184 : i32
      %c2_i32_185 = arith.constant 2 : i32
      %764 = arith.addi %763, %c2_i32_185 : i32
      %765 = arith.index_cast %764 : i32 to index
      %766 = memref.load %arg3[%765] : memref<256xf32, #tpu.memory_space<smem>>
      %c20_i32_186 = arith.constant 20 : i32
      %767 = arith.addi %52, %c20_i32_186 : i32
      %c3_i32_187 = arith.constant 3 : i32
      %768 = arith.addi %767, %c3_i32_187 : i32
      %769 = arith.index_cast %768 : i32 to index
      %770 = memref.load %arg3[%769] : memref<256xf32, #tpu.memory_space<smem>>
      %771 = arith.subf %758, %742 : f32
      %772 = arith.subf %762, %746 : f32
      %773 = arith.subf %766, %750 : f32
      %774 = arith.subf %770, %754 : f32
      %775 = vector.broadcast %742 : f32 to vector<8x128xf32>
      %776 = arith.subf %7, %775 : vector<8x128xf32>
      %777 = arith.mulf %776, %776 : vector<8x128xf32>
      %778 = arith.mulf %776, %15 : vector<8x128xf32>
      %779 = vector.broadcast %771 : f32 to vector<8x128xf32>
      %780 = arith.mulf %776, %779 : vector<8x128xf32>
      %781 = vector.broadcast %771 : f32 to vector<8x128xf32>
      %782 = arith.mulf %15, %781 : vector<8x128xf32>
      %783 = arith.mulf %771, %771 : f32
      %784 = vector.broadcast %746 : f32 to vector<8x128xf32>
      %785 = arith.subf %9, %784 : vector<8x128xf32>
      %786 = arith.mulf %785, %785 : vector<8x128xf32>
      %787 = arith.addf %777, %786 : vector<8x128xf32>
      %788 = arith.mulf %785, %17 : vector<8x128xf32>
      %789 = arith.addf %778, %788 : vector<8x128xf32>
      %790 = vector.broadcast %772 : f32 to vector<8x128xf32>
      %791 = arith.mulf %785, %790 : vector<8x128xf32>
      %792 = arith.addf %780, %791 : vector<8x128xf32>
      %793 = vector.broadcast %772 : f32 to vector<8x128xf32>
      %794 = arith.mulf %17, %793 : vector<8x128xf32>
      %795 = arith.addf %782, %794 : vector<8x128xf32>
      %796 = arith.mulf %772, %772 : f32
      %797 = arith.addf %783, %796 : f32
      %798 = vector.broadcast %750 : f32 to vector<8x128xf32>
      %799 = arith.subf %11, %798 : vector<8x128xf32>
      %800 = arith.mulf %799, %799 : vector<8x128xf32>
      %801 = arith.addf %787, %800 : vector<8x128xf32>
      %802 = arith.mulf %799, %19 : vector<8x128xf32>
      %803 = arith.addf %789, %802 : vector<8x128xf32>
      %804 = vector.broadcast %773 : f32 to vector<8x128xf32>
      %805 = arith.mulf %799, %804 : vector<8x128xf32>
      %806 = arith.addf %792, %805 : vector<8x128xf32>
      %807 = vector.broadcast %773 : f32 to vector<8x128xf32>
      %808 = arith.mulf %19, %807 : vector<8x128xf32>
      %809 = arith.addf %795, %808 : vector<8x128xf32>
      %810 = arith.mulf %773, %773 : f32
      %811 = arith.addf %797, %810 : f32
      %812 = vector.broadcast %754 : f32 to vector<8x128xf32>
      %813 = arith.subf %13, %812 : vector<8x128xf32>
      %814 = arith.mulf %813, %813 : vector<8x128xf32>
      %815 = arith.addf %801, %814 : vector<8x128xf32>
      %816 = arith.mulf %813, %21 : vector<8x128xf32>
      %817 = arith.addf %803, %816 : vector<8x128xf32>
      %818 = vector.broadcast %774 : f32 to vector<8x128xf32>
      %819 = arith.mulf %813, %818 : vector<8x128xf32>
      %820 = arith.addf %806, %819 : vector<8x128xf32>
      %821 = vector.broadcast %774 : f32 to vector<8x128xf32>
      %822 = arith.mulf %21, %821 : vector<8x128xf32>
      %823 = arith.addf %809, %822 : vector<8x128xf32>
      %824 = arith.mulf %774, %774 : f32
      %825 = arith.addf %811, %824 : f32
      %cst_188 = arith.constant 3.000000e+00 : f32
      %826 = vector.broadcast %cst_188 : f32 to vector<8x128xf32>
      %827 = arith.mulf %826, %815 : vector<8x128xf32>
      %828 = tpu.transpose %827, [1, 0] : vector<8x128xf32> -> vector<128x8xf32>
      %cst_189 = arith.constant 3.000000e+00 : f32
      %829 = vector.broadcast %cst_189 : f32 to vector<8x128xf32>
      %830 = arith.mulf %829, %817 : vector<8x128xf32>
      %831 = tpu.transpose %830, [1, 0] : vector<8x128xf32> -> vector<128x8xf32>
      %cst_190 = arith.constant -3.000000e+00 : f32
      %832 = vector.broadcast %cst_190 : f32 to vector<8x128xf32>
      %833 = arith.mulf %832, %820 : vector<8x128xf32>
      %834 = tpu.transpose %833, [1, 0] : vector<8x128xf32> -> vector<128x8xf32>
      %cst_191 = arith.constant -1.000000e+00 : f32
      %835 = vector.broadcast %cst_191 : f32 to vector<8x128xf32>
      %836 = arith.mulf %835, %823 : vector<8x128xf32>
      %837 = tpu.transpose %836, [1, 0] : vector<8x128xf32> -> vector<128x8xf32>
      %cst_192 = arith.constant 4.000000e+00 : f32
      %838 = arith.mulf %cst_192, %44 : f32
      %c0_i32_193 = arith.constant 0 : i32
      %c16_i32_194 = arith.constant 16 : i32
      %839 = arith.muli %c0_i32_193, %c16_i32_194 : i32
      %840 = arith.sitofp %839 : i32 to f32
      %841 = vector.broadcast %840 : f32 to vector<16x1xf32>
      %842 = arith.addf %841, %31 : vector<16x1xf32>
      %843 = vector.broadcast %51 : f32 to vector<16x1xf32>
      %844 = arith.mulf %842, %843 : vector<16x1xf32>
      %845 = vector.broadcast %0 : f32 to vector<16x1xf32>
      %846 = arith.addf %845, %844 : vector<16x1xf32>
      %847 = vector.broadcast %838 : f32 to vector<16x1xf32>
      %848 = arith.addf %846, %847 : vector<16x1xf32>
      %849 = vector.broadcast %848 : vector<16x1xf32> to vector<16x128xf32>
      %850 = vector.broadcast %3 : vector<1x128xf32> to vector<16x128xf32>
      %851 = arith.maximumf %849, %850 : vector<16x128xf32>
      %852 = vector.broadcast %44 : f32 to vector<16x1xf32>
      %853 = arith.addf %848, %852 : vector<16x1xf32>
      %854 = vector.broadcast %853 : vector<16x1xf32> to vector<16x128xf32>
      %855 = vector.broadcast %4 : vector<1x128xf32> to vector<16x128xf32>
      %856 = arith.minimumf %854, %855 : vector<16x128xf32>
      %857 = arith.subf %856, %851 : vector<16x128xf32>
      %cst_195 = arith.constant 0.000000e+00 : f32
      %858 = vector.broadcast %cst_195 : f32 to vector<16x128xf32>
      %859 = arith.maximumf %857, %858 : vector<16x128xf32>
      %860 = vector.broadcast %3 : vector<1x128xf32> to vector<16x128xf32>
      %861 = arith.subf %851, %860 : vector<16x128xf32>
      %862 = vector.broadcast %5 : vector<1x128xf32> to vector<16x128xf32>
      %863 = arith.mulf %861, %862 : vector<16x128xf32>
      %864 = vector.broadcast %5 : vector<1x128xf32> to vector<16x128xf32>
      %865 = arith.mulf %859, %864 : vector<16x128xf32>
      %866 = arith.addf %863, %865 : vector<16x128xf32>
      %867 = vector.broadcast %848 : vector<16x1xf32> to vector<16x128xf32>
      %868 = arith.subf %851, %867 : vector<16x128xf32>
      %869 = vector.broadcast %48 : f32 to vector<16x128xf32>
      %870 = arith.mulf %868, %869 : vector<16x128xf32>
      %871 = vector.broadcast %48 : f32 to vector<16x128xf32>
      %872 = arith.mulf %859, %871 : vector<16x128xf32>
      %873 = arith.addf %870, %872 : vector<16x128xf32>
      %874 = arith.addf %863, %866 : vector<16x128xf32>
      %875 = arith.addf %870, %873 : vector<16x128xf32>
      %876 = arith.mulf %874, %874 : vector<16x128xf32>
      %877 = arith.mulf %863, %866 : vector<16x128xf32>
      %878 = arith.subf %876, %877 : vector<16x128xf32>
      %879 = arith.mulf %875, %875 : vector<16x128xf32>
      %880 = arith.mulf %870, %873 : vector<16x128xf32>
      %881 = arith.subf %879, %880 : vector<16x128xf32>
      %882 = arith.mulf %874, %875 : vector<16x128xf32>
      %883 = arith.mulf %863, %870 : vector<16x128xf32>
      %884 = arith.mulf %866, %873 : vector<16x128xf32>
      %885 = arith.addf %883, %884 : vector<16x128xf32>
      %886 = arith.addf %882, %885 : vector<16x128xf32>
      %cst_196 = arith.constant dense<0.000000e+00> : vector<16x8xf32>
      %887 = tpu.matmul %859, %828, %cst_196 {dimension_numbers = #tpu.dot_dimension_numbers<[1], [0], [0], [1], [0, 0, 1, 1], [], []>} : vector<16x128xf32>, vector<128x8xf32>, vector<16x8xf32> -> vector<16x8xf32>
      %888 = arith.mulf %859, %878 : vector<16x128xf32>
      %cst_197 = arith.constant dense<0.000000e+00> : vector<16x8xf32>
      %889 = tpu.matmul %888, %29, %cst_197 {dimension_numbers = #tpu.dot_dimension_numbers<[1], [0], [0], [1], [0, 0, 1, 1], [], []>} : vector<16x128xf32>, vector<128x8xf32>, vector<16x8xf32> -> vector<16x8xf32>
      %890 = arith.addf %887, %889 : vector<16x8xf32>
      %891 = arith.mulf %859, %874 : vector<16x128xf32>
      %cst_198 = arith.constant dense<0.000000e+00> : vector<16x8xf32>
      %892 = tpu.matmul %891, %831, %cst_198 {dimension_numbers = #tpu.dot_dimension_numbers<[1], [0], [0], [1], [0, 0, 1, 1], [], []>} : vector<16x128xf32>, vector<128x8xf32>, vector<16x8xf32> -> vector<16x8xf32>
      %893 = arith.addf %890, %892 : vector<16x8xf32>
      %894 = arith.mulf %859, %875 : vector<16x128xf32>
      %cst_199 = arith.constant dense<0.000000e+00> : vector<16x8xf32>
      %895 = tpu.matmul %894, %834, %cst_199 {dimension_numbers = #tpu.dot_dimension_numbers<[1], [0], [0], [1], [0, 0, 1, 1], [], []>} : vector<16x128xf32>, vector<128x8xf32>, vector<16x8xf32> -> vector<16x8xf32>
      %896 = arith.addf %893, %895 : vector<16x8xf32>
      %897 = arith.mulf %859, %886 : vector<16x128xf32>
      %cst_200 = arith.constant dense<0.000000e+00> : vector<16x8xf32>
      %898 = tpu.matmul %897, %837, %cst_200 {dimension_numbers = #tpu.dot_dimension_numbers<[1], [0], [0], [1], [0, 0, 1, 1], [], []>} : vector<16x128xf32>, vector<128x8xf32>, vector<16x8xf32> -> vector<16x8xf32>
      %899 = arith.addf %896, %898 : vector<16x8xf32>
      %900 = arith.mulf %859, %881 : vector<16x128xf32>
      %cst_201 = arith.constant dense<0.000000e+00> : vector<16xf32>
      %901 = vector.multi_reduction <add>, %900, %cst_201 [1] : vector<16x128xf32> to vector<16xf32>
      %902 = vector.shape_cast %901 : vector<16xf32> to vector<16x1xf32>
      %903 = vector.broadcast %825 : f32 to vector<16x1xf32>
      %904 = arith.mulf %903, %902 : vector<16x1xf32>
      %905 = vector.broadcast %904 : vector<16x1xf32> to vector<16x8xf32>
      %906 = arith.addf %899, %905 : vector<16x8xf32>
      %c0_202 = arith.constant 0 : index
      %c0_203 = arith.constant 0 : index
      %907 = vector.load %arg8[%c0_202, %c0_203] : memref<16x8xf32, #tpu.memory_space<vmem>>, vector<16x8xf32>
      %908 = arith.addf %907, %906 : vector<16x8xf32>
      %c0_204 = arith.constant 0 : index
      %c0_205 = arith.constant 0 : index
      %909 = vector.load %arg8[%c0_204, %c0_205] : memref<16x8xf32, #tpu.memory_space<vmem>>, vector<16x8xf32>
      tpu.vector_store %arg8[%c0_204, %c0_205], %908 {strides = array<i32>} : memref<16x8xf32, #tpu.memory_space<vmem>>, vector<16x8xf32>,
      %c1_i32_206 = arith.constant 1 : i32
      %c20_i32_207 = arith.constant 20 : i32
      %910 = arith.addi %52, %c20_i32_207 : i32
      %c0_i32_208 = arith.constant 0 : i32
      %911 = arith.addi %910, %c0_i32_208 : i32
      %912 = arith.index_cast %911 : i32 to index
      %913 = memref.load %arg3[%912] : memref<256xf32, #tpu.memory_space<smem>>
      %c20_i32_209 = arith.constant 20 : i32
      %914 = arith.addi %52, %c20_i32_209 : i32
      %c1_i32_210 = arith.constant 1 : i32
      %915 = arith.addi %914, %c1_i32_210 : i32
      %916 = arith.index_cast %915 : i32 to index
      %917 = memref.load %arg3[%916] : memref<256xf32, #tpu.memory_space<smem>>
      %c20_i32_211 = arith.constant 20 : i32
      %918 = arith.addi %52, %c20_i32_211 : i32
      %c2_i32_212 = arith.constant 2 : i32
      %919 = arith.addi %918, %c2_i32_212 : i32
      %920 = arith.index_cast %919 : i32 to index
      %921 = memref.load %arg3[%920] : memref<256xf32, #tpu.memory_space<smem>>
      %c20_i32_213 = arith.constant 20 : i32
      %922 = arith.addi %52, %c20_i32_213 : i32
      %c3_i32_214 = arith.constant 3 : i32
      %923 = arith.addi %922, %c3_i32_214 : i32
      %924 = arith.index_cast %923 : i32 to index
      %925 = memref.load %arg3[%924] : memref<256xf32, #tpu.memory_space<smem>>
      %c24_i32 = arith.constant 24 : i32
      %926 = arith.addi %52, %c24_i32 : i32
      %c0_i32_215 = arith.constant 0 : i32
      %927 = arith.addi %926, %c0_i32_215 : i32
      %928 = arith.index_cast %927 : i32 to index
      %929 = memref.load %arg3[%928] : memref<256xf32, #tpu.memory_space<smem>>
      %c24_i32_216 = arith.constant 24 : i32
      %930 = arith.addi %52, %c24_i32_216 : i32
      %c1_i32_217 = arith.constant 1 : i32
      %931 = arith.addi %930, %c1_i32_217 : i32
      %932 = arith.index_cast %931 : i32 to index
      %933 = memref.load %arg3[%932] : memref<256xf32, #tpu.memory_space<smem>>
      %c24_i32_218 = arith.constant 24 : i32
      %934 = arith.addi %52, %c24_i32_218 : i32
      %c2_i32_219 = arith.constant 2 : i32
      %935 = arith.addi %934, %c2_i32_219 : i32
      %936 = arith.index_cast %935 : i32 to index
      %937 = memref.load %arg3[%936] : memref<256xf32, #tpu.memory_space<smem>>
      %c24_i32_220 = arith.constant 24 : i32
      %938 = arith.addi %52, %c24_i32_220 : i32
      %c3_i32_221 = arith.constant 3 : i32
      %939 = arith.addi %938, %c3_i32_221 : i32
      %940 = arith.index_cast %939 : i32 to index
      %941 = memref.load %arg3[%940] : memref<256xf32, #tpu.memory_space<smem>>
      %942 = arith.subf %929, %913 : f32
      %943 = arith.subf %933, %917 : f32
      %944 = arith.subf %937, %921 : f32
      %945 = arith.subf %941, %925 : f32
      %946 = vector.broadcast %913 : f32 to vector<8x128xf32>
      %947 = arith.subf %7, %946 : vector<8x128xf32>
      %948 = arith.mulf %947, %947 : vector<8x128xf32>
      %949 = arith.mulf %947, %15 : vector<8x128xf32>
      %950 = vector.broadcast %942 : f32 to vector<8x128xf32>
      %951 = arith.mulf %947, %950 : vector<8x128xf32>
      %952 = vector.broadcast %942 : f32 to vector<8x128xf32>
      %953 = arith.mulf %15, %952 : vector<8x128xf32>
      %954 = arith.mulf %942, %942 : f32
      %955 = vector.broadcast %917 : f32 to vector<8x128xf32>
      %956 = arith.subf %9, %955 : vector<8x128xf32>
      %957 = arith.mulf %956, %956 : vector<8x128xf32>
      %958 = arith.addf %948, %957 : vector<8x128xf32>
      %959 = arith.mulf %956, %17 : vector<8x128xf32>
      %960 = arith.addf %949, %959 : vector<8x128xf32>
      %961 = vector.broadcast %943 : f32 to vector<8x128xf32>
      %962 = arith.mulf %956, %961 : vector<8x128xf32>
      %963 = arith.addf %951, %962 : vector<8x128xf32>
      %964 = vector.broadcast %943 : f32 to vector<8x128xf32>
      %965 = arith.mulf %17, %964 : vector<8x128xf32>
      %966 = arith.addf %953, %965 : vector<8x128xf32>
      %967 = arith.mulf %943, %943 : f32
      %968 = arith.addf %954, %967 : f32
      %969 = vector.broadcast %921 : f32 to vector<8x128xf32>
      %970 = arith.subf %11, %969 : vector<8x128xf32>
      %971 = arith.mulf %970, %970 : vector<8x128xf32>
      %972 = arith.addf %958, %971 : vector<8x128xf32>
      %973 = arith.mulf %970, %19 : vector<8x128xf32>
      %974 = arith.addf %960, %973 : vector<8x128xf32>
      %975 = vector.broadcast %944 : f32 to vector<8x128xf32>
      %976 = arith.mulf %970, %975 : vector<8x128xf32>
      %977 = arith.addf %963, %976 : vector<8x128xf32>
      %978 = vector.broadcast %944 : f32 to vector<8x128xf32>
      %979 = arith.mulf %19, %978 : vector<8x128xf32>
      %980 = arith.addf %966, %979 : vector<8x128xf32>
      %981 = arith.mulf %944, %944 : f32
      %982 = arith.addf %968, %981 : f32
      %983 = vector.broadcast %925 : f32 to vector<8x128xf32>
      %984 = arith.subf %13, %983 : vector<8x128xf32>
      %985 = arith.mulf %984, %984 : vector<8x128xf32>
      %986 = arith.addf %972, %985 : vector<8x128xf32>
      %987 = arith.mulf %984, %21 : vector<8x128xf32>
      %988 = arith.addf %974, %987 : vector<8x128xf32>
      %989 = vector.broadcast %945 : f32 to vector<8x128xf32>
      %990 = arith.mulf %984, %989 : vector<8x128xf32>
      %991 = arith.addf %977, %990 : vector<8x128xf32>
      %992 = vector.broadcast %945 : f32 to vector<8x128xf32>
      %993 = arith.mulf %21, %992 : vector<8x128xf32>
      %994 = arith.addf %980, %993 : vector<8x128xf32>
      %995 = arith.mulf %945, %945 : f32
      %996 = arith.addf %982, %995 : f32
      %cst_222 = arith.constant 3.000000e+00 : f32
      %997 = vector.broadcast %cst_222 : f32 to vector<8x128xf32>
      %998 = arith.mulf %997, %986 : vector<8x128xf32>
      %999 = tpu.transpose %998, [1, 0] : vector<8x128xf32> -> vector<128x8xf32>
      %cst_223 = arith.constant 3.000000e+00 : f32
      %1000 = vector.broadcast %cst_223 : f32 to vector<8x128xf32>
      %1001 = arith.mulf %1000, %988 : vector<8x128xf32>
      %1002 = tpu.transpose %1001, [1, 0] : vector<8x128xf32> -> vector<128x8xf32>
      %cst_224 = arith.constant -3.000000e+00 : f32
      %1003 = vector.broadcast %cst_224 : f32 to vector<8x128xf32>
      %1004 = arith.mulf %1003, %991 : vector<8x128xf32>
      %1005 = tpu.transpose %1004, [1, 0] : vector<8x128xf32> -> vector<128x8xf32>
      %cst_225 = arith.constant -1.000000e+00 : f32
      %1006 = vector.broadcast %cst_225 : f32 to vector<8x128xf32>
      %1007 = arith.mulf %1006, %994 : vector<8x128xf32>
      %1008 = tpu.transpose %1007, [1, 0] : vector<8x128xf32> -> vector<128x8xf32>
      %cst_226 = arith.constant 5.000000e+00 : f32
      %1009 = arith.mulf %cst_226, %44 : f32
      %c0_i32_227 = arith.constant 0 : i32
      %c16_i32_228 = arith.constant 16 : i32
      %1010 = arith.muli %c0_i32_227, %c16_i32_228 : i32
      %1011 = arith.sitofp %1010 : i32 to f32
      %1012 = vector.broadcast %1011 : f32 to vector<16x1xf32>
      %1013 = arith.addf %1012, %31 : vector<16x1xf32>
      %1014 = vector.broadcast %51 : f32 to vector<16x1xf32>
      %1015 = arith.mulf %1013, %1014 : vector<16x1xf32>
      %1016 = vector.broadcast %0 : f32 to vector<16x1xf32>
      %1017 = arith.addf %1016, %1015 : vector<16x1xf32>
      %1018 = vector.broadcast %1009 : f32 to vector<16x1xf32>
      %1019 = arith.addf %1017, %1018 : vector<16x1xf32>
      %1020 = vector.broadcast %1019 : vector<16x1xf32> to vector<16x128xf32>
      %1021 = vector.broadcast %3 : vector<1x128xf32> to vector<16x128xf32>
      %1022 = arith.maximumf %1020, %1021 : vector<16x128xf32>
      %1023 = vector.broadcast %44 : f32 to vector<16x1xf32>
      %1024 = arith.addf %1019, %1023 : vector<16x1xf32>
      %1025 = vector.broadcast %1024 : vector<16x1xf32> to vector<16x128xf32>
      %1026 = vector.broadcast %4 : vector<1x128xf32> to vector<16x128xf32>
      %1027 = arith.minimumf %1025, %1026 : vector<16x128xf32>
      %1028 = arith.subf %1027, %1022 : vector<16x128xf32>
      %cst_229 = arith.constant 0.000000e+00 : f32
      %1029 = vector.broadcast %cst_229 : f32 to vector<16x128xf32>
      %1030 = arith.maximumf %1028, %1029 : vector<16x128xf32>
      %1031 = vector.broadcast %3 : vector<1x128xf32> to vector<16x128xf32>
      %1032 = arith.subf %1022, %1031 : vector<16x128xf32>
      %1033 = vector.broadcast %5 : vector<1x128xf32> to vector<16x128xf32>
      %1034 = arith.mulf %1032, %1033 : vector<16x128xf32>
      %1035 = vector.broadcast %5 : vector<1x128xf32> to vector<16x128xf32>
      %1036 = arith.mulf %1030, %1035 : vector<16x128xf32>
      %1037 = arith.addf %1034, %1036 : vector<16x128xf32>
      %1038 = vector.broadcast %1019 : vector<16x1xf32> to vector<16x128xf32>
      %1039 = arith.subf %1022, %1038 : vector<16x128xf32>
      %1040 = vector.broadcast %48 : f32 to vector<16x128xf32>
      %1041 = arith.mulf %1039, %1040 : vector<16x128xf32>
      %1042 = vector.broadcast %48 : f32 to vector<16x128xf32>
      %1043 = arith.mulf %1030, %1042 : vector<16x128xf32>
      %1044 = arith.addf %1041, %1043 : vector<16x128xf32>
      %1045 = arith.addf %1034, %1037 : vector<16x128xf32>
      %1046 = arith.addf %1041, %1044 : vector<16x128xf32>
      %1047 = arith.mulf %1045, %1045 : vector<16x128xf32>
      %1048 = arith.mulf %1034, %1037 : vector<16x128xf32>
      %1049 = arith.subf %1047, %1048 : vector<16x128xf32>
      %1050 = arith.mulf %1046, %1046 : vector<16x128xf32>
      %1051 = arith.mulf %1041, %1044 : vector<16x128xf32>
      %1052 = arith.subf %1050, %1051 : vector<16x128xf32>
      %1053 = arith.mulf %1045, %1046 : vector<16x128xf32>
      %1054 = arith.mulf %1034, %1041 : vector<16x128xf32>
      %1055 = arith.mulf %1037, %1044 : vector<16x128xf32>
      %1056 = arith.addf %1054, %1055 : vector<16x128xf32>
      %1057 = arith.addf %1053, %1056 : vector<16x128xf32>
      %cst_230 = arith.constant dense<0.000000e+00> : vector<16x8xf32>
      %1058 = tpu.matmul %1030, %999, %cst_230 {dimension_numbers = #tpu.dot_dimension_numbers<[1], [0], [0], [1], [0, 0, 1, 1], [], []>} : vector<16x128xf32>, vector<128x8xf32>, vector<16x8xf32> -> vector<16x8xf32>
      %1059 = arith.mulf %1030, %1049 : vector<16x128xf32>
      %cst_231 = arith.constant dense<0.000000e+00> : vector<16x8xf32>
      %1060 = tpu.matmul %1059, %29, %cst_231 {dimension_numbers = #tpu.dot_dimension_numbers<[1], [0], [0], [1], [0, 0, 1, 1], [], []>} : vector<16x128xf32>, vector<128x8xf32>, vector<16x8xf32> -> vector<16x8xf32>
      %1061 = arith.addf %1058, %1060 : vector<16x8xf32>
      %1062 = arith.mulf %1030, %1045 : vector<16x128xf32>
      %cst_232 = arith.constant dense<0.000000e+00> : vector<16x8xf32>
      %1063 = tpu.matmul %1062, %1002, %cst_232 {dimension_numbers = #tpu.dot_dimension_numbers<[1], [0], [0], [1], [0, 0, 1, 1], [], []>} : vector<16x128xf32>, vector<128x8xf32>, vector<16x8xf32> -> vector<16x8xf32>
      %1064 = arith.addf %1061, %1063 : vector<16x8xf32>
      %1065 = arith.mulf %1030, %1046 : vector<16x128xf32>
      %cst_233 = arith.constant dense<0.000000e+00> : vector<16x8xf32>
      %1066 = tpu.matmul %1065, %1005, %cst_233 {dimension_numbers = #tpu.dot_dimension_numbers<[1], [0], [0], [1], [0, 0, 1, 1], [], []>} : vector<16x128xf32>, vector<128x8xf32>, vector<16x8xf32> -> vector<16x8xf32>
      %1067 = arith.addf %1064, %1066 : vector<16x8xf32>
      %1068 = arith.mulf %1030, %1057 : vector<16x128xf32>
      %cst_234 = arith.constant dense<0.000000e+00> : vector<16x8xf32>
      %1069 = tpu.matmul %1068, %1008, %cst_234 {dimension_numbers = #tpu.dot_dimension_numbers<[1], [0], [0], [1], [0, 0, 1, 1], [], []>} : vector<16x128xf32>, vector<128x8xf32>, vector<16x8xf32> -> vector<16x8xf32>
      %1070 = arith.addf %1067, %1069 : vector<16x8xf32>
      %1071 = arith.mulf %1030, %1052 : vector<16x128xf32>
      %cst_235 = arith.constant dense<0.000000e+00> : vector<16xf32>
      %1072 = vector.multi_reduction <add>, %1071, %cst_235 [1] : vector<16x128xf32> to vector<16xf32>
      %1073 = vector.shape_cast %1072 : vector<16xf32> to vector<16x1xf32>
      %1074 = vector.broadcast %996 : f32 to vector<16x1xf32>
      %1075 = arith.mulf %1074, %1073 : vector<16x1xf32>
      %1076 = vector.broadcast %1075 : vector<16x1xf32> to vector<16x8xf32>
      %1077 = arith.addf %1070, %1076 : vector<16x8xf32>
      %c0_236 = arith.constant 0 : index
      %c0_237 = arith.constant 0 : index
      %1078 = vector.load %arg8[%c0_236, %c0_237] : memref<16x8xf32, #tpu.memory_space<vmem>>, vector<16x8xf32>
      %1079 = arith.addf %1078, %1077 : vector<16x8xf32>
      %c0_238 = arith.constant 0 : index
      %c0_239 = arith.constant 0 : index
      %1080 = vector.load %arg8[%c0_238, %c0_239] : memref<16x8xf32, #tpu.memory_space<vmem>>, vector<16x8xf32>
      tpu.vector_store %arg8[%c0_238, %c0_239], %1079 {strides = array<i32>} : memref<16x8xf32, #tpu.memory_space<vmem>>, vector<16x8xf32>,
      %c1_i32_240 = arith.constant 1 : i32
      %c24_i32_241 = arith.constant 24 : i32
      %1081 = arith.addi %52, %c24_i32_241 : i32
      %c0_i32_242 = arith.constant 0 : i32
      %1082 = arith.addi %1081, %c0_i32_242 : i32
      %1083 = arith.index_cast %1082 : i32 to index
      %1084 = memref.load %arg3[%1083] : memref<256xf32, #tpu.memory_space<smem>>
      %c24_i32_243 = arith.constant 24 : i32
      %1085 = arith.addi %52, %c24_i32_243 : i32
      %c1_i32_244 = arith.constant 1 : i32
      %1086 = arith.addi %1085, %c1_i32_244 : i32
      %1087 = arith.index_cast %1086 : i32 to index
      %1088 = memref.load %arg3[%1087] : memref<256xf32, #tpu.memory_space<smem>>
      %c24_i32_245 = arith.constant 24 : i32
      %1089 = arith.addi %52, %c24_i32_245 : i32
      %c2_i32_246 = arith.constant 2 : i32
      %1090 = arith.addi %1089, %c2_i32_246 : i32
      %1091 = arith.index_cast %1090 : i32 to index
      %1092 = memref.load %arg3[%1091] : memref<256xf32, #tpu.memory_space<smem>>
      %c24_i32_247 = arith.constant 24 : i32
      %1093 = arith.addi %52, %c24_i32_247 : i32
      %c3_i32_248 = arith.constant 3 : i32
      %1094 = arith.addi %1093, %c3_i32_248 : i32
      %1095 = arith.index_cast %1094 : i32 to index
      %1096 = memref.load %arg3[%1095] : memref<256xf32, #tpu.memory_space<smem>>
      %c28_i32 = arith.constant 28 : i32
      %1097 = arith.addi %52, %c28_i32 : i32
      %c0_i32_249 = arith.constant 0 : i32
      %1098 = arith.addi %1097, %c0_i32_249 : i32
      %1099 = arith.index_cast %1098 : i32 to index
      %1100 = memref.load %arg3[%1099] : memref<256xf32, #tpu.memory_space<smem>>
      %c28_i32_250 = arith.constant 28 : i32
      %1101 = arith.addi %52, %c28_i32_250 : i32
      %c1_i32_251 = arith.constant 1 : i32
      %1102 = arith.addi %1101, %c1_i32_251 : i32
      %1103 = arith.index_cast %1102 : i32 to index
      %1104 = memref.load %arg3[%1103] : memref<256xf32, #tpu.memory_space<smem>>
      %c28_i32_252 = arith.constant 28 : i32
      %1105 = arith.addi %52, %c28_i32_252 : i32
      %c2_i32_253 = arith.constant 2 : i32
      %1106 = arith.addi %1105, %c2_i32_253 : i32
      %1107 = arith.index_cast %1106 : i32 to index
      %1108 = memref.load %arg3[%1107] : memref<256xf32, #tpu.memory_space<smem>>
      %c28_i32_254 = arith.constant 28 : i32
      %1109 = arith.addi %52, %c28_i32_254 : i32
      %c3_i32_255 = arith.constant 3 : i32
      %1110 = arith.addi %1109, %c3_i32_255 : i32
      %1111 = arith.index_cast %1110 : i32 to index
      %1112 = memref.load %arg3[%1111] : memref<256xf32, #tpu.memory_space<smem>>
      %1113 = arith.subf %1100, %1084 : f32
      %1114 = arith.subf %1104, %1088 : f32
      %1115 = arith.subf %1108, %1092 : f32
      %1116 = arith.subf %1112, %1096 : f32
      %1117 = vector.broadcast %1084 : f32 to vector<8x128xf32>
      %1118 = arith.subf %7, %1117 : vector<8x128xf32>
      %1119 = arith.mulf %1118, %1118 : vector<8x128xf32>
      %1120 = arith.mulf %1118, %15 : vector<8x128xf32>
      %1121 = vector.broadcast %1113 : f32 to vector<8x128xf32>
      %1122 = arith.mulf %1118, %1121 : vector<8x128xf32>
      %1123 = vector.broadcast %1113 : f32 to vector<8x128xf32>
      %1124 = arith.mulf %15, %1123 : vector<8x128xf32>
      %1125 = arith.mulf %1113, %1113 : f32
      %1126 = vector.broadcast %1088 : f32 to vector<8x128xf32>
      %1127 = arith.subf %9, %1126 : vector<8x128xf32>
      %1128 = arith.mulf %1127, %1127 : vector<8x128xf32>
      %1129 = arith.addf %1119, %1128 : vector<8x128xf32>
      %1130 = arith.mulf %1127, %17 : vector<8x128xf32>
      %1131 = arith.addf %1120, %1130 : vector<8x128xf32>
      %1132 = vector.broadcast %1114 : f32 to vector<8x128xf32>
      %1133 = arith.mulf %1127, %1132 : vector<8x128xf32>
      %1134 = arith.addf %1122, %1133 : vector<8x128xf32>
      %1135 = vector.broadcast %1114 : f32 to vector<8x128xf32>
      %1136 = arith.mulf %17, %1135 : vector<8x128xf32>
      %1137 = arith.addf %1124, %1136 : vector<8x128xf32>
      %1138 = arith.mulf %1114, %1114 : f32
      %1139 = arith.addf %1125, %1138 : f32
      %1140 = vector.broadcast %1092 : f32 to vector<8x128xf32>
      %1141 = arith.subf %11, %1140 : vector<8x128xf32>
      %1142 = arith.mulf %1141, %1141 : vector<8x128xf32>
      %1143 = arith.addf %1129, %1142 : vector<8x128xf32>
      %1144 = arith.mulf %1141, %19 : vector<8x128xf32>
      %1145 = arith.addf %1131, %1144 : vector<8x128xf32>
      %1146 = vector.broadcast %1115 : f32 to vector<8x128xf32>
      %1147 = arith.mulf %1141, %1146 : vector<8x128xf32>
      %1148 = arith.addf %1134, %1147 : vector<8x128xf32>
      %1149 = vector.broadcast %1115 : f32 to vector<8x128xf32>
      %1150 = arith.mulf %19, %1149 : vector<8x128xf32>
      %1151 = arith.addf %1137, %1150 : vector<8x128xf32>
      %1152 = arith.mulf %1115, %1115 : f32
      %1153 = arith.addf %1139, %1152 : f32
      %1154 = vector.broadcast %1096 : f32 to vector<8x128xf32>
      %1155 = arith.subf %13, %1154 : vector<8x128xf32>
      %1156 = arith.mulf %1155, %1155 : vector<8x128xf32>
      %1157 = arith.addf %1143, %1156 : vector<8x128xf32>
      %1158 = arith.mulf %1155, %21 : vector<8x128xf32>
      %1159 = arith.addf %1145, %1158 : vector<8x128xf32>
      %1160 = vector.broadcast %1116 : f32 to vector<8x128xf32>
      %1161 = arith.mulf %1155, %1160 : vector<8x128xf32>
      %1162 = arith.addf %1148, %1161 : vector<8x128xf32>
      %1163 = vector.broadcast %1116 : f32 to vector<8x128xf32>
      %1164 = arith.mulf %21, %1163 : vector<8x128xf32>
      %1165 = arith.addf %1151, %1164 : vector<8x128xf32>
      %1166 = arith.mulf %1116, %1116 : f32
      %1167 = arith.addf %1153, %1166 : f32
      %cst_256 = arith.constant 3.000000e+00 : f32
      %1168 = vector.broadcast %cst_256 : f32 to vector<8x128xf32>
      %1169 = arith.mulf %1168, %1157 : vector<8x128xf32>
      %1170 = tpu.transpose %1169, [1, 0] : vector<8x128xf32> -> vector<128x8xf32>
      %cst_257 = arith.constant 3.000000e+00 : f32
      %1171 = vector.broadcast %cst_257 : f32 to vector<8x128xf32>
      %1172 = arith.mulf %1171, %1159 : vector<8x128xf32>
      %1173 = tpu.transpose %1172, [1, 0] : vector<8x128xf32> -> vector<128x8xf32>
      %cst_258 = arith.constant -3.000000e+00 : f32
      %1174 = vector.broadcast %cst_258 : f32 to vector<8x128xf32>
      %1175 = arith.mulf %1174, %1162 : vector<8x128xf32>
      %1176 = tpu.transpose %1175, [1, 0] : vector<8x128xf32> -> vector<128x8xf32>
      %cst_259 = arith.constant -1.000000e+00 : f32
      %1177 = vector.broadcast %cst_259 : f32 to vector<8x128xf32>
      %1178 = arith.mulf %1177, %1165 : vector<8x128xf32>
      %1179 = tpu.transpose %1178, [1, 0] : vector<8x128xf32> -> vector<128x8xf32>
      %cst_260 = arith.constant 6.000000e+00 : f32
      %1180 = arith.mulf %cst_260, %44 : f32
      %c0_i32_261 = arith.constant 0 : i32
      %c16_i32_262 = arith.constant 16 : i32
      %1181 = arith.muli %c0_i32_261, %c16_i32_262 : i32
      %1182 = arith.sitofp %1181 : i32 to f32
      %1183 = vector.broadcast %1182 : f32 to vector<16x1xf32>
      %1184 = arith.addf %1183, %31 : vector<16x1xf32>
      %1185 = vector.broadcast %51 : f32 to vector<16x1xf32>
      %1186 = arith.mulf %1184, %1185 : vector<16x1xf32>
      %1187 = vector.broadcast %0 : f32 to vector<16x1xf32>
      %1188 = arith.addf %1187, %1186 : vector<16x1xf32>
      %1189 = vector.broadcast %1180 : f32 to vector<16x1xf32>
      %1190 = arith.addf %1188, %1189 : vector<16x1xf32>
      %1191 = vector.broadcast %1190 : vector<16x1xf32> to vector<16x128xf32>
      %1192 = vector.broadcast %3 : vector<1x128xf32> to vector<16x128xf32>
      %1193 = arith.maximumf %1191, %1192 : vector<16x128xf32>
      %1194 = vector.broadcast %44 : f32 to vector<16x1xf32>
      %1195 = arith.addf %1190, %1194 : vector<16x1xf32>
      %1196 = vector.broadcast %1195 : vector<16x1xf32> to vector<16x128xf32>
      %1197 = vector.broadcast %4 : vector<1x128xf32> to vector<16x128xf32>
      %1198 = arith.minimumf %1196, %1197 : vector<16x128xf32>
      %1199 = arith.subf %1198, %1193 : vector<16x128xf32>
      %cst_263 = arith.constant 0.000000e+00 : f32
      %1200 = vector.broadcast %cst_263 : f32 to vector<16x128xf32>
      %1201 = arith.maximumf %1199, %1200 : vector<16x128xf32>
      %1202 = vector.broadcast %3 : vector<1x128xf32> to vector<16x128xf32>
      %1203 = arith.subf %1193, %1202 : vector<16x128xf32>
      %1204 = vector.broadcast %5 : vector<1x128xf32> to vector<16x128xf32>
      %1205 = arith.mulf %1203, %1204 : vector<16x128xf32>
      %1206 = vector.broadcast %5 : vector<1x128xf32> to vector<16x128xf32>
      %1207 = arith.mulf %1201, %1206 : vector<16x128xf32>
      %1208 = arith.addf %1205, %1207 : vector<16x128xf32>
      %1209 = vector.broadcast %1190 : vector<16x1xf32> to vector<16x128xf32>
      %1210 = arith.subf %1193, %1209 : vector<16x128xf32>
      %1211 = vector.broadcast %48 : f32 to vector<16x128xf32>
      %1212 = arith.mulf %1210, %1211 : vector<16x128xf32>
      %1213 = vector.broadcast %48 : f32 to vector<16x128xf32>
      %1214 = arith.mulf %1201, %1213 : vector<16x128xf32>
      %1215 = arith.addf %1212, %1214 : vector<16x128xf32>
      %1216 = arith.addf %1205, %1208 : vector<16x128xf32>
      %1217 = arith.addf %1212, %1215 : vector<16x128xf32>
      %1218 = arith.mulf %1216, %1216 : vector<16x128xf32>
      %1219 = arith.mulf %1205, %1208 : vector<16x128xf32>
      %1220 = arith.subf %1218, %1219 : vector<16x128xf32>
      %1221 = arith.mulf %1217, %1217 : vector<16x128xf32>
      %1222 = arith.mulf %1212, %1215 : vector<16x128xf32>
      %1223 = arith.subf %1221, %1222 : vector<16x128xf32>
      %1224 = arith.mulf %1216, %1217 : vector<16x128xf32>
      %1225 = arith.mulf %1205, %1212 : vector<16x128xf32>
      %1226 = arith.mulf %1208, %1215 : vector<16x128xf32>
      %1227 = arith.addf %1225, %1226 : vector<16x128xf32>
      %1228 = arith.addf %1224, %1227 : vector<16x128xf32>
      %cst_264 = arith.constant dense<0.000000e+00> : vector<16x8xf32>
      %1229 = tpu.matmul %1201, %1170, %cst_264 {dimension_numbers = #tpu.dot_dimension_numbers<[1], [0], [0], [1], [0, 0, 1, 1], [], []>} : vector<16x128xf32>, vector<128x8xf32>, vector<16x8xf32> -> vector<16x8xf32>
      %1230 = arith.mulf %1201, %1220 : vector<16x128xf32>
      %cst_265 = arith.constant dense<0.000000e+00> : vector<16x8xf32>
      %1231 = tpu.matmul %1230, %29, %cst_265 {dimension_numbers = #tpu.dot_dimension_numbers<[1], [0], [0], [1], [0, 0, 1, 1], [], []>} : vector<16x128xf32>, vector<128x8xf32>, vector<16x8xf32> -> vector<16x8xf32>
      %1232 = arith.addf %1229, %1231 : vector<16x8xf32>
      %1233 = arith.mulf %1201, %1216 : vector<16x128xf32>
      %cst_266 = arith.constant dense<0.000000e+00> : vector<16x8xf32>
      %1234 = tpu.matmul %1233, %1173, %cst_266 {dimension_numbers = #tpu.dot_dimension_numbers<[1], [0], [0], [1], [0, 0, 1, 1], [], []>} : vector<16x128xf32>, vector<128x8xf32>, vector<16x8xf32> -> vector<16x8xf32>
      %1235 = arith.addf %1232, %1234 : vector<16x8xf32>
      %1236 = arith.mulf %1201, %1217 : vector<16x128xf32>
      %cst_267 = arith.constant dense<0.000000e+00> : vector<16x8xf32>
      %1237 = tpu.matmul %1236, %1176, %cst_267 {dimension_numbers = #tpu.dot_dimension_numbers<[1], [0], [0], [1], [0, 0, 1, 1], [], []>} : vector<16x128xf32>, vector<128x8xf32>, vector<16x8xf32> -> vector<16x8xf32>
      %1238 = arith.addf %1235, %1237 : vector<16x8xf32>
      %1239 = arith.mulf %1201, %1228 : vector<16x128xf32>
      %cst_268 = arith.constant dense<0.000000e+00> : vector<16x8xf32>
      %1240 = tpu.matmul %1239, %1179, %cst_268 {dimension_numbers = #tpu.dot_dimension_numbers<[1], [0], [0], [1], [0, 0, 1, 1], [], []>} : vector<16x128xf32>, vector<128x8xf32>, vector<16x8xf32> -> vector<16x8xf32>
      %1241 = arith.addf %1238, %1240 : vector<16x8xf32>
      %1242 = arith.mulf %1201, %1223 : vector<16x128xf32>
      %cst_269 = arith.constant dense<0.000000e+00> : vector<16xf32>
      %1243 = vector.multi_reduction <add>, %1242, %cst_269 [1] : vector<16x128xf32> to vector<16xf32>
      %1244 = vector.shape_cast %1243 : vector<16xf32> to vector<16x1xf32>
      %1245 = vector.broadcast %1167 : f32 to vector<16x1xf32>
      %1246 = arith.mulf %1245, %1244 : vector<16x1xf32>
      %1247 = vector.broadcast %1246 : vector<16x1xf32> to vector<16x8xf32>
      %1248 = arith.addf %1241, %1247 : vector<16x8xf32>
      %c0_270 = arith.constant 0 : index
      %c0_271 = arith.constant 0 : index
      %1249 = vector.load %arg8[%c0_270, %c0_271] : memref<16x8xf32, #tpu.memory_space<vmem>>, vector<16x8xf32>
      %1250 = arith.addf %1249, %1248 : vector<16x8xf32>
      %c0_272 = arith.constant 0 : index
      %c0_273 = arith.constant 0 : index
      %1251 = vector.load %arg8[%c0_272, %c0_273] : memref<16x8xf32, #tpu.memory_space<vmem>>, vector<16x8xf32>
      tpu.vector_store %arg8[%c0_272, %c0_273], %1250 {strides = array<i32>} : memref<16x8xf32, #tpu.memory_space<vmem>>, vector<16x8xf32>,
      %c1_i32_274 = arith.constant 1 : i32
      %c0_275 = arith.constant 0 : index
      %c0_276 = arith.constant 0 : index
      %1252 = vector.load %arg8[%c0_275, %c0_276] : memref<16x8xf32, #tpu.memory_space<vmem>>, vector<16x8xf32>
      %cst_277 = arith.constant 0.333333343 : f32
      %1253 = vector.broadcast %cst_277 : f32 to vector<16x8xf32>
      %1254 = arith.mulf %1252, %1253 : vector<16x8xf32>
      %c16_i32_278 = arith.constant 16 : i32
      %1255 = vector.broadcast %c16_i32_278 : i32 to vector<16x1xi32>
      %1256 = arith.cmpi slt, %32, %1255 : vector<16x1xi32>
      %cst_279 = arith.constant 0x7F800000 : f32
      %1257 = vector.shape_cast %1256 : vector<16x1xi1> to vector<16x1xi1>
      %1258 = vector.broadcast %1257 : vector<16x1xi1> to vector<16x8xi1>
      %1259 = vector.broadcast %cst_279 : f32 to vector<16x8xf32>
      %1260 = arith.select %1258, %1254, %1259 : vector<16x8xi1>, vector<16x8xf32>
      %cst_280 = arith.constant dense<0x7F800000> : vector<8xf32>
      %1261 = vector.multi_reduction <minimumf>, %1260, %cst_280 [0] : vector<16x8xf32> to vector<8xf32>
      %1262 = vector.shape_cast %1261 : vector<8xf32> to vector<1x8xf32>
      %cst_281 = arith.constant 0.000000e+00 : f32
      %1263 = vector.broadcast %cst_281 : f32 to vector<1x8xf32>
      %1264 = arith.maximumf %1262, %1263 : vector<1x8xf32>
      %1265 = math.sqrt %1264 : vector<1x8xf32>
      %1266 = vector.broadcast %arg9 : i32 to vector<4x1xi32>
      %1267 = arith.cmpi eq, %33, %1266 : vector<4x1xi32>
      %1268 = vector.shape_cast %1267 : vector<4x1xi1> to vector<4x1xi1>
      %1269 = vector.broadcast %1268 : vector<4x1xi1> to vector<4x8xi1>
      %1270 = vector.shape_cast %1265 : vector<1x8xf32> to vector<1x8xf32>
      %1271 = vector.broadcast %1270 : vector<1x8xf32> to vector<4x8xf32>
      %1272 = arith.select %1269, %1271, %arg10 : vector<4x8xi1>, vector<4x8xf32>
      scf.yield %1272 : vector<4x8xf32>
    }
    %c4_i32_24 = arith.constant 4 : i32
    %c0_25 = arith.constant 0 : index
    %c0_26 = arith.constant 0 : index
    %c0_27 = arith.constant 0 : index
    %37 = vector.load %arg7[%c0_25, %c0_26, %c0_27] : memref<1x4x8xf32, #tpu.memory_space<vmem>>, vector<1x4x8xf32>
    %38 = vector.shape_cast %37 : vector<1x4x8xf32> to vector<4x8xf32>
    %39 = vector.shape_cast %36 : vector<4x8xf32> to vector<1x4x8xf32>
    tpu.vector_store %arg7[%c0_25, %c0_26, %c0_27], %39 {strides = array<i32>} : memref<1x4x8xf32, #tpu.memory_space<vmem>>, vector<1x4x8xf32>,
    return
  }
  func.func @transform_0(%arg0: i32) -> i32 {
    %c0_i32 = arith.constant 0 : i32
    %c0_i32_0 = arith.constant 0 : i32
    return %c0_i32 : i32
  }
  func.func @transform_1(%arg0: i32) -> i32 {
    %c0_i32 = arith.constant 0 : i32
    %c0_i32_0 = arith.constant 0 : i32
    return %c0_i32 : i32
  }
  func.func @transform_2(%arg0: i32) -> i32 {
    %c0_i32 = arith.constant 0 : i32
    %c0_i32_0 = arith.constant 0 : i32
    return %c0_i32 : i32
  }
  func.func @transform_3(%arg0: i32) -> (i32, i32, i32) {
    %c0_i32 = arith.constant 0 : i32
    %c0_i32_0 = arith.constant 0 : i32
    %c0_i32_1 = arith.constant 0 : i32
    %c0_i32_2 = arith.constant 0 : i32
    return %c0_i32, %c0_i32_0, %c0_i32_1 : i32, i32, i32
  }
  func.func @transform_4(%arg0: i32) -> (i32, i32, i32) {
    %c0_i32 = arith.constant 0 : i32
    %c0_i32_0 = arith.constant 0 : i32
    %c0_i32_1 = arith.constant 0 : i32
    %c0_i32_2 = arith.constant 0 : i32
    return %c0_i32, %c0_i32_0, %c0_i32_1 : i32, i32, i32
  }
  func.func @transform_5(%arg0: i32) -> (i32, i32) {
    %c0_i32 = arith.constant 0 : i32
    %c0_i32_0 = arith.constant 0 : i32
    %c0_i32_1 = arith.constant 0 : i32
    return %c0_i32, %c0_i32_0 : i32, i32
  }
  func.func @transform_6(%arg0: i32) -> (i32, i32, i32) {
    %c0_i32 = arith.constant 0 : i32
    %c0_i32_0 = arith.constant 0 : i32
    %c0_i32_1 = arith.constant 0 : i32
    return %arg0, %c0_i32, %c0_i32_0 : i32, i32, i32
  }
}

</mosaic_0001>

<bundles_post_ra>
// kernel: tpu_custom_call.1
= control target key start
LH: loop header
LB: loop body
LE: loop exit
PB: predicated region body
PF: predicated region fallthrough
CT: control target
= control target key end

     0   :  { %s6957_s0 = inlined_call_operand.hbm [shape: f32[8], index: 0, kind: input, shape index: {}]   ;;  %s6958_s1 = inlined_call_operand.vmem [shape: f32[2], index: 1, kind: input, shape index: {}]   ;;  %s6959_s2 = inlined_call_operand.vmem [shape: f32[256], index: 2, kind: input, shape index: {}]   ;;  %s6960_s3 = inlined_call_operand.hbm [shape: f32[4,8,128], index: 3, kind: input, shape index: {}]   ;;  %s6961_s4 = inlined_call_operand.hbm [shape: f32[4,8,128], index: 4, kind: input, shape index: {}]   ;;  %s6962_s5 = inlined_call_operand.vmem [shape: f32[8,128], index: 5, kind: input, shape index: {}]   ;;  %s6963_s6 = inlined_call_operand.hbm [shape: f32[2,4,8], index: 6, kind: output, shape index: {}]  }
   0x1   :  { %7094 = sst [smem:[#allocation84_spill]] %s6957_s0 }
   0x2   :  { %7095 = sst [smem:[#allocation85_spill]] %s6958_s1 }
   0x3   :  { %7096 = sst [smem:[#allocation86_spill]] %s6959_s2 }
   0x4   :  { %7097 = sst [smem:[#allocation87_spill]] %s6960_s3 }
   0x5   :  { %7098 = sst [smem:[#allocation88_spill]] %s6961_s4 }
   0x6   :  { %7099 = sst [smem:[#allocation89_spill]] %s6962_s5 }
   0x7   :  { %7100 = sst [smem:[#allocation90_spill]] %s6963_s6 }
   0x8   :  { %11 = vsyncpa [#allocation6], 0 }
   0x9   :  { %12 = vsyncpa [#allocation7], 0 }
   0xa   :  { %13 = vsyncpa [#allocation10], 0 }
   0xb   :  { %14 = vsyncpa [#allocation4], 0 }
   0xc   :  { %15 = vsyncpa [#allocation13], 0 }
   0xd   :  { %16 = vsyncpa [#allocation5], 0 }
   0xe   :  { %18 = vsyncpa [#allocation5 + $0x1], 0  ;;  %s4959_s21 = smov 0   ;;  %s4961_s22 = smov 0  }
   0xf   :  { %s4963_s23 = smov 0   ;;  %s4965_s24 = smov 0  }
  0x10 LB: > { %7101 = sst [smem:[#allocation21_spill]] %s4892_s21  ;;  %s4980_s25 = sadd.s32 4294967295, %s4904_s24   ;;  %s4904_s24 = sphi %s4965_s24, %s7354_s24   ;;  %s4900_s23 = sphi %s4963_s23, %s7357_s23   ;;  %s4896_s22 = sphi %s4961_s22, %s7356_s22   ;;  %s4892_s21 = sphi %s4959_s21, %s7355_s21  }
  0x11   : > { %7102 = sst [smem:[#allocation22_spill]] %s4896_s22  ;;  %s4242_s26 = sadd.s32 4294967294, %s4904_s24  }
  0x12   : > { %7103 = sst [smem:[#allocation23_spill]] %s4900_s23  ;;  %s4984_s27 = sadd.s32 1, %s4904_s24  }
  0x13   : > { %7104 = sst [smem:[#allocation24_spill]] %s4904_s24  ;;  %s157_s28 = sadd.s32 1, %s4900_s23 }
  0x14   : > { %7105 = sst [smem:[#allocation25_spill]] %s4980_s25  ;;  %s154_s29 = ssub.s32 %s4904_s24, %s4984_s27 }
  0x15   : > { %7106 = sst [smem:[#allocation26_spill]] %s4984_s27  ;;  %p167_p0 = scmp.ne.s32.totalorder %s4900_s23, %s4896_s22 }
  0x16   : > { %p155_p1 = scmp.eq.s32.totalorder %s154_s29, 0  ;;  %p168_p2 = scmp.eq.s32.totalorder %s4980_s25, 1 }
  0x17   : > { %p173_p3 = scmp.ne.s32.totalorder %s4896_s22, %s4892_s21  ;;  %p174_p4 = scmp.eq.s32.totalorder %s4242_s26, 1 }
  0x18   : > { %s4995_s30 = scalar_select %p155_p1, %s4900_s23, %s157_s28  }
  0x19   : > { %p4997_p5 = por %p168_p2, %p167_p0  ;;  %p5001_p6 = por %p174_p4, %p173_p3 }
  0x1a   : > { %7107 = sst [smem:[#allocation27_spill]] %s4995_s30  ;;  %p4243_p7 = scmp.ge.s32.totalorder %s4904_s24, 1 }
  0x1b   : > { %s7108_s7 = scalar_select %p4997_p5, 1, 0 }
  0x1c   : > { %s7110_s8 = scalar_select %p5001_p6, 1, 0 }
  0x1d   : > { %7109 = sst [smem:[#allocation28_spill]] %s7108_s7  ;;  %p181_p8 = scmp.lt.s32.totalorder %s4904_s24, 3 }
  0x1e   : > { %7111 = sst [smem:[#allocation29_spill]] %s7110_s8  ;;  %p6964_p9 = scmp.eq.s32.totalorder %s4980_s25, 0 }
  0x1f   : > { %p5008_p10 = pnand %p4243_p7, %p181_p8  ;;  %s7113_s1 = sld [smem:[#allocation85_spill]] }
  0x20   : > { %s7114_s2 = sld [smem:[#allocation86_spill]]  ;;  %s4914_s17 = smov [#allocation11]  }
  0x21   : > { %s7112_s9 = scalar_select %p5008_p10, 1, 0 }
  0x22   : > { %p4623_p11 = pneg %p5008_p10  ;;  %s5028_s18 = sshll.u32 %s4914_s17, 4  ;;  %s225_s18 = int_to_ptr.vmem [resolvable:$true] %s5028_s18 }
  0x23   : > { %s7116_s0 = sld [smem:[#allocation84_spill]] }
  0x24   : > { %p5022_p12 = pnand %p6964_p9, %p4623_p11 }
  0x25   : > { %s203_s12 = sshll.u32 %s7113_s1, 4  ;;  %s204_s12 = int_to_ptr.vmem [resolvable:$true] %s203_s12 }
  0x26   : > { %s214_s15 = sshll.u32 %s7114_s2, 4  ;;  %p5038_p0 = pneg %p5022_p12  ;;  %s5026_s15 = int_to_ptr.vmem [resolvable:$true] %s214_s15 }
  0x29   : > { %s4715_s26 = scalar_lea.hbm %s7116_s0, 16 }
  0x2a   : > { %p4716_p13 = scmp.ne.s32.totalorder %s7116_s0, %s4715_s26  ;;  %p4722_p3 = scmp.lt.u32.totalorder %s4715_s26, %s7116_s0 }
  0x2c   : > { %p4718_p1 = pnand %p5038_p0, %p4716_p13 }
  0x2e   : > { %p4719_p2 = pneg %p4718_p1 }
  0x30   : > { %p4724_p4 = pnand %p4722_p3, %p4719_p2 }
  0x32   : > { %4727 = shalt.err (!%p4724_p4)
}
  0x33   : > { %s4915_s14 = smov [#allocation3]   ;;  %s4728_s20 = scalar_lea.vmem %s204_s12, 16 }
  0x34   : > { %4626 = dma.hbm_to_smem (!%p5022_p12), %s7116_s0, 16, %s4915_s14, [#allocation6]  }
  0x35   : > { %p4729_p7 = scmp.ne.s32.totalorder %s204_s12, %s4728_s20  ;;  %p4736_p13 = scmp.lt.s32.totalorder %s204_s12, %s204_s12 }
  0x36   : > { %p4737_p1 = scmp.lt.s32.totalorder %s4728_s20, %s4728_s20 }
  0x37   : > { %p4731_p8 = pnand %p4729_p7, %p5038_p0 }
  0x38   : > { %p4738_p9 = por %p4737_p1, %p4736_p13 }
  0x39   : > { %p4732_p11 = pneg %p4731_p8 }
  0x3b   : > { %p4739_p6 = pnand %p4738_p9, %p4732_p11 }
  0x3d   : > { %4742 = shalt.err (!%p4739_p6)
}
  0x3e   : > { %s4916_s26 = smov [#allocation8]   ;;  %s4743_s28 = scalar_lea.vmem %s5026_s15, 32 }
  0x3f   : > { %4629 = dma.vmem_to_smem (!%p5022_p12), %s204_s12, 16, %s4916_s26, [#allocation7]  }
  0x40   : > { %p4744_p2 = scmp.ne.s32.totalorder %s5026_s15, %s4743_s28  ;;  %p4751_p7 = scmp.lt.s32.totalorder %s5026_s15, %s5026_s15 }
  0x41   : > { %p4752_p8 = scmp.lt.s32.totalorder %s4743_s28, %s4743_s28 }
  0x42   : > { %p4746_p3 = pnand %p4744_p2, %p5038_p0 }
  0x43   : > { %p4753_p5 = por %p4752_p8, %p4751_p7 }
  0x44   : > { %p4747_p4 = pneg %p4746_p3 }
  0x46   : > { %p4754_p13 = pnand %p4753_p5, %p4747_p4 }
  0x48   : > { %4757 = shalt.err (!%p4754_p13)
}
  0x49   : > { %s4917_s29 = smov [#allocation9]   ;;  %s7118_s3 = sld [smem:[#allocation87_spill]] }
  0x4a   : > { %4632 = dma.vmem_to_smem (!%p5022_p12), %s5026_s15, 32, %s4917_s29, [#allocation10]  }
  0x4f   : > { %s4758_s13 = scalar_lea.hbm %s7118_s3, 512 }
  0x50   : > { %p4759_p6 = scmp.ne.s32.totalorder %s7118_s3, %s4758_s13  ;;  %p4765_p11 = scmp.lt.u32.totalorder %s4758_s13, %s7118_s3 }
  0x52   : > { %p4761_p9 = pnand %p4759_p6, %p5038_p0 }
  0x54   : > { %p4762_p5 = pneg %p4761_p9 }
  0x56   : > { %p4767_p1 = pnand %p4765_p11, %p4762_p5 }
  0x58   : > { %4770 = shalt.err (!%p4767_p1)
}
  0x59   : > { %s4771_s26 = scalar_lea.vmem %s225_s18, 512  ;;  %p4779_p7 = scmp.lt.s32.totalorder %s225_s18, %s225_s18 }
  0x5a   : > { %p4772_p2 = scmp.ne.s32.totalorder %s225_s18, %s4771_s26  ;;  %p4780_p8 = scmp.lt.s32.totalorder %s4771_s26, %s4771_s26 }
  0x5c   : > { %p4774_p3 = pnand %p4772_p2, %p5038_p0  ;;  %p4781_p13 = por %p4780_p8, %p4779_p7 }
  0x5e   : > { %p4775_p4 = pneg %p4774_p3 }
  0x60   : > { %p4782_p10 = pnand %p4781_p13, %p4775_p4 }
  0x62   : > { %4785 = shalt.err (!%p4782_p10)
}
  0x63   : > { %s4918_s15 = smov 128   ;;  %s4919_s28 = smov 8  }
  0x64   : > { %4635 = dma.hbm_to_vmem [thread:$0]  (!%p5022_p12), %s7118_s3, 512, %s225_s18, [#allocation4], %s4918_s15, %s4918_s15, %s4919_s28  }
  0x65   : > { %s4920_s11 = smov [#allocation12]   ;;  %s7119_s4 = sld [smem:[#allocation88_spill]] }
  0x66   : > { %s237_s13 = sshll.u32 %s4920_s11, 4  ;;  %s238_s13 = int_to_ptr.vmem [resolvable:$true] %s237_s13 }
  0x6b   : > { %s4786_s19 = scalar_lea.hbm %s7119_s4, 512 }
  0x6c   : > { %p4787_p10 = scmp.ne.s32.totalorder %s7119_s4, %s4786_s19  ;;  %p4793_p5 = scmp.lt.u32.totalorder %s4786_s19, %s7119_s4 }
  0x6e   : > { %p4789_p6 = pnand %p4787_p10, %p5038_p0 }
  0x70   : > { %p4790_p9 = pneg %p4789_p6 }
  0x72   : > { %p4795_p11 = pnand %p4793_p5, %p4790_p9 }
  0x74   : > { %4798 = shalt.err (!%p4795_p11)
}
  0x75   : > { %s4799_s18 = scalar_lea.vmem %s238_s13, 512  ;;  %p4807_p4 = scmp.lt.s32.totalorder %s238_s13, %s238_s13 }
  0x76   : > { %p4800_p1 = scmp.ne.s32.totalorder %s238_s13, %s4799_s18  ;;  %p4808_p7 = scmp.lt.s32.totalorder %s4799_s18, %s4799_s18 }
  0x78   : > { %p4802_p2 = pnand %p4800_p1, %p5038_p0  ;;  %p4809_p8 = por %p4808_p7, %p4807_p4 }
  0x7a   : > { %p4803_p3 = pneg %p4802_p2 }
  0x7c   : > { %p4810_p13 = pnand %p4809_p8, %p4803_p3 }
  0x7e   : > { %4813 = shalt.err (!%p4810_p13)
}
  0x7f   : > { %4638 = dma.hbm_to_vmem [thread:$0]  (!%p5022_p12), %s7119_s4, 512, %s238_s13, [#allocation13], %s4918_s15, %s4918_s15, %s4919_s28  }
  0x80   : > { %p7120_p10 = scmp.ne.s32.totalorder %s7112_s9, 0 }
  0x82   : > { %256 = sbr.rel (%p7120_p10) target bundleno = 688 (0x2b0), region = 44 }
  0x89   : > { %p7121_p6 = scmp.eq.s32.totalorder %s4980_s25, 0 }
  0x8b   : > { %4867 = dma.done.wait (%p7121_p6), [#allocation6], 16   ;;  %p7122_p0 = pmov %p7121_p6 }
  0x8d   : > { %4869 = vsyncadd (%p7122_p0), [#allocation6], 4294967280  ;;  %p7123_p9 = pmov %p7122_p0 }
  0x8e   : > { %p7124_p5 = pmov %p7122_p0 }
  0x8f   : > { %4871 = dma.done.wait (%p7123_p9), [#allocation7], 16  }
  0x90   : > { %4873 = vsyncadd (%p7124_p5), [#allocation7], 4294967280  ;;  %p7125_p11 = pmov %p7122_p0 }
  0x91   : > { %p7126_p12 = pmov %p7122_p0 }
  0x92   : > { %4875 = dma.done.wait (%p7125_p11), [#allocation10], 32  }
  0x93   : > { %4877 = vsyncadd (%p7126_p12), [#allocation10], 4294967264  ;;  %p7127_p1 = pmov %p7122_p0 }
  0x94   : > { %p7128_p2 = pmov %p7122_p0 }
  0x95   : > { %4879 = dma.done.wait (%p7127_p1), [#allocation4], 512  }
  0x96   : > { %4881 = vsyncadd (%p7128_p2), [#allocation4], 4294966784  ;;  %p7129_p3 = pmov %p7122_p0 }
  0x97   : > { %p7130_p4 = pmov %p7122_p0 }
  0x98   : > { %4883 = dma.done.wait (%p7129_p3), [#allocation13], 512  }
  0x99   : > { %4885 = vsyncadd (%p7130_p4), [#allocation13], 4294966784 }
  0x9a   : > { %278 = sfence }
  0x9b   : > { %s6967_s0 = sand.u32 1, %s4896_s22   ;;  %s5125_s1 = sld [smem:[#allocation8]]  ;;  %v5132_v1 = vld [vmem:[#allocation11] sm:$0xff]  ;;  %v5134_v2 = vld [vmem:[#allocation11 + $0x8] sm:$0xff]  ;;  %v322_v3 = vlaneseq  ;;  %v5142_v4 = vld [vmem:[#allocation11 + $0x10] sm:$0xff]  ;;  %v5172_v21 = vmov 0.0  }
  0x9c   : > { %s7132_s5 = sld [smem:[#allocation89_spill]]  ;;  %7134 = vst [vmem:[#allocation32_spill] sm:$0xff] %v5132_v1  ;;  %7135 = vst [vmem:[#allocation33_spill] sm:$0xff] %v5134_v2  ;;  %s5138_s10 = sshll.u32 %s6967_s0, 2  ;;  %v5144_v5 = vld [vmem:[#allocation11 + $0x18] sm:$0xff]  ;;  %v5146_v6 = vld [vmem:[#allocation12] sm:$0xff] }
  0x9d   : > { %7136 = sst [smem:[#allocation34_spill]] %s5138_s10  ;;  %s5140_s15 = sld [smem:[#allocation8 + $0x1]]  ;;  %7138 = vst [vmem:[#allocation36_spill] sm:$0xff] %v5142_v4  ;;  %7139 = vst [vmem:[#allocation37_spill] sm:$0xff] %v5144_v5  ;;  %v5148_v7 = vld [vmem:[#allocation12 + $0x8] sm:$0xff]  ;;  %v5150_v8 = vld [vmem:[#allocation12 + $0x10] sm:$0xff]  ;;  %v315_v10 = vmul.f32 %v5146_v6, %v5146_v6 }
  0x9e   : > { %7140 = vst [vmem:[#allocation38_spill] sm:$0xff] %v5148_v7  ;;  %7141 = vst [vmem:[#allocation39_spill] sm:$0xff] %v5150_v8  ;;  %v5152_v9 = vld [vmem:[#allocation12 + $0x18] sm:$0xff]  ;;  %v5156_v11 = vshrl.u32 %v322_v3, 7  ;;  %v316_v12 = vmul.f32 %v5148_v7, %v5148_v7  ;;  %v318_v13 = vmul.f32 %v5150_v8, %v5150_v8  ;;  %s5174_s11 = smov 0  }
  0x9f   : > { %7142 = vst [vmem:[#allocation40_spill] sm:$0xff] %v5152_v9  ;;  %v320_v17 = vmul.f32 %v5152_v9, %v5152_v9 }
  0xa0   : > { %7143 = vst [vmem:[#allocation41_spill] sm:$0xff] %v5156_v11  ;;  %v5163_v14 = vadd.s32 8, %v5156_v11  ;;  %v317_v16 = vadd.f32 %v316_v12, %v315_v10 }
  0xa1   : > { %7131 = sst [smem:[#allocation30_spill]] %s5125_s1 }
  0xa2   : > { %v5130_v0 = vld [vmem:[%s7132_s5] sm:$0xff]  ;;  %7144 = vst [vmem:[#allocation42_spill] sm:$0xff] %v5163_v14  ;;  %v319_v19 = vadd.f32 %v318_v13, %v317_v16 }
  0xa3   : > { %7133 = vst [vmem:[#allocation31_spill] sm:$0xff] %v5130_v0  ;;  %7137 = sst [smem:[#allocation35_spill]] %s5140_s15 }
  0xa4   : > { %v5169_v20 = vadd.f32 %v320_v17, %v319_v19 }
  0xa6   : > { %7145 = vst [vmem:[#allocation43_spill] sm:$0xff] %v5169_v20 }
  0xa7 LB: >> { %v7147_v4 = vld [vmem:[#allocation36_spill] sm:$0xff]  ;;  %v7148_v5 = vld [vmem:[#allocation37_spill] sm:$0xff]  ;;  %v7149_v2 = vld [vmem:[#allocation33_spill] sm:$0xff]  ;;  %s7156_s1 = sld [smem:[#allocation30_spill]]  ;;  %s7157_s25 = sld [smem:[#allocation25_spill]]  ;;  %7158 = vst [vmem:[#allocation44_spill] sm:$0xff] %v4908_v21  ;;  %v4908_v21 = vphi %v5172_v21, %v7340_v21   ;;  %s4912_s11 = sphi %s5174_s11, %s332_s11  }
  0xa8   : >> { %v7150_v1 = vld [vmem:[#allocation32_spill] sm:$0xff]  ;;  %v7152_v8 = vld [vmem:[#allocation39_spill] sm:$0xff]  ;;  %v7153_v9 = vld [vmem:[#allocation40_spill] sm:$0xff]  ;;  %7159 = sst [smem:[#allocation45_spill]] %s4912_s11  ;;  %s7160_s15 = sld [smem:[#allocation35_spill]]  ;;  %vm352_vm0 = vcmask 64512  }
  0xa9   : >> { %v7151_v7 = vld [vmem:[#allocation38_spill] sm:$0xff]  ;;  %v7154_v11 = vld [vmem:[#allocation41_spill] sm:$0xff] }
  0xaa   : >> { %v7155_v0 = vld [vmem:[#allocation31_spill] sm:$0xff]  ;;  %v439_v22 = vsub.s32 0, %v7154_v11  ;;  %v448_v23 = vsub.s32 1, %v7154_v11  ;;  %v460_v24 = vsub.s32 2, %v7154_v11  ;;  %v7164_v15 = vcvt.s32.f32 %v7154_v11  ;;  %v7165_v14 = vld [vmem:[#allocation42_spill] sm:$0xff] }
  0xab   : >> { %v7166_v18 = vcvt.s32.f32 %v7165_v14 }
  0xac   : >> { %v5218_v27 = vrot.slane %v7155_v0, %v439_v22  ;;  %v5226_v31 = vrot.slane %v7155_v0, %v448_v23  ;;  %v5247_v37 = vrot.slane %v7155_v0, %v460_v24 }
  0xad   : >> { %v7146_v20 = vld [vmem:[#allocation43_spill] sm:$0xff]  ;;  %s4257_s13 = sshll.u32 %s7157_s25, 2  ;;  %v431_v26 = vstv %s7156_s1 }
  0xae   : >> { %4368 = vmatprep.subr.mxu1 %v7146_v20  ;;  %s335_s14 = sadd.s32 %s4912_s11, %s4257_s13  ;;  %7161 = vst [vmem:[#allocation46_spill] sm:$0xff] %v5218_v27  ;;  %7162 = vst [vmem:[#allocation47_spill] sm:$0xff] %v5226_v31 }
  0xaf   : >> { %4369 = vmatpush3.xpose.msra.mxu1 %v7146_v20  ;;  %s336_s17 = sld [smem:[#allocation3 + %s335_s14]]  ;;  %s5186_s19 = sshll.u32 %s335_s14, 5  ;;  %7163 = vst [vmem:[#allocation48_spill] sm:$0xff] %v5247_v37 }
  0xb0   : >> { %s5189_s20 = sld [smem:[#allocation9 + %s5186_s19]]  ;;  %s356_s26 = sadd.s32 1, %s5186_s19 }
  0xb1   : >> { %s5192_s18 = sld [smem:[#allocation9 + %s356_s26]]  ;;  %s358_s29 = sadd.s32 2, %s5186_s19 }
  0xb2   : >> { %s5195_s12 = sld [smem:[#allocation9 + %s358_s29]]  ;;  %s360_s9 = sadd.s32 3, %s5186_s19 }
  0xb3   : >> { %s5199_s16 = sld [smem:[#allocation9 + %s360_s9]]  ;;  %s362_s13 = sadd.s32 4, %s5186_s19 }
  0xb4   : >> { %s364_s14 = sadd.s32 5, %s5186_s19  ;;  %s6969_s29 = sadd.s32 6, %s5186_s19 }
  0xb5   : >> { %s5204_s0 = smul.f32 0.14285715, %s336_s17  ;;  %s346_s26 = ssub.f32 %s7160_s15, %s336_s17 }
  0xb6   : >> { %v374_v25 = vstv %s5189_s20  ;;  %s5212_s28 = sld [smem:[#allocation9 + %s362_s13]]  ;;  %s4921_s9 = smov 1e-30  }
  0xb7   : >> { %s341_s2 = smax.f32 %s4921_s9, %s5204_s0  ;;  %s347_s3 = ssub.f32 %s346_s26, %s7156_s1  ;;  %v5221_v28 = vsub.f32 %v7150_v1, %v374_v25  ;;  %v382_v29 = vstv %s5192_s18  ;;  %v5269_v49 = vstv %s5204_s0 }
  0xb8   : >> { %v342_v30 = vstv %s341_s2  ;;  %s425_s17 = smul.f32 0.0, %s5204_s0  ;;  %v5229_v32 = vsub.f32 %v7149_v2, %v382_v29  ;;  %v395_v33 = vstv %s5195_s12  ;;  %s5234_s26 = sld [smem:[#allocation9 + %s364_s14]]  ;;  %7167 = vst [vmem:[#allocation49_spill] sm:$0xff] %v5269_v49 }
  0xb9   : >> { %4711 = vrcp.f32 %v342_v30  ;;  %s350_s9 = smul.f32 0.06666667, %s347_s3  ;;  %v376_v34 = vmul.f32 %v5221_v28, %v5221_v28  ;;  %v5239_v35 = vsub.f32 %v7147_v4, %v395_v33  ;;  %v408_v36 = vstv %s5199_s16  ;;  %s5244_s2 = sld [smem:[#allocation9 + %s6969_s29]] }
  0xba   : >> { %v384_v38 = vmul.f32 %v5229_v32, %v5229_v32  ;;  %v5252_v39 = vsub.f32 %v7148_v5, %v408_v36  ;;  %v377_v40 = vmul.f32 %v5221_v28, %v5146_v6  ;;  %v386_v43 = vmul.f32 %v5229_v32, %v7151_v7  ;;  %s6968_s3 = sadd.s32 7, %s5186_s19  ;;  %p340_p7 = scmp.gt.f32.partialorder %s5204_s0, 0.0 }
  0xbb   : >> { %v428_v41 = vstv %s350_s9  ;;  %v397_v42 = vmul.f32 %v5239_v35, %v5239_v35  ;;  %v399_v44 = vmul.f32 %v5239_v35, %v7152_v8  ;;  %v434_v50 = vstv %s425_s17  ;;  %s5300_s17 = sld [smem:[#allocation9 + %s6968_s3]]  ;;  %s3090_s27 = smul.f32 5.0, %s5204_s0 }
  0xbc   : >> { %v429_v45 = vmul.f32 %v428_v41, %v7164_v15  ;;  %v430_v46 = vmul.f32 %v428_v41, %v7166_v18  ;;  %v385_v47 = vadd.f32 %v384_v38, %v376_v34  ;;  %v410_v48 = vmul.f32 %v5252_v39, %v5252_v39  ;;  %s5358_s9 = sld [smem:[#allocation9 + %s362_s13]]  ;;  %s7169_s13 = sadd.s32 6, %s5186_s19 }
  0xbd   : >> { %v925_v51 = vstv %s5212_s28  ;;  %v387_v52 = vadd.f32 %v386_v43, %v377_v40  ;;  %v412_v60 = vmul.f32 %v5252_v39, %v7153_v9  ;;  %s5370_s3 = sld [smem:[#allocation9 + %s364_s14]]  ;;  %s7170_s14 = sadd.s32 7, %s5186_s19 }
  0xbe   : >> { %v5272_v53 = vadd.f32 %v431_v26, %v429_v45  ;;  %v5274_v54 = vadd.f32 %v431_v26, %v430_v46  ;;  %v398_v55 = vadd.f32 %v397_v42, %v385_v47  ;;  %v5278_v56 = vsub.f32 %v7150_v1, %v925_v51  ;;  %s5383_s1 = sld [smem:[#allocation9 + %s7169_s13]]  ;;  %s7171_s13 = sadd.s32 8, %s5186_s19 }
  0xbf   : >> { %v933_v57 = vstv %s5234_s26  ;;  %v946_v58 = vstv %s5244_s2  ;;  %v400_v59 = vadd.f32 %v399_v44, %v387_v52  ;;  %s5392_s29 = sld [smem:[#allocation9 + %s7170_s14]]  ;;  %s7172_s14 = sadd.s32 9, %s5186_s19 }
  0xc0   : >> { %7168 = vst [vmem:[#allocation50_spill] sm:$0xff] %v5272_v53  ;;  %v5285_v61 = vadd.f32 %v434_v50, %v5272_v53  ;;  %v5288_v62 = vadd.f32 %v434_v50, %v5274_v54  ;;  %v411_v63 = vadd.f32 %v410_v48, %v398_v55  ;;  %v5292_v3 = vadd.f32 %v5269_v49, %v5272_v53  ;;  %s5404_s4 = sld [smem:[#allocation9 + %s7171_s13]]  ;;  %s7175_s13 = sadd.s32 10, %s5186_s19 }
  0xc1   : >> { %v5296_v10 = vadd.f32 %v5269_v49, %v5274_v54  ;;  %v927_v12 = vmul.f32 %v5278_v56, %v5278_v56  ;;  %v5305_v13 = vsub.f32 %v7149_v2, %v933_v57  ;;  %v5308_v16 = vsub.f32 %v7147_v4, %v946_v58  ;;  %s5415_s5 = sld [smem:[#allocation9 + %s7172_s14]]  ;;  %s7176_s14 = sadd.s32 11, %s5186_s19 }
  0xc2   : >> { %v5312_v17 = vmax.f32 %v5285_v61, %v5218_v27  ;;  %v444_v19 = vadd.f32 %v5269_v49, %v5285_v61  ;;  %v445_v22 = vadd.f32 %v5269_v49, %v5288_v62  ;;  %v5320_v23 = vmax.f32 %v5288_v62, %v5218_v27  ;;  %s5427_s15 = sld [smem:[#allocation9 + %s7175_s13]]  ;;  %s5456_s13 = ssub.f32 %s5358_s9, %s5189_s20 }
  0xc3   : >> { %v4712_v24 = vpop.eup %4711  ;;  %v5322_v25 = vmul.f32 3.0, %v411_v63  ;;  %v5326_v26 = vmax.f32 %v5292_v3, %v5218_v27  ;;  %v980_v29 = vadd.f32 %v5292_v3, %v5269_v49  ;;  %v5332_v30 = vmax.f32 %v5296_v10, %v5218_v27  ;;  %s5440_s30 = sld [smem:[#allocation9 + %s7176_s14]]  ;;  %s5469_s14 = ssub.f32 %s5370_s3, %s5192_s18 }
  0xc4   : >> { %4599 = vpush %v4712_v24  ;;  %v450_v33 = vmin.f32 %v444_v19, %v5226_v31  ;;  %v456_v34 = vsub.f32 %v5312_v17, %v5218_v27  ;;  %v451_v36 = vmin.f32 %v445_v22, %v5226_v31  ;;  %v457_v38 = vsub.f32 %v5320_v23, %v5218_v27  ;;  %s5479_s20 = ssub.f32 %s5383_s1, %s5195_s12  ;;  %s7216_s21 = sadd.s32 15, %s5186_s19 }
  0xc5   : >> { %4373 = vmatprep.subr.mxu1 %v5322_v25  ;;  %v982_v40 = vmin.f32 %v980_v29, %v5226_v31  ;;  %v988_v41 = vsub.f32 %v5326_v26, %v5218_v27  ;;  %v981_v42 = vadd.f32 %v5296_v10, %v5269_v49  ;;  %v989_v43 = vsub.f32 %v5332_v30, %v5218_v27  ;;  %7179 = sst [smem:[#allocation55_spill]] %s5469_s14 }
  0xc6   : >> { %v452_v44 = vsub.f32 %v450_v33, %v5312_v17  ;;  %v5350_v45 = vmul.f32 %v5247_v37, %v456_v34  ;;  %v453_v46 = vsub.f32 %v451_v36, %v5320_v23  ;;  %v5354_v47 = vmul.f32 %v5247_v37, %v457_v38  ;;  %7180 = sst [smem:[#allocation56_spill]] %s5479_s20 }
  0xc7   : >> { %v984_v48 = vsub.f32 %v982_v40, %v5326_v26  ;;  %v5362_v50 = vmul.f32 %v988_v41, %v5247_v37  ;;  %v983_v51 = vmin.f32 %v981_v42, %v5226_v31  ;;  %v5366_v52 = vmul.f32 %v989_v43, %v5247_v37  ;;  %s5493_s18 = ssub.f32 %s5392_s29, %s5199_s16  ;;  %s1503_s16 = smul.f32 2.0, %s5204_s0 }
  0xc8   : >> { %v5373_v55 = vmax.f32 %v452_v44, 0.0  ;;  %v5375_v57 = vmax.f32 %v453_v46, 0.0  ;;  %v935_v58 = vmul.f32 %v5305_v13, %v5305_v13  ;;  %v948_v63 = vmul.f32 %v5308_v16, %v5308_v16  ;;  %s5499_s1 = ssub.f32 %s5404_s4, %s5212_s28  ;;  %s2032_s28 = smul.f32 3.0, %s5204_s0 }
  0xc9   : >> { %v5386_v19 = vmax.f32 %v984_v48, 0.0  ;;  %v985_v22 = vsub.f32 %v983_v51, %v5332_v30  ;;  %v959_v24 = vstv %s5300_s17  ;;  %v413_v29 = vadd.f32 %v412_v60, %v400_v59  ;;  %7182 = sst [smem:[#allocation58_spill]] %s5493_s18  ;;  %s7186_s29 = sadd.s32 9, %s5186_s19 }
  0xca   : >> { %v464_v33 = vmul.f32 %v5247_v37, %v5373_v55  ;;  %v465_v34 = vmul.f32 %v5247_v37, %v5375_v57  ;;  %v936_v36 = vadd.f32 %v935_v58, %v927_v12  ;;  %v5400_v38 = vsub.f32 %v7148_v5, %v959_v24  ;;  %s5507_s12 = ssub.f32 %s5415_s5, %s5234_s26  ;;  %s5572_s26 = sld [smem:[#allocation9 + %s7186_s29]] }
  0xcb   : >> { %v992_v59 = vmul.f32 %v5386_v19, %v5247_v37  ;;  %v5409_v60 = vmax.f32 %v985_v22, 0.0  ;;  %v422_v40 = vmul.f32 3.0, %v413_v29  ;;  %v928_v41 = vmul.f32 %v5278_v56, %v5146_v6  ;;  %s5514_s4 = ssub.f32 %s5427_s15, %s5244_s2  ;;  %s7187_s2 = sadd.s32 10, %s5186_s19 }
  0xcc   : >> { %v5418_v12 = vadd.f32 %v464_v33, %v5350_v45  ;;  %v5421_v42 = vadd.f32 %v465_v34, %v5354_v47  ;;  %v949_v43 = vadd.f32 %v948_v63, %v936_v36  ;;  %v961_v44 = vmul.f32 %v5400_v38, %v5400_v38  ;;  %s5521_s5 = ssub.f32 %s5440_s30, %s5300_s17  ;;  %s7185_s30 = sadd.s32 8, %s5186_s19 }
  0xcd   : >> { %v5430_v46 = vadd.f32 %v992_v59, %v5362_v50  ;;  %v993_v48 = vmul.f32 %v5409_v60, %v5247_v37  ;;  %4378 = vmatprep.subr.mxu0 %v422_v40  ;;  %v937_v51 = vmul.f32 %v5305_v13, %v7151_v7  ;;  %v950_v58 = vmul.f32 %v5308_v16, %v7152_v8  ;;  %7183 = sst [smem:[#allocation59_spill]] %s5514_s4  ;;  %s7188_s17 = sadd.s32 11, %s5186_s19 }
  0xce   : >> { %7173 = vst [vmem:[#allocation51_spill] sm:$0xff] %v5418_v12  ;;  %7174 = vst [vmem:[#allocation52_spill] sm:$0xff] %v5421_v42  ;;  %v5444_v63 = vadd.f32 %v5418_v12, %v5350_v45  ;;  %v483_v22 = vmul.f32 %v5418_v12, %v5350_v45  ;;  %v5450_v24 = vadd.f32 %v5421_v42, %v5354_v47  ;;  %4379 = vmatpush3.xpose.msra.mxu0 %v422_v40  ;;  %7184 = sst [smem:[#allocation60_spill]] %s5521_s5  ;;  %s7012_s29 = sadd.s32 14, %s5186_s19 }
  0xcf   : >> { %v484_v29 = vmul.f32 %v5421_v42, %v5354_v47  ;;  %v5460_v33 = vadd.f32 %v5430_v46, %v5362_v50  ;;  %v1010_v34 = vmul.f32 %v5430_v46, %v5362_v50  ;;  %v5465_v36 = vadd.f32 %v993_v48, %v5366_v52  ;;  %s5548_s15 = sld [smem:[#allocation9 + %s7185_s30]]  ;;  %s6988_s30 = sadd.s32 12, %s5186_s19 }
  0xd0   : >> { %7177 = vst [vmem:[#allocation53_spill] sm:$0xff] %v5450_v24  ;;  %v962_v59 = vadd.f32 %v961_v44, %v949_v43  ;;  %v481_v40 = vmul.f32 %v5444_v63, %v5444_v63  ;;  %v482_v15 = vmul.f32 %v5450_v24, %v5450_v24  ;;  %v938_v18 = vadd.f32 %v937_v51, %v928_v41  ;;  %s5577_s3 = sld [smem:[#allocation9 + %s7187_s2]]  ;;  %s7009_s2 = sadd.s32 15, %s5186_s19 }
  0xd1   : >> { %7178 = vst [vmem:[#allocation54_spill] sm:$0xff] %v5465_v36  ;;  %v963_v0 = vmul.f32 %v5400_v38, %v7153_v9  ;;  %v1008_v43 = vmul.f32 %v5460_v33, %v5460_v33  ;;  %v5485_v44 = vadd.f32 %v5465_v36, %v5366_v52  ;;  %v1011_v48 = vmul.f32 %v5465_v36, %v5366_v52  ;;  %s5595_s9 = sld [smem:[#allocation9 + %s7188_s17]] }
  0xd2   : >> { %v5489_v14 = vmul.f32 3.0, %v962_v59  ;;  %v485_v41 = vsub.f32 %v481_v40, %v483_v22  ;;  %v486_v51 = vsub.f32 %v482_v15, %v484_v29  ;;  %v951_v21 = vadd.f32 %v950_v58, %v938_v18  ;;  %s5908_s24 = sld [smem:[#allocation9 + %s7216_s21]] }
  0xd3   : >> { %7181 = vst [vmem:[#allocation57_spill] sm:$0xff] %v5485_v44  ;;  %v655_v11 = vmul.f32 %v5444_v63, %v5373_v55  ;;  %v1012_v42 = vsub.f32 %v1008_v43, %v1010_v34  ;;  %v1009_v59 = vmul.f32 %v5485_v44, %v5485_v44  ;;  %v378_v36 = vstv %s5456_s13 }
  0xd4   : >> { %v388_v12 = vstv %s5469_s14  ;;  %v503_v15 = vmul.f32 %v485_v41, %v5373_v55  ;;  %v504_v18 = vmul.f32 %v486_v51, %v5375_v57  ;;  %v964_v58 = vadd.f32 %v963_v0, %v951_v21 }
  0xd5   : >> { %4380 = vmatprep.mubr.f32.mxu0 %v655_v11  ;;  %v379_v22 = vmul.f32 %v378_v36, %v5221_v28  ;;  %v1030_v29 = vmul.f32 %v1012_v42, %v5386_v19  ;;  %v1013_v34 = vsub.f32 %v1009_v59, %v1011_v48  ;;  %v389_v40 = vmul.f32 %v388_v12, %v5229_v32 }
  0xd6   : >> { %v401_v43 = vstv %s5479_s20  ;;  %4370 = vmatprep.mubr.f32.mxu1 %v503_v15  ;;  %v5523_v41 = vmul.f32 3.0, %v964_v58  ;;  %v414_v11 = vstv %s5493_s18  ;;  %v5529_v21 = vmul.f32 %v5460_v33, %v5386_v19 }
  0xd7   : >> { %v402_v0 = vmul.f32 %v401_v43, %v5239_v35  ;;  %4371 = vmatmul.mubr.f32.vlgmr.msra.gmra.mrb[0].mxu1 %v504_v18  ;;  %v5532_v28 = vmul.f32 %v1013_v34, %v5409_v60  ;;  %v390_v32 = vadd.f32 %v389_v40, %v379_v22  ;;  %v415_v42 = vmul.f32 %v414_v11, %v5252_v39 }
  0xd8   : >> { %v656_v48 = vmul.f32 %v5450_v24, %v5375_v57  ;;  %4374 = vmatpush3.xpose.msra.mxu1 %v5322_v25  ;;  %4375 = vmatprep.mubr.f32.mxu1 %v5373_v55  ;;  %v5541_v35 = vmul.f32 %v5485_v44, %v5409_v60  ;;  %v929_v51 = vstv %s5499_s1  ;;  %v939_v59 = vstv %s5507_s12 }
  0xd9   : >> { %v952_v15 = vstv %s5514_s4  ;;  %4393 = vmatprep.subr.mxu1 %v7146_v20  ;;  %v403_v39 = vadd.f32 %v402_v0, %v390_v32  ;;  %v930_v25 = vmul.f32 %v929_v51, %v5278_v56  ;;  %v940_v18 = vmul.f32 %v939_v59, %v5305_v13 }
  0xda   : >> { %4381 = vmatmul.mubr.f32.vlgmr.msra.gmra.mrb[0].mxu0 %v656_v48  ;;  %v965_v58 = vstv %s5521_s5  ;;  %v953_v22 = vmul.f32 %v952_v15, %v5308_v16  ;;  %v380_v44 = vmul.f32 %v378_v36, %v5146_v6  ;;  %v391_v32 = vmul.f32 %v388_v12, %v7151_v7 }
  0xdb   : >> { %v966_v34 = vmul.f32 %v965_v58, %v5400_v38  ;;  %v416_v24 = vadd.f32 %v415_v42, %v403_v39  ;;  %v941_v0 = vadd.f32 %v940_v18, %v930_v25  ;;  %v404_v56 = vmul.f32 %v401_v43, %v7152_v8 }
  0xdc   : >> { %v417_v13 = vmul.f32 %v414_v11, %v7153_v9  ;;  %v392_v12 = vadd.f32 %v391_v32, %v380_v44  ;;  %v931_v43 = vmul.f32 %v929_v51, %v5146_v6  ;;  %v942_v11 = vmul.f32 %v939_v59, %v7151_v7 }
  0xdd   : >> { %v423_v42 = vmul.f32 -3.0, %v416_v24  ;;  %v954_v48 = vadd.f32 %v953_v22, %v941_v0  ;;  %v955_v39 = vmul.f32 %v952_v15, %v7152_v8  ;;  %v968_v25 = vmul.f32 %v965_v58, %v7153_v9 }
  0xde   : >> { %v2033_v18 = vstv %s2032_s28  ;;  %v405_v22 = vadd.f32 %v404_v56, %v392_v12  ;;  %v1504_v51 = vstv %s1503_s16  ;;  %v943_v59 = vadd.f32 %v942_v11, %v931_v43  ;;  %s5638_s28 = sld [smem:[#allocation9 + %s6988_s30]]  ;;  %s6987_s16 = sadd.s32 13, %s5186_s19 }
  0xdf   : >> { %4376 = vmatmul.mubr.f32.vlgmr.msra.gmra.mrb[0].mxu1 %v5375_v57  ;;  %4383 = vmatprep.subr.mxu0 %v423_v42  ;;  %v967_v24 = vadd.f32 %v966_v34, %v954_v48  ;;  %v5584_v44 = vadd.f32 %v2033_v18, %v5272_v53  ;;  %v5588_v0 = vadd.f32 %v2033_v18, %v5274_v54  ;;  %v1452_v58 = vstv %s5548_s15  ;;  %s5694_s17 = sld [smem:[#allocation9 + %s6987_s16]] }
  0xe0   : >> { %4394 = vmatpush3.xpose.msra.mxu1 %v7146_v20  ;;  %4395 = vmatprep.mubr.f32.mxu1 %v1030_v29  ;;  %v5591_v15 = vadd.f32 %v1504_v51, %v5272_v53  ;;  %v418_v32 = vadd.f32 %v417_v13, %v405_v22  ;;  %v956_v48 = vadd.f32 %v955_v39, %v943_v59  ;;  %s5716_s16 = sld [smem:[#allocation9 + %s7012_s29]] }
  0xe1   : >> { %4398 = vmatprep.subr.mxu1 %v5489_v14  ;;  %4384 = vmatpush3.xpose.msra.mxu0 %v423_v42  ;;  %v5599_v34 = vmul.f32 -3.0, %v967_v24  ;;  %v5603_v29 = vmax.f32 %v5584_v44, %v5218_v27  ;;  %v2038_v56 = vadd.f32 %v5584_v44, %v5269_v49  ;;  %v5610_v12 = vadd.f32 %v5588_v0, %v5269_v49  ;;  %s5720_s30 = sld [smem:[#allocation9 + %s7009_s2]]  ;;  %s2561_s2 = smul.f32 4.0, %s5204_s0 }
  0xe2   : >> { %v5613_v42 = vadd.f32 %v1504_v51, %v5274_v54  ;;  %v1509_v13 = vadd.f32 %v5591_v15, %v5269_v49  ;;  %v5618_v43 = vmul.f32 -1.0, %v418_v32  ;;  %v5625_v18 = vmax.f32 %v5591_v15, %v5218_v27 }
  0xe3   : >> { %4396 = vmatmul.mubr.f32.vlgmr.msra.gmra.mrb[2].mxu1 %v5532_v28  ;;  %v2040_v11 = vmin.f32 %v2038_v56, %v5226_v31  ;;  %v2046_v39 = vsub.f32 %v5603_v29, %v5218_v27  ;;  %v969_v24 = vadd.f32 %v968_v25, %v956_v48  ;;  %v1460_v51 = vstv %s5572_s26 }
  0xe4   : >> { %4399 = vmatpush3.xpose.msra.mxu1 %v5489_v14  ;;  %4400 = vmatprep.mubr.f32.mxu1 %v5386_v19  ;;  %v5631_v28 = vmax.f32 %v5613_v42, %v5218_v27  ;;  %v1510_v22 = vadd.f32 %v5613_v42, %v5269_v49  ;;  %v1511_v59 = vmin.f32 %v1509_v13, %v5226_v31  ;;  %v1473_v32 = vstv %s5577_s3 }
  0xe5   : >> { %4403 = vmatprep.subr.mxu1 %v5523_v41  ;;  %4388 = vmatprep.subr.mxu0 %v5618_v43  ;;  %v2042_v14 = vsub.f32 %v2040_v11, %v5603_v29  ;;  %v5644_v25 = vmul.f32 %v2046_v39, %v5247_v37  ;;  %v5648_v56 = vmul.f32 -1.0, %v969_v24  ;;  %v1517_v38 = vsub.f32 %v5625_v18, %v5218_v27 }
  0xe6   : >> { %v1512_v48 = vmin.f32 %v1510_v22, %v5226_v31  ;;  %v1513_v39 = vsub.f32 %v1511_v59, %v5625_v18  ;;  %v5659_v16 = vsub.f32 %v7150_v1, %v1452_v58  ;;  %v5662_v13 = vsub.f32 %v7149_v2, %v1460_v51 }
  0xe7   : >> { %7189 = vst [vmem:[#allocation61_spill] sm:$0xff] %v5644_v25  ;;  %v5655_v11 = vmax.f32 %v2042_v14, 0.0  ;;  %v5667_v22 = vmul.f32 %v1517_v38, %v5247_v37  ;;  %v5670_v36 = vsub.f32 %v7147_v4, %v1473_v32  ;;  %v1486_v14 = vstv %s5595_s9 }
  0xe8   : >> { %7190 = vst [vmem:[#allocation62_spill] sm:$0xff] %v5659_v16  ;;  %7191 = vst [vmem:[#allocation63_spill] sm:$0xff] %v5662_v13  ;;  %v1514_v24 = vsub.f32 %v1512_v48, %v5631_v28  ;;  %v5675_v40 = vmax.f32 %v1513_v39, 0.0  ;;  %v1454_v58 = vmul.f32 %v5659_v16, %v5659_v16  ;;  %v1462_v51 = vmul.f32 %v5662_v13, %v5662_v13 }
  0xe9   : >> { %7192 = vst [vmem:[#allocation64_spill] sm:$0xff] %v5667_v22  ;;  %7193 = vst [vmem:[#allocation65_spill] sm:$0xff] %v5670_v36  ;;  %v2050_v59 = vmul.f32 %v5655_v11, %v5247_v37  ;;  %v1475_v32 = vmul.f32 %v5670_v36, %v5670_v36  ;;  %v5688_v48 = vsub.f32 %v7148_v5, %v1486_v14 }
  0xea   : >> { %v5683_v38 = vmax.f32 %v1514_v24, 0.0  ;;  %v1521_v24 = vmul.f32 %v5675_v40, %v5247_v37  ;;  %v1463_v9 = vadd.f32 %v1462_v51, %v1454_v58  ;;  %v1518_v36 = vsub.f32 %v5631_v28, %v5218_v27 }
  0xeb   : >> { %7194 = vst [vmem:[#allocation66_spill] sm:$0xff] %v5688_v48  ;;  %4401 = vmatmul.mubr.f32.vlgmr.msra.gmra.mrb[2].mxu1 %v5409_v60  ;;  %v5698_v53 = vadd.f32 %v2050_v59, %v5644_v25  ;;  %v1488_v14 = vmul.f32 %v5688_v48, %v5688_v48  ;;  %v5712_v59 = vmax.f32 %v5588_v0, %v5218_v27  ;;  %v1981_v58 = vstv %s5638_s28 }
  0xec   : >> { %4404 = vmatpush3.xpose.msra.mxu1 %v5523_v41  ;;  %4405 = vmatprep.mubr.f32.mxu1 %v5529_v21  ;;  %v1522_v39 = vmul.f32 %v5683_v38, %v5247_v37  ;;  %v5731_v51 = vadd.f32 %v1521_v24, %v5667_v22  ;;  %v1476_v48 = vadd.f32 %v1475_v32, %v1463_v9 }
  0xed   : >> { %7195 = vst [vmem:[#allocation67_spill] sm:$0xff] %v5698_v53  ;;  %4408 = vmatprep.subr.mxu1 %v5599_v34  ;;  %v5726_v41 = vadd.f32 %v5698_v53, %v5644_v25  ;;  %v2068_v21 = vmul.f32 %v5698_v53, %v5644_v25  ;;  %v5734_v8 = vmul.f32 %v1518_v36, %v5247_v37 }
  0xee   : >> { %7197 = vst [vmem:[#allocation69_spill] sm:$0xff] %v5731_v51  ;;  %v2041_v13 = vmin.f32 %v5610_v12, %v5226_v31  ;;  %v2047_v7 = vsub.f32 %v5712_v59, %v5218_v27  ;;  %v5746_v9 = vadd.f32 %v5731_v51, %v5667_v22  ;;  %v1539_v36 = vmul.f32 %v5731_v51, %v5667_v22 }
  0xef   : >> { %7196 = vst [vmem:[#allocation68_spill] sm:$0xff] %v5726_v41  ;;  %7198 = vst [vmem:[#allocation70_spill] sm:$0xff] %v5734_v8  ;;  %v2066_v53 = vmul.f32 %v5726_v41, %v5726_v41  ;;  %v1489_v32 = vadd.f32 %v1488_v14, %v1476_v48  ;;  %v5751_v12 = vadd.f32 %v1522_v39, %v5734_v8 }
  0xf0   : >> { %7199 = vst [vmem:[#allocation71_spill] sm:$0xff] %v5746_v9  ;;  %v2043_v24 = vsub.f32 %v2041_v13, %v5712_v59  ;;  %v5755_v49 = vmul.f32 %v2047_v7, %v5247_v37  ;;  %v1537_v31 = vmul.f32 %v5746_v9, %v5746_v9  ;;  %v5764_v48 = vsub.f32 %v7150_v1, %v1981_v58  ;;  %v7214_v9 = vld [vmem:[#allocation51_spill] sm:$0xff] }
  0xf1   : >> { %7200 = vst [vmem:[#allocation72_spill] sm:$0xff] %v5751_v12  ;;  %v2070_v41 = vsub.f32 %v2066_v53, %v2068_v21  ;;  %v5761_v27 = vmul.f32 3.0, %v1489_v32  ;;  %v5769_v13 = vadd.f32 %v5751_v12, %v5734_v8  ;;  %v1540_v7 = vmul.f32 %v5751_v12, %v5734_v8 }
  0xf2   : >> { %7201 = vst [vmem:[#allocation73_spill] sm:$0xff] %v5755_v49  ;;  %7202 = vst [vmem:[#allocation74_spill] sm:$0xff] %v5764_v48  ;;  %v5773_v39 = vmax.f32 %v2043_v24, 0.0  ;;  %v1989_v53 = vstv %s5694_s17  ;;  %v1541_v58 = vsub.f32 %v1537_v31, %v1539_v36  ;;  %v1983_v21 = vmul.f32 %v5764_v48, %v5764_v48 }
  0xf3   : >> { %7203 = vst [vmem:[#allocation75_spill] sm:$0xff] %v5769_v13  ;;  %4406 = vmatmul.mubr.f32.vlgmr.msra.gmra.mrb[2].mxu1 %v5541_v35  ;;  %v5779_v14 = vmul.f32 %v2070_v41, %v5655_v11  ;;  %v5784_v32 = vsub.f32 %v7149_v2, %v1989_v53  ;;  %v1538_v24 = vmul.f32 %v5769_v13, %v5769_v13  ;;  %v2002_v35 = vstv %s5716_s16 }
  0xf4   : >> { %4409 = vmatpush3.xpose.msra.mxu1 %v5599_v34  ;;  %v2051_v25 = vmul.f32 %v5773_v39, %v5247_v37  ;;  %v2015_v1 = vstv %s5720_s30  ;;  %v5795_v31 = vmul.f32 %v1541_v58, %v5675_v40  ;;  %v5800_v34 = vsub.f32 %v7147_v4, %v2002_v35 }
  0xf5   : >> { %7204 = vst [vmem:[#allocation76_spill] sm:$0xff] %v5784_v32  ;;  %s4600_s29 = spop %4599  ;;  %4413 = vmatprep.subr.mxu1 %v5648_v56  ;;  %v1991_v41 = vmul.f32 %v5784_v32, %v5784_v32  ;;  %v5803_v36 = vsub.f32 %v7148_v5, %v2015_v1  ;;  %v1542_v53 = vsub.f32 %v1538_v24, %v1540_v7  ;;  %v5810_v37 = vstv %s2561_s2  ;;  %s7208_s2 = sadd.s32 12, %s5186_s19 }
  0xf6   : >> { %7205 = vst [vmem:[#allocation77_spill] sm:$0xff] %v5800_v34  ;;  %s7359_s29 = smov (!%p340_p7, %s4600_s29), 0.0  ;;  %v5808_v2 = vadd.f32 %v2051_v25, %v5755_v49  ;;  %v5814_v58 = vmul.f32 %v5659_v16, %v5146_v6  ;;  %v5820_v35 = vmul.f32 %v5800_v34, %v5800_v34  ;;  %v5828_v25 = vadd.f32 %v5810_v37, %v5274_v54  ;;  %s5832_s23 = sld [smem:[#allocation9 + %s7208_s2]] }
  0xf7   : >> { %7206 = vst [vmem:[#allocation78_spill] sm:$0xff] %v5803_v36  ;;  %v5816_v12 = vadd.f32 %v1991_v41, %v1983_v21  ;;  %v5824_v1 = vmul.f32 %v5803_v36, %v5803_v36  ;;  %v5834_v7 = vstv %s7359_s29  ;;  %v5837_v21 = vmul.f32 %v1542_v53, %v5683_v38  ;;  %s7213_s29 = sadd.s32 13, %s5186_s19 }
  0xf8   : >> { %7207 = vst [vmem:[#allocation79_spill] sm:$0xff] %v5808_v2  ;;  %v5841_v24 = vadd.f32 %v5808_v2, %v5755_v49  ;;  %v5845_v41 = vmul.f32 %v5808_v2, %v5755_v49  ;;  %v7209_v5 = vsub.f32 %v5312_v17, %v5285_v61  ;;  %v473_v8 = vmul.f32 %v5834_v7, %v5373_v55  ;;  %s5875_s2 = sld [smem:[#allocation9 + %s7213_s29]]  ;;  %s3619_s29 = smul.f32 6.0, %s5204_s0 }
  0xf9   : >> { %v7210_v53 = vsub.f32 %v5326_v26, %v5292_v3  ;;  %v1000_v22 = vmul.f32 %v5386_v19, %v5834_v7  ;;  %v7211_v2 = vsub.f32 %v5320_v23, %v5288_v62  ;;  %v474_v61 = vmul.f32 %v5834_v7, %v5375_v57  ;;  %s7215_s0 = sadd.s32 14, %s5186_s19 }
  0xfa   : >> { %v471_v4 = vmul.f32 %v5834_v7, %v7209_v5  ;;  %v7212_v5 = vsub.f32 %v5332_v30, %v5296_v10  ;;  %v1001_v3 = vmul.f32 %v5409_v60, %v5834_v7  ;;  %v5900_v48 = vstv %s3619_s29  ;;  %s7049_s29 = sadd.s32 17, %s5186_s19 }
  0xfb   : >> { %v998_v51 = vmul.f32 %v7210_v53, %v5834_v7  ;;  %v472_v49 = vmul.f32 %v5834_v7, %v7211_v2 }
  0xfc   : >> { %v999_v17 = vmul.f32 %v7212_v5, %v5834_v7  ;;  %v475_v26 = vadd.f32 %v473_v8, %v471_v4  ;;  %v495_v62 = vmul.f32 %v471_v4, %v5350_v45  ;;  %s5892_s8 = ssub.f32 %s5832_s23, %s5548_s15  ;;  %s7046_s23 = sadd.s32 16, %s5186_s19 }
  0xfd   : >> { %v1002_v53 = vadd.f32 %v1000_v22, %v998_v51  ;;  %v1022_v13 = vmul.f32 %v998_v51, %v5362_v50  ;;  %v476_v2 = vadd.f32 %v474_v61, %v472_v49  ;;  %v5878_v16 = vmul.f32 %v472_v49, %v5354_v47  ;;  %s5904_s15 = sld [smem:[#allocation9 + %s7215_s0]]  ;;  %s7047_s0 = sadd.s32 18, %s5186_s19 }
  0xfe   : >> { %v1003_v23 = vadd.f32 %v1001_v3, %v999_v17  ;;  %v5881_v10 = vmul.f32 %v999_v17, %v5366_v52  ;;  %v479_v8 = vadd.f32 %v475_v26, %v471_v4  ;;  %v497_v36 = vmul.f32 %v475_v26, %v7214_v9  ;;  %s5923_s21 = sld [smem:[#allocation9 + %s7046_s23]]  ;;  %s1459_s10 = smul.f32 %s5892_s8, %s5892_s8 }
  0xff   : >> { %v1006_v30 = vadd.f32 %v1002_v53, %v998_v51  ;;  %v1024_v50 = vmul.f32 %v1002_v53, %v5430_v46  ;;  %v1016_v22 = vmul.f32 %v1002_v53, %v998_v51  ;;  %v480_v45 = vadd.f32 %v476_v2, %v472_v49  ;;  %s5950_s23 = sld [smem:[#allocation9 + %s7047_s0]] }
 0x100   : >> { %v1007_v5 = vadd.f32 %v1003_v23, %v999_v17  ;;  %v489_v61 = vmul.f32 %v475_v26, %v471_v4  ;;  %v734_v47 = vmul.f32 %v479_v8, %v5373_v55  ;;  %v493_v4 = vmul.f32 %v479_v8, %v5444_v63 }
 0x101   : >> { %v1261_v3 = vmul.f32 %v1006_v30, %v5386_v19  ;;  %v1020_v52 = vmul.f32 %v1006_v30, %v5460_v33  ;;  %v1026_v34 = vadd.f32 %v1024_v50, %v1022_v13  ;;  %v735_v46 = vmul.f32 %v480_v45, %v5375_v57 }
 0x102   : >> { %v1262_v51 = vmul.f32 %v1007_v5, %v5409_v60  ;;  %v1014_v53 = vmul.f32 %v1006_v30, %v1006_v30  ;;  %4385 = vmatprep.mubr.f32.mxu0 %v734_v47  ;;  %v499_v26 = vadd.f32 %v497_v36, %v495_v62  ;;  %v487_v32 = vmul.f32 %v479_v8, %v479_v8 }
 0x103   : >> { %4410 = vmatprep.mubr.f32.mxu1 %v1261_v3  ;;  %v1028_v9 = vadd.f32 %v1026_v34, %v1020_v52  ;;  %v5897_v33 = vstv %s3090_s27  ;;  %4386 = vmatmul.mubr.f32.vlgmr.msra.gmra.mrb[0].mxu0 %v735_v46  ;;  %v1015_v50 = vmul.f32 %v1007_v5, %v1007_v5  ;;  %v1017_v30 = vmul.f32 %v1003_v23, %v999_v17  ;;  %s5915_s27 = ssub.f32 %s5875_s2, %s5572_s26  ;;  %s7048_s26 = sadd.s32 19, %s5186_s19  ;;  %v7219_v46 = vld [vmem:[#allocation57_spill] sm:$0xff] }
 0x104   : >> { %4411 = vmatmul.mubr.f32.vlgmr.msra.gmra.mrb[2].mxu1 %v1262_v51  ;;  %v1018_v13 = vsub.f32 %v1014_v53, %v1016_v22  ;;  %4389 = vmatpush3.xpose.msra.mxu0 %v5618_v43  ;;  %v501_v34 = vadd.f32 %v499_v26, %v493_v4  ;;  %v491_v36 = vsub.f32 %v487_v32, %v489_v61  ;;  %v7217_v32 = vld [vmem:[#allocation53_spill] sm:$0xff]  ;;  %v7220_v53 = vld [vmem:[#allocation54_spill] sm:$0xff]  ;;  %s5936_s2 = sld [smem:[#allocation9 + %s7049_s29]]  ;;  %s6003_s29 = ssub.f32 %s5908_s24, %s5595_s9 }
 0x105   : >> { %v1340_v63 = vmul.f32 %v1028_v9, %v5386_v19  ;;  %4414 = vmatpush3.xpose.msra.mxu1 %v5648_v56  ;;  %v1019_v8 = vsub.f32 %v1015_v50, %v1017_v30  ;;  %4418 = vmatprep.subr.mxu0 %v7146_v20  ;;  %v488_v22 = vmul.f32 %v480_v45, %v480_v45  ;;  %s5965_s0 = sld [smem:[#allocation9 + %s7048_s26]]  ;;  %s5991_s26 = ssub.f32 %s5904_s15, %s5577_s3  ;;  %v7251_v26 = vld [vmem:[#allocation71_spill] sm:$0xff] }
 0x106   : >> { %v1419_v62 = vmul.f32 %v1018_v13, %v5386_v19  ;;  %v490_v47 = vmul.f32 %v476_v2, %v472_v49  ;;  %v813_v43 = vmul.f32 %v501_v34, %v5373_v55  ;;  %v892_v56 = vmul.f32 %v491_v36, %v5373_v55  ;;  %v7218_v19 = vld [vmem:[#allocation52_spill] sm:$0xff]  ;;  %4443 = vmatprep.subr.mxu1 %v7146_v20  ;;  %s6017_s3 = ssub.f32 %s5923_s21, %s5638_s28  ;;  %s7225_s24 = sadd.s32 16, %s5186_s19 }
 0x107   : >> { %4415 = vmatprep.mubr.f32.mxu1 %v1340_v63  ;;  %v494_v61 = vmul.f32 %v480_v45, %v7217_v32  ;;  %v498_v3 = vmul.f32 %v476_v2, %v7218_v19  ;;  %v1420_v52 = vmul.f32 %v1019_v8, %v5409_v60  ;;  %v1021_v51 = vmul.f32 %v1007_v5, %v7219_v46  ;;  %s6028_s9 = sld [smem:[#allocation9 + %s7225_s24]]  ;;  %s6053_s15 = ssub.f32 %s5950_s23, %s5716_s16 }
 0x108   : >> { %1421 = vadd.xlane.f32.xlu1 %v1419_v62  ;;  %v492_v49 = vsub.f32 %v488_v22, %v490_v47  ;;  %v1025_v4 = vmul.f32 %v1003_v23, %v7220_v53  ;;  %4390 = vmatprep.mubr.f32.mxu0 %v813_v43  ;;  %v7221_v2 = vsub.f32 %v5631_v28, %v5613_v42  ;;  %s7227_s16 = sadd.s32 17, %s5186_s19  ;;  %s7052_s21 = sadd.s32 21, %s5186_s19 }
 0x109   : >> { %894 = vadd.xlane.f32.xlu0 %v892_v56  ;;  %v500_v55 = vadd.f32 %v498_v3, %v5878_v16  ;;  %v1530_v9 = vmul.f32 %v5683_v38, %v5834_v7  ;;  %v7222_v16 = vsub.f32 %v5625_v18, %v5591_v15  ;;  %v1529_v28 = vmul.f32 %v5675_v40, %v5834_v7  ;;  %s6078_s23 = sld [smem:[#allocation9 + %s7227_s16]]  ;;  %s932_s24 = smul.f32 %s5499_s1, %s5499_s1 }
 0x10a   : >> { %v5943_v45 = vmul.f32 %v7221_v2, %v5834_v7  ;;  %v893_v23 = vmul.f32 %v492_v49, %v5375_v57  ;;  %v1027_v5 = vadd.f32 %v1025_v4, %v5881_v10  ;;  %v2067_v10 = vmul.f32 %v5841_v24, %v5841_v24  ;;  %s6042_s28 = ssub.f32 %s5936_s2, %s5694_s17  ;;  %s6124_s2 = sld [smem:[#allocation9 + %s7052_s21]]  ;;  %v7250_v4 = vld [vmem:[#allocation68_spill] sm:$0xff] }
 0x10b   : >> { %v5959_v42 = vmul.f32 %v7222_v16, %v5834_v7  ;;  %v502_v13 = vadd.f32 %v500_v55, %v494_v61  ;;  %v7223_v15 = vsub.f32 %v5712_v59, %v5588_v0  ;;  %v2059_v34 = vmul.f32 %v5773_v39, %v5834_v7  ;;  %s6065_s17 = ssub.f32 %s5965_s0, %s5720_s30  ;;  %s7050_s30 = sadd.s32 20, %s5186_s19 }
 0x10c   : >> { %v5968_v50 = vadd.f32 %v1530_v9, %v5943_v45  ;;  %1423 = vadd.xlane.f32.xlu1 %v1420_v52  ;;  %v1029_v30 = vadd.f32 %v1027_v5, %v1021_v51  ;;  %v7224_v36 = vsub.f32 %v5603_v29, %v5584_v44  ;;  %v2071_v22 = vsub.f32 %v2067_v10, %v5845_v41  ;;  %v7229_v10 = vld [vmem:[#allocation38_spill] sm:$0xff]  ;;  %s6115_s0 = sld [smem:[#allocation9 + %s7050_s30]]  ;;  %s7051_s16 = sadd.s32 22, %s5186_s19 }
 0x10d   : >> { %v5976_v18 = vmul.f32 %v7223_v15, %v5834_v7  ;;  %v5979_v63 = vadd.f32 %v1529_v28, %v5959_v42  ;;  %896 = vadd.xlane.f32.xlu0 %v893_v23  ;;  %v814_v0 = vmul.f32 %v502_v13, %v5375_v57  ;;  %v2058_v43 = vmul.f32 %v5655_v11, %v5834_v7  ;;  %v7230_v15 = vld [vmem:[#allocation63_spill] sm:$0xff]  ;;  %s944_s30 = smul.f32 %s5507_s12, %s5507_s12  ;;  %s6148_s1 = sld [smem:[#allocation9 + %s7051_s16]] }
 0x10e   : >> { %v5987_v62 = vmul.f32 %v7224_v36, %v5834_v7  ;;  %v5996_v59 = vadd.f32 %v5968_v50, %v5943_v45  ;;  %v1546_v8 = vmul.f32 %v5968_v50, %v5943_v45  ;;  %v1341_v44 = vmul.f32 %v1029_v30, %v5409_v60  ;;  %v7231_v36 = vld [vmem:[#allocation47_spill] sm:$0xff]  ;;  %s7240_s16 = sadd.s32 18, %s5186_s19  ;;  %s1484_s25 = smul.f32 %s5991_s26, %s5991_s26 }
 0x10f   : >> { %v6008_v29 = vadd.f32 %v5979_v63, %v5959_v42  ;;  %v1545_v57 = vmul.f32 %v5979_v63, %v5959_v42  ;;  %v6013_v47 = vadd.f32 %v2059_v34, %v5976_v18  ;;  %4391 = vmatmul.mubr.f32.vlgmr.msra.gmra.mrb[0].mxu0 %v814_v0  ;;  %v2089_v60 = vmul.f32 %v2071_v22, %v5773_v39  ;;  %v7233_v22 = vld [vmem:[#allocation65_spill] sm:$0xff]  ;;  %s6156_s12 = sadd.f32 %s944_s30, %s932_s24  ;;  %s6163_s21 = sld [smem:[#allocation9 + %s7240_s16]] }
 0x110   : >> { %v1544_v41 = vmul.f32 %v5996_v59, %v5996_v59  ;;  %v2005_v56 = vadd.f32 %v5820_v35, %v5816_v12  ;;  %4416 = vmatmul.mubr.f32.vlgmr.msra.gmra.mrb[2].mxu1 %v1341_v44  ;;  %4419 = vmatpush3.xpose.msra.mxu0 %v7146_v20  ;;  %v6047_v3 = vadd.f32 %v2058_v43, %v5987_v62  ;;  %s7056_s30 = sadd.s32 23, %s5186_s19  ;;  %s7245_s24 = sadd.s32 19, %s5186_s19 }
 0x111   : >> { %v1543_v32 = vmul.f32 %v6008_v29, %v6008_v29  ;;  %v6035_v61 = vadd.f32 %v6013_v47, %v5976_v18  ;;  %v2075_v19 = vmul.f32 %v6013_v47, %v5976_v18  ;;  %4444 = vmatpush3.xpose.msra.mxu1 %v7146_v20  ;;  %4445 = vmatprep.mubr.f32.mxu1 %v5779_v14  ;;  %v7226_v14 = vld [vmem:[#allocation46_spill] sm:$0xff]  ;;  %7239 = sst [smem:[#allocation80_spill]] %s6156_s12  ;;  %s1497_s11 = smul.f32 %s6003_s29, %s6003_s29 }
 0x112   : >> { %v1548_v35 = vsub.f32 %v1544_v41, %v1546_v8  ;;  %v2018_v52 = vadd.f32 %v5824_v1, %v2005_v56  ;;  %4420 = vmatprep.mubr.f32.mxu0 %v5795_v31  ;;  %4423 = vmatprep.subr.mxu0 %v5761_v27  ;;  %v6061_v53 = vmax.f32 %v5828_v25, %v7226_v14  ;;  %v7232_v8 = vld [vmem:[#allocation39_spill] sm:$0xff]  ;;  %s6185_s16 = sld [smem:[#allocation9 + %s7245_s24]]  ;;  %s7248_s24 = sadd.s32 20, %s5186_s19 }
 0x113   : >> { %v1547_v46 = vsub.f32 %v1543_v32, %v1545_v57  ;;  %v2073_v51 = vmul.f32 %v6035_v61, %v6035_v61  ;;  %4421 = vmatmul.mubr.f32.vlgmr.msra.gmra.mrb[2].mxu0 %v5837_v21  ;;  %v6072_v31 = vadd.f32 %v6047_v3, %v5987_v62  ;;  %v2074_v55 = vmul.f32 %v6047_v3, %v5987_v62  ;;  %v7228_v21 = vld [vmem:[#allocation49_spill] sm:$0xff]  ;;  %s6189_s6 = sld [smem:[#allocation9 + %s7056_s30]]  ;;  %s6207_s30 = ssub.f32 %s6115_s0, %s6028_s9 }
 0x114   : >> { %v1949_v1 = vmul.f32 %v1548_v35, %v5683_v38  ;;  %v2028_v2 = vmul.f32 3.0, %v2018_v52  ;;  %4424 = vmatpush3.xpose.msra.mxu0 %v5761_v27  ;;  %4446 = vmatmul.mubr.f32.vlgmr.msra.gmra.mrb[4].mxu1 %v2089_v60  ;;  %v2568_v5 = vadd.f32 %v5828_v25, %v7228_v21  ;;  %v2584_v13 = vsub.f32 %v6061_v53, %v5828_v25  ;;  %v7235_v32 = vld [vmem:[#allocation40_spill] sm:$0xff]  ;;  %v7237_v52 = vld [vmem:[#allocation50_spill] sm:$0xff]  ;;  %s6203_s7 = sld [smem:[#allocation9 + %s7248_s24]]  ;;  %s6216_s22 = ssub.f32 %s6124_s2, %s6078_s23 }
 0x115   : >> { %v1948_v9 = vmul.f32 %v1547_v46, %v5675_v40  ;;  %v2077_v23 = vsub.f32 %v2073_v51, %v2075_v19  ;;  %v2072_v28 = vmul.f32 %v6072_v31, %v6072_v31  ;;  %v1464_v27 = vmul.f32 %v7230_v15, %v7229_v10  ;;  %4450 = vmatprep.mubr.f32.mxu1 %v5655_v11  ;;  %v7236_v19 = vld [vmem:[#allocation66_spill] sm:$0xff]  ;;  %s1471_s24 = smul.f32 %s5915_s27, %s5915_s27  ;;  %s6239_s2 = ssub.f32 %s6148_s1, %s6163_s21 }
 0x116   : >> { %1952 = vadd.xlane.f32.xlu1 %v1949_v1  ;;  %4448 = vmatprep.subr.mxu1 %v2028_v2  ;;  %v2570_v0 = vmin.f32 %v2568_v5, %v7231_v36  ;;  %v1477_v44 = vmul.f32 %v7233_v22, %v7232_v8  ;;  %v6099_v25 = vmul.f32 %v2584_v13, %v5834_v7  ;;  %s7257_s1 = sadd.s32 24, %s5186_s19  ;;  %s2000_s5 = smul.f32 %s6042_s28, %s6042_s28 }
 0x117   : >> { %1950 = vadd.xlane.f32.xlu0 %v1948_v9  ;;  %v2478_v34 = vmul.f32 %v2077_v23, %v5773_v39  ;;  %4449 = vmatpush3.xpose.msra.mxu1 %v2028_v2  ;;  %v2076_v41 = vsub.f32 %v2072_v28, %v2074_v55  ;;  %v1465_v60 = vadd.f32 %v1464_v27, %v5814_v58  ;;  %v7238_v2 = vld [vmem:[#allocation74_spill] sm:$0xff]  ;;  %s1472_s0 = sadd.f32 %s1471_s24, %s1459_s10  ;;  %s6262_s18 = sld [smem:[#allocation9 + %s7257_s1]] }
 0x118   : >> { %7234 = vst [vmem:[#allocation51_spill] sm:$0xff] %v6099_v25  ;;  %4425 = vmatprep.mubr.f32.mxu0 %v5675_v40  ;;  %v2572_v56 = vsub.f32 %v2570_v0, %v6061_v53  ;;  %v1490_v35 = vmul.f32 %v7236_v19, %v7235_v32  ;;  %v2563_v46 = vadd.f32 %v5810_v37, %v7237_v52  ;;  %s1988_s10 = smul.f32 %s6017_s3, %s6017_s3 }
 0x119   : >> { %v3093_v51 = vadd.f32 %v5897_v33, %v5274_v54  ;;  %v2477_v58 = vmul.f32 %v2076_v41, %v5655_v11  ;;  %v1478_v1 = vadd.f32 %v1477_v44, %v1465_v60  ;;  %v3092_v55 = vadd.f32 %v5897_v33, %v7237_v52  ;;  %s1485_s24 = sadd.f32 %s1484_s25, %s1472_s0  ;;  %s2013_s12 = smul.f32 %s6053_s15, %s6053_s15 }
 0x11a   : >> { %2481 = vadd.xlane.f32.xlu1 %v2478_v34  ;;  %v1984_v37 = vmul.f32 %v7238_v2, %v5146_v6  ;;  %v6128_v9 = vmax.f32 %v2572_v56, 0.0  ;;  %v6131_v23 = vmax.f32 %v2563_v46, %v7226_v14  ;;  %v2567_v5 = vadd.f32 %v2563_v46, %v7228_v21  ;;  %s6287_s1 = ssub.f32 %s6189_s6, %s6185_s16  ;;  %s2517_s0 = smul.f32 %s6207_s30, %s6207_s30 }
 0x11b   : >> { %v6135_v28 = vmax.f32 %v3093_v51, %v7226_v14  ;;  %2479 = vadd.xlane.f32.xlu0 %v2477_v58  ;;  %v1491_v33 = vadd.f32 %v1490_v35, %v1478_v1  ;;  %4426 = vmatmul.mubr.f32.vlgmr.msra.gmra.mrb[2].mxu0 %v5683_v38  ;;  %v3097_v13 = vadd.f32 %v3093_v51, %v7228_v21  ;;  %s6298_s25 = sadd.f32 %s1497_s11, %s1485_s24  ;;  %s2529_s6 = smul.f32 %s6216_s22, %s6216_s22 }
 0x11c   : >> { %v6143_v27 = vmax.f32 %v3092_v55, %v7226_v14  ;;  %v2588_v0 = vmul.f32 %v6128_v9, %v5834_v7  ;;  %v2569_v44 = vmin.f32 %v2567_v5, %v7231_v36  ;;  %v2583_v41 = vsub.f32 %v6131_v23, %v2563_v46  ;;  %4451 = vmatmul.mubr.f32.vlgmr.msra.gmra.mrb[4].mxu1 %v5773_v39  ;;  %s2001_s11 = sadd.f32 %s2000_s5, %s1988_s10  ;;  %s2542_s10 = smul.f32 %s6239_s2, %s6239_s2 }
 0x11d   : >> { %v3113_v60 = vsub.f32 %v6135_v28, %v3093_v51  ;;  %v1500_v56 = vmul.f32 3.0, %v1491_v33  ;;  %v3099_v35 = vmin.f32 %v3097_v13, %v7231_v36  ;;  %v3096_v58 = vadd.f32 %v3092_v55, %v7228_v21  ;;  %7261 = sst [smem:[#allocation81_spill]] %s6298_s25  ;;  %s2555_s25 = smul.f32 %s6287_s1, %s6287_s1 }
 0x11e   : >> { %v3112_v1 = vsub.f32 %v6143_v27, %v3092_v55  ;;  %v6166_v46 = vadd.f32 %v2588_v0, %v6099_v25  ;;  %v2571_v5 = vsub.f32 %v2569_v44, %v6131_v23  ;;  %v6170_v51 = vmul.f32 %v2583_v41, %v5834_v7  ;;  %v7244_v44 = vld [vmem:[#allocation76_spill] sm:$0xff]  ;;  %s2014_s5 = sadd.f32 %s2013_s12, %s2001_s11  ;;  %s7267_s12 = sadd.s32 25, %s5186_s19 }
 0x11f   : >> { %v6173_v33 = vmul.f32 %v3113_v60, %v5834_v7  ;;  %4428 = vmatprep.subr.mxu0 %v1500_v56  ;;  %v3101_v55 = vsub.f32 %v3099_v35, %v6135_v28  ;;  %v3098_v13 = vmin.f32 %v3096_v58, %v7231_v36  ;;  %v1993_v41 = vmul.f32 %v7244_v44, %v7229_v10  ;;  %s2530_s24 = sadd.f32 %s2529_s6, %s2517_s0  ;;  %s6346_s11 = sld [smem:[#allocation9 + %s7267_s12]] }
 0x120   : >> { %7241 = vst [vmem:[#allocation53_spill] sm:$0xff] %v6166_v46  ;;  %7242 = vst [vmem:[#allocation52_spill] sm:$0xff] %v6170_v51  ;;  %v6179_v0 = vmul.f32 %v3112_v1, %v5834_v7  ;;  %v6193_v60 = vadd.f32 %v6166_v46, %v6099_v25  ;;  %v2604_v35 = vmul.f32 %v6166_v46, %v6099_v25  ;;  %v6197_v58 = vmax.f32 %v2571_v5, 0.0  ;;  %v7247_v1 = vld [vmem:[#allocation77_spill] sm:$0xff]  ;;  %v7249_v5 = vld [vmem:[#allocation78_spill] sm:$0xff]  ;;  %s7268_s20 = smul.f32 %s6065_s17, %s6065_s17  ;;  %s7079_s6 = sadd.s32 26, %s5186_s19 }
 0x121   : >> { %7243 = vst [vmem:[#allocation57_spill] sm:$0xff] %v6173_v33  ;;  %4429 = vmatpush3.xpose.msra.mxu0 %v1500_v56  ;;  %v2006_v34 = vmul.f32 %v7247_v1, %v7232_v8  ;;  %v6209_v43 = vmax.f32 %v3101_v55, 0.0  ;;  %v3100_v57 = vsub.f32 %v3098_v13, %v6143_v27  ;;  %v1994_v30 = vadd.f32 %v1993_v41, %v1984_v37  ;;  %s2543_s0 = sadd.f32 %s2542_s10, %s2530_s24  ;;  %s7080_s24 = sadd.s32 27, %s5186_s19 }
 0x122   : >> { %7246 = vst [vmem:[#allocation54_spill] sm:$0xff] %v6193_v60  ;;  %v2019_v16 = vmul.f32 %v7249_v5, %v7235_v32  ;;  %v2602_v56 = vmul.f32 %v6193_v60, %v6193_v60  ;;  %v2587_v55 = vmul.f32 %v6197_v58, %v5834_v7  ;;  %v2240_v49 = vmul.f32 %v7250_v4, %v5655_v11  ;;  %s6351_s4 = sadd.f32 %s7268_s20, %s2014_s5  ;;  %s7271_s20 = sadd.s32 21, %s5186_s19 }
 0x123   : >> { %v3622_v37 = vadd.f32 %v5900_v48, %v5274_v54  ;;  %v3117_v13 = vmul.f32 %v6209_v43, %v5834_v7  ;;  %v6233_v41 = vmax.f32 %v3100_v57, 0.0  ;;  %v2007_v12 = vadd.f32 %v2006_v34, %v1994_v30  ;;  %s6367_s5 = sld [smem:[#allocation9 + %s7271_s20]]  ;;  %s6378_s10 = sadd.f32 %s2555_s25, %s2543_s0 }
 0x124   : >> { %v1711_v17 = vmul.f32 %v7251_v26, %v5675_v40  ;;  %v2606_v54 = vsub.f32 %v2602_v56, %v2604_v35  ;;  %v6244_v46 = vadd.f32 %v2587_v55, %v6170_v51  ;;  %4455 = vmatprep.mubr.f32.mxu1 %v2240_v49  ;;  %v7255_v49 = vld [vmem:[#allocation62_spill] sm:$0xff]  ;;  %v7256_v56 = vstv %s5892_s8  ;;  %7269 = sst [smem:[#allocation82_spill]] %s6351_s4  ;;  %s7279_s25 = sadd.s32 22, %s5186_s19 }
 0x125   : >> { %v6247_v25 = vmax.f32 %v3622_v37, %v7226_v14  ;;  %v3626_v30 = vadd.f32 %v3622_v37, %v7228_v21  ;;  %v6253_v57 = vadd.f32 %v3117_v13, %v6173_v33  ;;  %v3116_v34 = vmul.f32 %v6233_v41, %v5834_v7  ;;  %7273 = sst [smem:[#allocation83_spill]] %s6378_s10  ;;  %s3556_s20 = sadd.s32 28, %s5186_s19 }
 0x126   : >> { %7252 = vst [vmem:[#allocation46_spill] sm:$0xff] %v6244_v46  ;;  %v2020_v35 = vadd.f32 %v2019_v16, %v2007_v12  ;;  %4430 = vmatprep.mubr.f32.mxu0 %v1711_v17  ;;  %v1457_v55 = vmul.f32 %v7256_v56, %v7255_v49  ;;  %v3007_v60 = vmul.f32 %v2606_v54, %v6128_v9  ;;  %s6392_s12 = sld [smem:[#allocation9 + %s7079_s6]]  ;;  %s3558_s10 = sadd.s32 29, %s5186_s19 }
 0x127   : >> { %7253 = vst [vmem:[#allocation49_spill] sm:$0xff] %v6247_v25  ;;  %7254 = vst [vmem:[#allocation63_spill] sm:$0xff] %v6253_v57  ;;  %v6269_v13 = vadd.f32 %v6244_v46, %v6170_v51  ;;  %v2603_v12 = vmul.f32 %v6244_v46, %v6170_v51  ;;  %v3628_v17 = vmin.f32 %v3626_v30, %v7231_v36  ;;  %s6405_s0 = sld [smem:[#allocation9 + %s7279_s25]]  ;;  %s3562_s4 = sadd.s32 31, %s5186_s19 }
 0x128   : >> { %v6278_v16 = vadd.f32 %v6253_v57, %v6173_v33  ;;  %v3133_v54 = vmul.f32 %v6253_v57, %v6173_v33  ;;  %v6283_v49 = vadd.f32 %v3116_v34, %v6179_v0  ;;  %v2029_v56 = vmul.f32 3.0, %v2020_v35  ;;  %3010 = vadd.xlane.f32.xlu1 %v3007_v60  ;;  %s6418_s6 = sld [smem:[#allocation9 + %s7080_s24]] }
 0x129   : >> { %v2601_v30 = vmul.f32 %v6269_v13, %v6269_v13  ;;  %v3630_v46 = vsub.f32 %v3628_v17, %v6247_v25  ;;  %v3642_v51 = vsub.f32 %v6247_v25, %v3622_v37  ;;  %v7260_v57 = vstv %s5915_s27 }
 0x12a   : >> { %7258 = vst [vmem:[#allocation47_spill] sm:$0xff] %v6278_v16  ;;  %7259 = vst [vmem:[#allocation65_spill] sm:$0xff] %v6283_v49  ;;  %v1467_v33 = vmul.f32 %v7260_v57, %v7230_v15  ;;  %v3131_v34 = vmul.f32 %v6278_v16, %v6278_v16  ;;  %v6306_v60 = vadd.f32 %v6283_v49, %v6179_v0  ;;  %4453 = vmatprep.subr.mxu1 %v2029_v56 }
 0x12b   : >> { %v3132_v37 = vmul.f32 %v6283_v49, %v6179_v0  ;;  %v7262_v35 = vstv %s5991_s26  ;;  %v2605_v57 = vsub.f32 %v2601_v30, %v2603_v12  ;;  %4454 = vmatpush3.xpose.msra.mxu1 %v2029_v56  ;;  %v6315_v17 = vmax.f32 %v3630_v46, 0.0 }
 0x12c   : >> { %v1480_v15 = vmul.f32 %v7262_v35, %v7233_v22  ;;  %v6318_v25 = vmul.f32 %v3642_v51, %v5834_v7  ;;  %v1468_v16 = vadd.f32 %v1467_v33, %v1457_v55  ;;  %v3135_v49 = vsub.f32 %v3131_v34, %v3133_v54  ;;  %v7266_v54 = vld [vmem:[#allocation75_spill] sm:$0xff] }
 0x12d   : >> { %7263 = vst [vmem:[#allocation66_spill] sm:$0xff] %v6315_v17  ;;  %v3130_v22 = vmul.f32 %v6306_v60, %v6306_v60  ;;  %v7265_v35 = vstv %s6003_s29  ;;  %v3621_v46 = vadd.f32 %v5900_v48, %v7237_v52  ;;  %v3006_v51 = vmul.f32 %v2605_v57, %v6197_v58  ;;  %s6490_s14 = ssub.f32 %s6392_s12, %s6405_s0 }
 0x12e   : >> { %7264 = vst [vmem:[#allocation50_spill] sm:$0xff] %v6318_v25  ;;  %v1493_v12 = vmul.f32 %v7265_v35, %v7236_v19  ;;  %v3646_v33 = vmul.f32 %v6315_v17, %v5834_v7  ;;  %v1481_v55 = vadd.f32 %v1480_v15, %v1468_v16  ;;  %v1712_v56 = vmul.f32 %v7266_v54, %v5683_v38 }
 0x12f   : >> { %v3536_v19 = vmul.f32 %v3135_v49, %v6209_v43  ;;  %v3134_v48 = vsub.f32 %v3130_v22, %v3132_v37  ;;  %v6341_v52 = vmax.f32 %v3621_v46, %v7226_v14  ;;  %v3625_v30 = vadd.f32 %v3621_v46, %v7228_v21  ;;  %3008 = vadd.xlane.f32.xlu0 %v3006_v51 }
 0x130   : >> { %v6354_v16 = vadd.f32 %v3646_v33, %v6318_v25  ;;  %v1494_v34 = vadd.f32 %v1493_v12, %v1481_v55  ;;  %4431 = vmatmul.mubr.f32.vlgmr.msra.gmra.mrb[2].mxu0 %v1712_v56  ;;  %v2241_v49 = vmul.f32 %v5841_v24, %v5773_v39  ;;  %v2531_v37 = vstv %s6163_s21 }
 0x131   : >> { %3539 = vadd.xlane.f32.xlu1 %v3536_v19  ;;  %v3535_v21 = vmul.f32 %v3134_v48, %v6233_v41  ;;  %v3627_v15 = vmin.f32 %v3625_v30, %v7231_v36  ;;  %v3641_v57 = vsub.f32 %v6341_v52, %v3621_v46  ;;  %v1790_v22 = vmul.f32 %v6008_v29, %v5675_v40 }
 0x132   : >> { %7270 = vst [vmem:[#allocation74_spill] sm:$0xff] %v6354_v16  ;;  %v6371_v35 = vadd.f32 %v6354_v16, %v6318_v25  ;;  %v3662_v12 = vmul.f32 %v6354_v16, %v6318_v25  ;;  %v1501_v51 = vmul.f32 -3.0, %v1494_v34  ;;  %4456 = vmatmul.mubr.f32.vlgmr.msra.gmra.mrb[4].mxu1 %v2241_v49  ;;  %v2319_v36 = vmul.f32 %v6072_v31, %v5655_v11 }
 0x133   : >> { %v3629_v46 = vsub.f32 %v3627_v15, %v6341_v52  ;;  %v6382_v33 = vmul.f32 %v3641_v57, %v5834_v7  ;;  %4435 = vmatprep.mubr.f32.mxu0 %v1790_v22  ;;  %v7275_v55 = vstv %s6017_s3  ;;  %v7276_v19 = vstv %s6042_s28  ;;  %3537 = vadd.xlane.f32.xlu0 %v3535_v21 }
 0x134   : >> { %7272 = vst [vmem:[#allocation76_spill] sm:$0xff] %v6371_v35  ;;  %v1986_v56 = vmul.f32 %v7275_v55, %v7238_v2  ;;  %v1996_v48 = vmul.f32 %v7276_v19, %v7244_v44  ;;  %v3660_v30 = vmul.f32 %v6371_v35, %v6371_v35  ;;  %4433 = vmatprep.subr.mxu0 %v1501_v51  ;;  %v7277_v34 = vstv %s6053_s15 }
 0x135   : >> { %7274 = vst [vmem:[#allocation77_spill] sm:$0xff] %v6382_v33  ;;  %v2009_v49 = vmul.f32 %v7277_v34, %v7247_v1  ;;  %v7278_v2 = vstv %s6065_s17  ;;  %v2544_v44 = vstv %s6185_s16  ;;  %v6408_v21 = vmax.f32 %v3629_v46, 0.0  ;;  %4434 = vmatpush3.xpose.msra.mxu0 %v1501_v51  ;;  %4460 = vmatprep.mubr.f32.mxu1 %v2319_v36 }
 0x136   : >> { %v2022_v15 = vmul.f32 %v7278_v2, %v7249_v5  ;;  %v1997_v57 = vadd.f32 %v1996_v48, %v1986_v56  ;;  %v7280_v22 = vstv %s5892_s8  ;;  %v7281_v55 = vstv %s5915_s27  ;;  %s7284_s8 = sadd.s32 23, %s5186_s19  ;;  %s6435_s27 = ssub.f32 %s6262_s18, %s6203_s7 }
 0x137   : >> { %v1458_v1 = vmul.f32 %v7280_v22, %v5146_v6  ;;  %v1469_v5 = vmul.f32 %v7281_v55, %v7229_v10  ;;  %v3664_v19 = vsub.f32 %v3660_v30, %v3662_v12  ;;  %v7282_v34 = vstv %s5991_s26  ;;  %s6431_s25 = sld [smem:[#allocation9 + %s7284_s8]]  ;;  %s3560_s26 = sadd.s32 30, %s5186_s19 }
 0x138   : >> { %v1482_v2 = vmul.f32 %v7282_v34, %v7232_v8  ;;  %v7283_v46 = vstv %s6003_s29  ;;  %v1791_v36 = vmul.f32 %v5996_v59, %v5683_v38  ;;  %v3645_v56 = vmul.f32 %v6408_v21, %v5834_v7  ;;  %s6443_s29 = sld [smem:[#allocation9 + %s3556_s20]]  ;;  %v7285_v34 = vld [vmem:[#allocation64_spill] sm:$0xff]  ;;  %s6455_s18 = ssub.f32 %s6346_s11, %s6367_s5 }
 0x139   : >> { %v1495_v51 = vmul.f32 %v7283_v46, %v7235_v32  ;;  %v2010_v12 = vadd.f32 %v2009_v49, %v1997_v57  ;;  %v1470_v48 = vadd.f32 %v1469_v5, %v1458_v1  ;;  %v6441_v30 = vmul.f32 %v6035_v61, %v5773_v39  ;;  %v7286_v49 = vld [vmem:[#allocation69_spill] sm:$0xff]  ;;  %s6457_s8 = sld [smem:[#allocation9 + %s3558_s10]]  ;;  %s7288_s20 = sadd.s32 24, %s5186_s19  ;;  %v7290_v46 = vld [vmem:[#allocation67_spill] sm:$0xff] }
 0x13a   : >> { %v4065_v22 = vmul.f32 %v3664_v19, %v6315_v17  ;;  %4436 = vmatmul.mubr.f32.vlgmr.msra.gmra.mrb[2].mxu0 %v1791_v36  ;;  %v1549_v55 = vmul.f32 %v6008_v29, %v7251_v26  ;;  %v1551_v7 = vmul.f32 %v5959_v42, %v7285_v34  ;;  %v1553_v57 = vmul.f32 %v5979_v63, %v7286_v49  ;;  %s6466_s24 = sld [smem:[#allocation9 + %s7288_s20]]  ;;  %v7289_v63 = vld [vmem:[#allocation61_spill] sm:$0xff]  ;;  %s7292_s11 = sadd.s32 25, %s5186_s19 }
 0x13b   : >> { %v6460_v1 = vadd.f32 %v3645_v56, %v6382_v33  ;;  %v2023_v5 = vadd.f32 %v2022_v15, %v2010_v12  ;;  %v1483_v19 = vadd.f32 %v1482_v2, %v1470_v48  ;;  %v2078_v26 = vmul.f32 %v6072_v31, %v7250_v4  ;;  %s6478_s10 = sld [smem:[#allocation9 + %s7292_s11]] }
 0x13c   : >> { %4068 = vadd.xlane.f32.xlu1 %v4065_v22  ;;  %v1555_v42 = vadd.f32 %v1553_v57, %v1551_v7  ;;  %v2080_v29 = vmul.f32 %v5987_v62, %v7289_v63  ;;  %v2082_v15 = vmul.f32 %v6047_v3, %v7290_v46  ;;  %v7291_v2 = vstv %s6017_s3  ;;  %s6480_s20 = sld [smem:[#allocation9 + %s3560_s26]]  ;;  %s7296_s3 = sadd.s32 26, %s5186_s19 }
 0x13d   : >> { %7287 = vst [vmem:[#allocation78_spill] sm:$0xff] %v6460_v1  ;;  %v1987_v36 = vmul.f32 %v7291_v2, %v5146_v6  ;;  %v6484_v4 = vadd.f32 %v6460_v1, %v6382_v33  ;;  %v3661_v62 = vmul.f32 %v6460_v1, %v6382_v33  ;;  %v2030_v31 = vmul.f32 -3.0, %v2023_v5  ;;  %s6500_s26 = sld [smem:[#allocation9 + %s7296_s3]] }
 0x13e   : >> { %v1496_v3 = vadd.f32 %v1495_v51, %v1483_v19  ;;  %v1557_v56 = vadd.f32 %v1555_v42, %v1549_v55  ;;  %v2084_v12 = vadd.f32 %v2082_v15, %v2080_v29  ;;  %v7294_v48 = vstv %s6042_s28  ;;  %s6502_s11 = sld [smem:[#allocation9 + %s3562_s4]]  ;;  %s6513_s28 = ssub.f32 %s6418_s6, %s6431_s25  ;;  %v7298_v29 = vld [vmem:[#allocation70_spill] sm:$0xff] }
 0x13f   : >> { %7293 = vst [vmem:[#allocation68_spill] sm:$0xff] %v6484_v4  ;;  %v1998_v22 = vmul.f32 %v7294_v48, %v7229_v10  ;;  %v7295_v34 = vstv %s6053_s15  ;;  %v3659_v51 = vmul.f32 %v6484_v4, %v6484_v4  ;;  %4458 = vmatprep.subr.mxu1 %v2030_v31  ;;  %v7297_v55 = vstv %s6065_s17  ;;  %s7299_s4 = sadd.s32 27, %s5186_s19  ;;  %s3046_s17 = smul.f32 %s6435_s27, %s6435_s27  ;;  %v7305_v48 = vld [vmem:[#allocation32_spill] sm:$0xff] }
 0x140   : >> { %v2011_v7 = vmul.f32 %v7295_v34, %v7232_v8  ;;  %v1502_v49 = vmul.f32 -1.0, %v1496_v3  ;;  %v2024_v57 = vmul.f32 %v7297_v55, %v7235_v32  ;;  %v1550_v5 = vmul.f32 %v5996_v59, %v7266_v54  ;;  %4459 = vmatpush3.xpose.msra.mxu1 %v2030_v31  ;;  %s6520_s15 = sld [smem:[#allocation9 + %s7299_s4]]  ;;  %v7300_v54 = vld [vmem:[#allocation72_spill] sm:$0xff]  ;;  %s6532_s19 = ssub.f32 %s6443_s29, %s6466_s24  ;;  %v7308_v55 = vld [vmem:[#allocation36_spill] sm:$0xff] }
 0x141   : >> { %v1869_v19 = vmul.f32 %v1557_v56, %v5675_v40  ;;  %v2086_v42 = vadd.f32 %v2084_v12, %v2078_v26  ;;  %v1999_v63 = vadd.f32 %v1998_v22, %v1987_v36  ;;  %v1552_v46 = vmul.f32 %v5943_v45, %v7298_v29  ;;  %v7301_v26 = vld [vmem:[#allocation73_spill] sm:$0xff]  ;;  %s3058_s6 = smul.f32 %s6455_s18, %s6455_s18  ;;  %s6542_s12 = ssub.f32 %s6457_s8, %s6478_s10 }
 0x142   : >> { %v3663_v59 = vsub.f32 %v3659_v51, %v3661_v62  ;;  %4438 = vmatprep.subr.mxu0 %v1502_v49  ;;  %v1554_v15 = vmul.f32 %v5968_v50, %v7300_v54  ;;  %v2079_v40 = vmul.f32 %v6035_v61, %v5841_v24  ;;  %v2081_v2 = vmul.f32 %v5976_v18, %v7301_v26  ;;  %v7302_v62 = vld [vmem:[#allocation79_spill] sm:$0xff]  ;;  %s3071_s29 = smul.f32 %s6490_s14, %s6490_s14  ;;  %v7303_v56 = vld [vmem:[#allocation48_spill] sm:$0xff] }
 0x143   : >> { %4439 = vmatpush3.xpose.msra.mxu0 %v1502_v49  ;;  %4440 = vmatprep.mubr.f32.mxu0 %v1869_v19  ;;  %v2398_v45 = vmul.f32 %v2086_v42, %v5655_v11  ;;  %v2012_v36 = vadd.f32 %v2011_v7, %v1999_v63  ;;  %v2083_v50 = vmul.f32 %v6013_v47, %v7302_v62  ;;  %v3039_v31 = vstv %s6203_s7  ;;  %s3059_s3 = sadd.f32 %s3058_s6, %s3046_s17  ;;  %s3084_s8 = smul.f32 %s6513_s28, %s6513_s28  ;;  %v7307_v51 = vld [vmem:[#allocation33_spill] sm:$0xff] }
 0x144   : >> { %v4064_v24 = vmul.f32 %v3663_v59, %v6408_v21  ;;  %4461 = vmatmul.mubr.f32.vlgmr.msra.gmra.mrb[4].mxu1 %v6441_v30  ;;  %4468 = vmatprep.subr.mxu0 %v7146_v20  ;;  %v1556_v11 = vadd.f32 %v1554_v15, %v1552_v46  ;;  %v2575_v18 = vsub.f32 %v6131_v23, %v7226_v14  ;;  %v3047_v47 = vstv %s6367_s5  ;;  %s6563_s4 = ssub.f32 %s6480_s20, %s6500_s26  ;;  %s3575_s5 = smul.f32 %s6532_s19, %s6532_s19 }
 0x145   : >> { %4465 = vmatprep.mubr.f32.mxu1 %v2398_v45  ;;  %v2025_v61 = vadd.f32 %v2024_v57, %v2012_v36  ;;  %v2085_v3 = vadd.f32 %v2083_v50, %v2081_v2  ;;  %v2579_v30 = vmul.f32 %v6197_v58, %v7303_v56  ;;  %v7304_v12 = vstv %s6028_s9  ;;  %s3072_s9 = sadd.f32 %s3071_s29, %s3059_s3  ;;  %s3587_s20 = smul.f32 %s6542_s12, %s6542_s12 }
 0x146   : >> { %v6559_v22 = vsub.f32 %v7305_v48, %v7304_v12  ;;  %4066 = vadd.xlane.f32.xlu0 %v4064_v24  ;;  %v1558_v23 = vadd.f32 %v1556_v11, %v1550_v5  ;;  %v6568_v34 = vmul.f32 %v2575_v18, %v7303_v56  ;;  %v7306_v7 = vstv %s6078_s23  ;;  %v7309_v5 = vld [vmem:[#allocation37_spill] sm:$0xff]  ;;  %s6591_s23 = ssub.f32 %s6502_s11, %s6520_s15  ;;  %s3600_s21 = smul.f32 %s6563_s4, %s6563_s4 }
 0x147   : >> { %v6573_v49 = vsub.f32 %v7307_v51, %v7306_v7  ;;  %v6578_v57 = vsub.f32 %v7308_v55, %v2531_v37  ;;  %v2031_v19 = vmul.f32 -1.0, %v2025_v61  ;;  %v2087_v42 = vadd.f32 %v2085_v3, %v2079_v40  ;;  %s6603_s16 = sadd.f32 %s3084_s8, %s3072_s9  ;;  %s7328_s7 = sld [smem:[#allocation59_spill]] }
 0x148   : >> { %v2512_v63 = vmul.f32 %v6559_v22, %v6559_v22  ;;  %v6587_v29 = vsub.f32 %v7309_v5, %v2544_v44  ;;  %v1870_v37 = vmul.f32 %v1558_v23, %v5683_v38  ;;  %v6597_v46 = vadd.f32 %v2579_v30, %v6568_v34  ;;  %s3588_s11 = sadd.f32 %s3587_s20, %s3575_s5  ;;  %s3613_s17 = smul.f32 %s6591_s23, %s6591_s23 }
 0x149   : >> { %v2520_v59 = vmul.f32 %v6573_v49, %v6573_v49  ;;  %v2533_v54 = vmul.f32 %v6578_v57, %v6578_v57  ;;  %4463 = vmatprep.subr.mxu1 %v2031_v19  ;;  %v2399_v44 = vmul.f32 %v2087_v42, %v5773_v39  ;;  %v3104_v38 = vsub.f32 %v6143_v27, %v7226_v14  ;;  %s7335_s3 = sld [smem:[#allocation82_spill]]  ;;  %s7336_s8 = sld [smem:[#allocation83_spill]] }
 0x14a   : >> { %v2546_v15 = vmul.f32 %v6587_v29, %v6587_v29  ;;  %v3108_v40 = vmul.f32 %v6233_v41, %v7303_v56  ;;  %4464 = vmatpush3.xpose.msra.mxu1 %v2031_v19  ;;  %4441 = vmatmul.mubr.f32.vlgmr.msra.gmra.mrb[2].mxu0 %v1870_v37  ;;  %v6616_v26 = vadd.f32 %v6597_v46, %v6568_v34  ;;  %v3060_v45 = vstv %s6405_s0  ;;  %s3601_s6 = sadd.f32 %s3600_s21, %s3588_s11 }
 0x14b   : >> { %v2597_v39 = vmul.f32 %v6597_v46, %v6568_v34  ;;  %v2521_v2 = vadd.f32 %v2520_v59, %v2512_v63  ;;  %4469 = vmatpush3.xpose.msra.mxu0 %v7146_v20  ;;  %4493 = vmatprep.subr.mxu1 %v7146_v20  ;;  %v6624_v27 = vmul.f32 %v3104_v38, %v7303_v56  ;;  %v3073_v50 = vstv %s6431_s25 }
 0x14c   : >> { %v2576_v36 = vsub.f32 %v6061_v53, %v7226_v14  ;;  %v2580_v62 = vmul.f32 %v6128_v9, %v7303_v56  ;;  %v2595_v24 = vmul.f32 %v6616_v26, %v6616_v26  ;;  %v3105_v18 = vsub.f32 %v6135_v28, %v7226_v14  ;;  %s6651_s0 = sadd.f32 %s3613_s17, %s3601_s6 }
 0x14d   : >> { %v2534_v11 = vadd.f32 %v2533_v54, %v2521_v2  ;;  %v3109_v61 = vmul.f32 %v6209_v43, %v7303_v56  ;;  %4466 = vmatmul.mubr.f32.vlgmr.msra.gmra.mrb[4].mxu1 %v2399_v44  ;;  %v6638_v3 = vadd.f32 %v3108_v40, %v6624_v27  ;;  %v6646_v30 = vsub.f32 %v7305_v48, %v3039_v31 }
 0x14e   : >> { %v6641_v53 = vmul.f32 %v2576_v36, %v7303_v56  ;;  %v6649_v12 = vsub.f32 %v7307_v51, %v3047_v47  ;;  %4494 = vmatpush3.xpose.msra.mxu1 %v7146_v20  ;;  %v2599_v28 = vsub.f32 %v2595_v24, %v2597_v39  ;;  %v6655_v7 = vmul.f32 %v3105_v18, %v7303_v56 }
 0x14f   : >> { %v2547_v23 = vadd.f32 %v2546_v15, %v2534_v11  ;;  %v6658_v19 = vsub.f32 %v7308_v55, %v3060_v45  ;;  %v6662_v42 = vadd.f32 %v6638_v3, %v6624_v27  ;;  %v3126_v31 = vmul.f32 %v6638_v3, %v6624_v27 }
 0x150   : >> { %v6667_v47 = vadd.f32 %v2580_v62, %v6641_v53  ;;  %v3041_v63 = vmul.f32 %v6646_v30, %v6646_v30  ;;  %v2617_v37 = vmul.f32 %v2599_v28, %v6197_v58  ;;  %v6673_v54 = vadd.f32 %v3109_v61, %v6655_v7 }
 0x151   : >> { %v2557_v59 = vmul.f32 3.0, %v2547_v23  ;;  %v3049_v44 = vmul.f32 %v6649_v12, %v6649_v12  ;;  %v3124_v15 = vmul.f32 %v6662_v42, %v6662_v42  ;;  %v3062_v39 = vmul.f32 %v6658_v19, %v6658_v19 }
 0x152   : >> { %v6681_v38 = vadd.f32 %v6667_v47, %v6641_v53  ;;  %v2598_v40 = vmul.f32 %v6667_v47, %v6641_v53  ;;  %4470 = vmatprep.mubr.f32.mxu0 %v2617_v37  ;;  %v6689_v2 = vadd.f32 %v6673_v54, %v6655_v7  ;;  %v3127_v45 = vmul.f32 %v6673_v54, %v6655_v7 }
 0x153   : >> { %4473 = vmatprep.subr.mxu0 %v2557_v59  ;;  %v3050_v36 = vadd.f32 %v3049_v44, %v3041_v63  ;;  %v2514_v62 = vstv %s6207_s30  ;;  %v3128_v24 = vsub.f32 %v3124_v15, %v3126_v31  ;;  %v3074_v18 = vsub.f32 %v7309_v5, %v3073_v50  ;;  %s7331_s30 = sld [smem:[#allocation80_spill]] }
 0x154   : >> { %v2596_v11 = vmul.f32 %v6681_v38, %v6681_v38  ;;  %v2513_v61 = vmul.f32 %v6559_v22, %v5146_v6  ;;  %v3125_v28 = vmul.f32 %v6689_v2, %v6689_v2  ;;  %v2522_v37 = vmul.f32 %v6573_v49, %v7229_v10 }
 0x155   : >> { %v3063_v23 = vadd.f32 %v3062_v39, %v3050_v36  ;;  %v2535_v63 = vmul.f32 %v6578_v57, %v7232_v8  ;;  %v3146_v31 = vmul.f32 %v3128_v24, %v6233_v41  ;;  %v3075_v15 = vmul.f32 %v3074_v18, %v3074_v18 }
 0x156   : >> { %v2600_v44 = vsub.f32 %v2596_v11, %v2598_v40  ;;  %v2548_v50 = vmul.f32 %v6587_v29, %v7235_v32  ;;  %v3129_v35 = vsub.f32 %v3125_v28, %v3127_v45  ;;  %v2523_v25 = vadd.f32 %v2522_v37, %v2513_v61 }
 0x157   : >> { %v3042_v39 = vmul.f32 %v6646_v30, %v5146_v6  ;;  %v3051_v36 = vmul.f32 %v6649_v12, %v7229_v10  ;;  %4495 = vmatprep.mubr.f32.mxu1 %v3146_v31  ;;  %v3076_v1 = vadd.f32 %v3075_v15, %v3063_v23  ;;  %v3064_v40 = vmul.f32 %v6658_v19, %v7232_v8 }
 0x158   : >> { %v2618_v16 = vmul.f32 %v2600_v44, %v6128_v9  ;;  %v3077_v24 = vmul.f32 %v3074_v18, %v7235_v32  ;;  %v3147_v45 = vmul.f32 %v3129_v35, %v6209_v43  ;;  %v2536_v11 = vadd.f32 %v2535_v63, %v2523_v25 }
 0x159   : >> { %v3052_v61 = vadd.f32 %v3051_v36, %v3042_v39  ;;  %v2769_v28 = vmul.f32 %v6616_v26, %v6197_v58  ;;  %v3086_v37 = vmul.f32 3.0, %v3076_v1  ;;  %v2515_v31 = vmul.f32 %v2514_v62, %v6559_v22 }
 0x15a   : >> { %4471 = vmatmul.mubr.f32.vlgmr.msra.gmra.mrb[4].mxu0 %v2618_v16  ;;  %v2524_v44 = vstv %s6216_s22  ;;  %v2537_v23 = vstv %s6239_s2  ;;  %4496 = vmatmul.mubr.f32.vlgmr.msra.gmra.mrb[6].mxu1 %v3147_v45  ;;  %v2549_v15 = vadd.f32 %v2548_v50, %v2536_v11  ;;  %v2550_v20 = vstv %s6287_s1  ;;  %s7326_s22 = sld [smem:[#allocation55_spill]]  ;;  %s7332_s2 = sld [smem:[#allocation60_spill]] }
 0x15b   : >> { %4474 = vmatpush3.xpose.msra.mxu0 %v2557_v59  ;;  %v3065_v33 = vadd.f32 %v3064_v40, %v3052_v61  ;;  %v2525_v4 = vmul.f32 %v2524_v44, %v6573_v49  ;;  %4498 = vmatprep.subr.mxu1 %v3086_v37  ;;  %v2538_v25 = vmul.f32 %v2537_v23, %v6578_v57  ;;  %v3043_v1 = vstv %s6435_s27  ;;  %s7333_s1 = sld [smem:[#allocation58_spill]]  ;;  %s957_s27 = smul.f32 %s7328_s7, %s7328_s7 }
 0x15c   : >> { %4475 = vmatprep.mubr.f32.mxu0 %v6197_v58  ;;  %v2551_v16 = vmul.f32 %v2550_v20, %v6587_v29  ;;  %v3298_v35 = vmul.f32 %v6662_v42, %v6233_v41  ;;  %4499 = vmatpush3.xpose.msra.mxu1 %v3086_v37  ;;  %v2558_v22 = vmul.f32 3.0, %v2549_v15  ;;  %v2770_v63 = vmul.f32 %v6681_v38, %v6128_v9 }
 0x15d   : >> { %4500 = vmatprep.mubr.f32.mxu1 %v6233_v41  ;;  %v3078_v49 = vadd.f32 %v3077_v24, %v3065_v33  ;;  %v2526_v59 = vadd.f32 %v2525_v4, %v2515_v31  ;;  %v3299_v57 = vmul.f32 %v6689_v2, %v6209_v43  ;;  %v6737_v29 = vmul.f32 %v6269_v13, %v6197_v58 }
 0x15e   : >> { %v6741_v50 = vmul.f32 %v6306_v60, %v6233_v41  ;;  %v3044_v39 = vmul.f32 %v3043_v1, %v6646_v30  ;;  %4478 = vmatprep.subr.mxu0 %v2558_v22  ;;  %v3053_v4 = vstv %s6455_s18  ;;  %v3066_v40 = vstv %s6490_s14  ;;  %s7330_s14 = sld [smem:[#allocation56_spill]] }
 0x15f   : >> { %v3087_v36 = vmul.f32 3.0, %v3078_v49  ;;  %v2539_v33 = vadd.f32 %v2538_v25, %v2526_v59  ;;  %v3054_v24 = vmul.f32 %v3053_v4, %v6649_v12  ;;  %v3067_v45 = vmul.f32 %v3066_v40, %v6658_v19  ;;  %v7310_v49 = vld [vmem:[#allocation54_spill] sm:$0xff]  ;;  %v7311_v19 = vld [vmem:[#allocation47_spill] sm:$0xff] }
 0x160   : >> { %v3079_v11 = vstv %s6513_s28  ;;  %v2516_v61 = vmul.f32 %v2514_v62, %v5146_v6  ;;  %v2527_v15 = vmul.f32 %v2524_v44, %v7229_v10  ;;  %v2540_v17 = vmul.f32 %v2537_v23, %v7232_v8  ;;  %v7312_v23 = vld [vmem:[#allocation52_spill] sm:$0xff]  ;;  %s393_s25 = smul.f32 %s7326_s22, %s7326_s22 }
 0x161   : >> { %4503 = vmatprep.subr.mxu1 %v3087_v36  ;;  %v2552_v37 = vadd.f32 %v2551_v16, %v2539_v33  ;;  %v3080_v31 = vmul.f32 %v3079_v11, %v3074_v18  ;;  %v3055_v30 = vadd.f32 %v3054_v24, %v3044_v39  ;;  %v2553_v25 = vmul.f32 %v2550_v20, %v7235_v32  ;;  %v7313_v39 = vld [vmem:[#allocation46_spill] sm:$0xff]  ;;  %s970_s28 = smul.f32 %s7332_s2, %s7332_s2 }
 0x162   : >> { %4476 = vmatmul.mubr.f32.vlgmr.msra.gmra.mrb[4].mxu0 %v6128_v9  ;;  %v6756_v12 = vmul.f32 %v7310_v49, %v6128_v9  ;;  %v6760_v59 = vmul.f32 %v7311_v19, %v6209_v43  ;;  %4501 = vmatmul.mubr.f32.vlgmr.msra.gmra.mrb[6].mxu1 %v6209_v43  ;;  %v2528_v18 = vadd.f32 %v2527_v15, %v2516_v61  ;;  %v7316_v15 = vld [vmem:[#allocation53_spill] sm:$0xff] }
 0x163   : >> { %4479 = vmatpush3.xpose.msra.mxu0 %v2558_v22  ;;  %v2559_v62 = vmul.f32 -3.0, %v2552_v37  ;;  %v2607_v44 = vmul.f32 %v6269_v13, %v6616_v26  ;;  %v2609_v16 = vmul.f32 %v7312_v23, %v6568_v34  ;;  %4504 = vmatpush3.xpose.msra.mxu1 %v3087_v36  ;;  %v3068_v20 = vadd.f32 %v3067_v45, %v3055_v30  ;;  %v7314_v13 = vld [vmem:[#allocation65_spill] sm:$0xff] }
 0x164   : >> { %4480 = vmatprep.mubr.f32.mxu0 %v2769_v28  ;;  %v2611_v33 = vmul.f32 %v7313_v39, %v6597_v46  ;;  %v3136_v24 = vmul.f32 %v6306_v60, %v6662_v42  ;;  %4505 = vmatprep.mubr.f32.mxu1 %v3298_v35  ;;  %v2541_v22 = vadd.f32 %v2540_v17, %v2528_v18  ;;  %v3576_v18 = vstv %s6478_s10  ;;  %s406_s10 = smul.f32 %s7330_s14, %s7330_s14 }
 0x165   : >> { %4483 = vmatprep.subr.mxu0 %v2559_v62  ;;  %v3138_v61 = vmul.f32 %v6179_v0, %v6624_v27  ;;  %v3140_v26 = vmul.f32 %v7314_v13, %v6638_v3  ;;  %v3081_v37 = vadd.f32 %v3080_v31, %v3068_v20  ;;  %v3045_v28 = vmul.f32 %v3043_v1, %v5146_v6  ;;  %v7315_v1 = vld [vmem:[#allocation51_spill] sm:$0xff] }
 0x166   : >> { %v2613_v34 = vadd.f32 %v2611_v33, %v2609_v16  ;;  %v3056_v36 = vmul.f32 %v3053_v4, %v7229_v10  ;;  %v2554_v45 = vadd.f32 %v2553_v25, %v2541_v22  ;;  %v3069_v60 = vmul.f32 %v3066_v40, %v7232_v8 }
 0x167   : >> { %v3142_v46 = vadd.f32 %v3140_v26, %v3138_v61  ;;  %v3082_v17 = vmul.f32 %v3079_v11, %v7235_v32  ;;  %v3088_v42 = vmul.f32 -3.0, %v3081_v37  ;;  %v2608_v27 = vmul.f32 %v7310_v49, %v6681_v38  ;;  %v7319_v61 = vld [vmem:[#allocation49_spill] sm:$0xff] }
 0x168   : >> { %v2615_v35 = vadd.f32 %v2613_v34, %v2607_v44  ;;  %v3057_v0 = vadd.f32 %v3056_v36, %v3045_v28  ;;  %v2560_v3 = vmul.f32 -1.0, %v2554_v45  ;;  %v2610_v4 = vmul.f32 %v7315_v1, %v6641_v53  ;;  %v7317_v44 = vld [vmem:[#allocation57_spill] sm:$0xff]  ;;  %v7320_v37 = vld [vmem:[#allocation66_spill] sm:$0xff] }
 0x169   : >> { %v3144_v31 = vadd.f32 %v3142_v46, %v3136_v24  ;;  %v2612_v30 = vmul.f32 %v7316_v15, %v6667_v47  ;;  %4508 = vmatprep.subr.mxu1 %v3088_v42  ;;  %v3137_v11 = vmul.f32 %v7311_v19, %v6689_v2  ;;  %v3568_v25 = vstv %s6466_s24  ;;  %s381_s24 = smul.f32 %s5456_s13, %s5456_s13  ;;  %s7334_s13 = sld [smem:[#allocation81_spill]] }
 0x16a   : >> { %4481 = vmatmul.mubr.f32.vlgmr.msra.gmra.mrb[4].mxu0 %v2770_v63  ;;  %v3070_v40 = vadd.f32 %v3069_v60, %v3057_v0  ;;  %4506 = vmatmul.mubr.f32.vlgmr.msra.gmra.mrb[6].mxu1 %v3299_v57  ;;  %v3139_v53 = vmul.f32 %v7317_v44, %v6655_v7  ;;  %v3589_v23 = vstv %s6500_s26  ;;  %v7318_v63 = vld [vmem:[#allocation63_spill] sm:$0xff]  ;;  %v3633_v2 = vsub.f32 %v6341_v52, %v7226_v14  ;;  %v7321_v0 = vld [vmem:[#allocation43_spill] sm:$0xff]  ;;  %s958_s26 = sadd.f32 %s957_s27, %s7331_s30 }
 0x16b   : >> { %4484 = vmatpush3.xpose.msra.mxu0 %v2559_v62  ;;  %v3456_v38 = vmul.f32 %v3144_v31, %v6233_v41  ;;  %v2614_v49 = vadd.f32 %v2612_v30, %v2610_v4  ;;  %4485 = vmatprep.mubr.f32.mxu0 %v6737_v29  ;;  %v3141_v16 = vmul.f32 %v7318_v63, %v6673_v54  ;;  %v3602_v19 = vstv %s6520_s15  ;;  %s394_s18 = sadd.f32 %s393_s25, %s381_s24 }
 0x16c   : >> { %4510 = vmatprep.mubr.f32.mxu1 %v6741_v50  ;;  %v3083_v47 = vadd.f32 %v3082_v17, %v3070_v40  ;;  %4509 = vmatpush3.xpose.msra.mxu1 %v3088_v42  ;;  %v3637_v57 = vmul.f32 %v6408_v21, %v7303_v56  ;;  %v3569_v7 = vsub.f32 %v7305_v48, %v3568_v25  ;;  %v3572_v34 = vstv %s6532_s19  ;;  %s419_s19 = smul.f32 %s7333_s1, %s7333_s1 }
 0x16d   : >> { %4488 = vmatprep.subr.mxu0 %v2560_v3  ;;  %v2616_v41 = vadd.f32 %v2614_v49, %v2608_v27  ;;  %v3143_v29 = vadd.f32 %v3141_v16, %v3139_v53  ;;  %v6804_v50 = vmul.f32 %v3633_v2, %v7303_v56  ;;  %v3577_v54 = vsub.f32 %v7307_v51, %v3576_v18  ;;  %s407_s15 = sadd.f32 %s406_s10, %s394_s18 }
 0x16e   : >> { %v3089_v62 = vmul.f32 -1.0, %v3083_v47  ;;  %v2927_v20 = vmul.f32 %v2615_v35, %v6197_v58  ;;  %v3570_v52 = vmul.f32 %v3569_v7, %v3569_v7  ;;  %v3590_v39 = vsub.f32 %v7308_v55, %v3589_v23 }
 0x16f   : >> { %v3603_v33 = vsub.f32 %v7309_v5, %v3602_v19  ;;  %v3145_v24 = vadd.f32 %v3143_v29, %v3137_v11  ;;  %v3639_v22 = vadd.f32 %v3637_v57, %v6804_v50  ;;  %v3578_v48 = vmul.f32 %v3577_v54, %v3577_v54  ;;  %v7322_v19 = vld [vmem:[#allocation68_spill] sm:$0xff]  ;;  %v7324_v29 = vld [vmem:[#allocation78_spill] sm:$0xff]  ;;  %s420_s29 = sadd.f32 %s419_s19, %s407_s15 }
 0x170   : >> { %4513 = vmatprep.subr.mxu1 %v3089_v62  ;;  %v3634_v13 = vsub.f32 %v7319_v61, %v7226_v14  ;;  %v3591_v26 = vmul.f32 %v3590_v39, %v3590_v39  ;;  %v3638_v51 = vmul.f32 %v7320_v37, %v7303_v56  ;;  %v3571_v58 = vmul.f32 %v3569_v7, %v5146_v6 }
 0x171   : >> { %v6819_v55 = vadd.f32 %v3639_v22, %v6804_v50  ;;  %v3655_v5 = vmul.f32 %v3639_v22, %v6804_v50  ;;  %v3579_v28 = vadd.f32 %v3578_v48, %v3570_v52  ;;  %v3604_v36 = vmul.f32 %v3603_v33, %v3603_v33 }
 0x172   : >> { %4486 = vmatmul.mubr.f32.vlgmr.msra.gmra.mrb[4].mxu0 %v6756_v12  ;;  %4511 = vmatmul.mubr.f32.vlgmr.msra.gmra.mrb[6].mxu1 %v6760_v59  ;;  %v6824_v14 = vmul.f32 %v3634_v13, %v7303_v56  ;;  %v3580_v45 = vmul.f32 %v3577_v54, %v7229_v10  ;;  %v3593_v46 = vmul.f32 %v3590_v39, %v7232_v8  ;;  %v3582_v60 = vstv %s6542_s12  ;;  %s971_s12 = sadd.f32 %s970_s28, %s958_s26 }
 0x173   : >> { %4489 = vmatpush3.xpose.msra.mxu0 %v2560_v3  ;;  %4490 = vmatprep.mubr.f32.mxu0 %v2927_v20  ;;  %v2928_v12 = vmul.f32 %v2616_v41, %v6128_v9  ;;  %v3653_v17 = vmul.f32 %v6819_v55, %v6819_v55  ;;  %v3592_v42 = vadd.f32 %v3591_v26, %v3579_v28  ;;  %v3595_v35 = vstv %s6563_s4  ;;  %s7337_s4 = sld [smem:[#allocation45_spill]] }
 0x174   : >> { %4515 = vmatprep.mubr.f32.mxu1 %v3456_v38  ;;  %4514 = vmatpush3.xpose.msra.mxu1 %v3089_v62  ;;  %v3640_v56 = vadd.f32 %v3638_v51, %v6824_v14  ;;  %v3581_v59 = vadd.f32 %v3580_v45, %v3571_v58  ;;  %v3606_v27 = vmul.f32 %v3603_v33, %v7235_v32  ;;  %v3608_v38 = vstv %s6591_s23  ;;  %v7325_v58 = vld [vmem:[#allocation74_spill] sm:$0xff] }
 0x175   : >> { %4518 = vmatprep.subr.mxu0 %v7321_v0  ;;  %v3657_v3 = vsub.f32 %v3653_v17, %v3655_v5  ;;  %v3605_v31 = vadd.f32 %v3604_v36, %v3592_v42  ;;  %v3573_v1 = vmul.f32 %v3572_v34, %v3569_v7  ;;  %v3583_v4 = vmul.f32 %v3582_v60, %v3577_v54  ;;  %v7323_v7 = vld [vmem:[#allocation77_spill] sm:$0xff]  ;;  %v7329_v5 = vld [vmem:[#allocation76_spill] sm:$0xff] }
 0x176   : >> { %v3650_v9 = vadd.f32 %v3640_v56, %v6824_v14  ;;  %v3656_v15 = vmul.f32 %v3640_v56, %v6824_v14  ;;  %v3594_v30 = vadd.f32 %v3593_v46, %v3581_v59  ;;  %v3596_v40 = vmul.f32 %v3595_v35, %v3590_v39 }
 0x177   : >> { %v3675_v11 = vmul.f32 %v3657_v3, %v6408_v21  ;;  %v3615_v25 = vmul.f32 3.0, %v3605_v31  ;;  %v3584_v18 = vadd.f32 %v3583_v4, %v3573_v1  ;;  %v3457_v49 = vmul.f32 %v3145_v24, %v6209_v43 }
 0x178   : >> { %v3654_v44 = vmul.f32 %v3650_v9, %v3650_v9  ;;  %v3607_v53 = vadd.f32 %v3606_v27, %v3594_v30  ;;  %v3609_v63 = vmul.f32 %v3608_v38, %v3603_v33  ;;  %v3574_v16 = vmul.f32 %v3572_v34, %v5146_v6  ;;  %v7327_v34 = vld [vmem:[#allocation50_spill] sm:$0xff] }
 0x179   : >> { %v3597_v47 = vadd.f32 %v3596_v40, %v3584_v18  ;;  %v3585_v2 = vmul.f32 %v3582_v60, %v7229_v10  ;;  %v3665_v41 = vmul.f32 %v7322_v19, %v6819_v55  ;;  %v3667_v62 = vmul.f32 %v7323_v7, %v6804_v50  ;;  %s332_s11 = sadd.s32 1, %s7337_s4  }
 0x17a   : >> { %4491 = vmatmul.mubr.f32.vlgmr.msra.gmra.mrb[4].mxu0 %v2928_v12  ;;  %4516 = vmatmul.mubr.f32.vlgmr.msra.gmra.mrb[6].mxu1 %v3457_v49  ;;  %v3658_v23 = vsub.f32 %v3654_v44, %v3656_v15  ;;  %v3616_v57 = vmul.f32 3.0, %v3607_v53  ;;  %v3669_v54 = vmul.f32 %v7324_v29, %v3639_v22  ;;  %v3598_v39 = vmul.f32 %v3595_v35, %v7232_v8  ;;  %p329_p8 = scmp.ge.s32.totalorder %s332_s11, 4  }
 0x17b   : >> { %4519 = vmatpush3.xpose.msra.mxu0 %v7321_v0  ;;  %4520 = vmatprep.mubr.f32.mxu0 %v3675_v11  ;;  %v3610_v52 = vadd.f32 %v3609_v63, %v3597_v47  ;;  %v3586_v10 = vadd.f32 %v3585_v2, %v3574_v16  ;;  %v4922_v24 = vmov 0.0   ;;  %v3827_v50 = vmul.f32 %v6819_v55, %v6408_v21  ;;  %s7341_s5 = sld [smem:[#allocation25_spill]] (%p329_p8)  ;;  %s7342_s9 = sld [smem:[#allocation34_spill]] (%p329_p8) }
 0x17c   : >> { %4523 = vmatprep.subr.mxu0 %v3615_v25  ;;  %v3676_v43 = vmul.f32 %v3658_v23, %v7320_v37  ;;  %v3671_v20 = vadd.f32 %v3669_v54, %v3667_v62  ;;  %354 = vst.msk [vmem:[#allocation2 + $0x8] sm:$0xff] %vm352_vm0, %v4922_v24  ;;  %353 = vst.msk [vmem:[#allocation2] sm:$0xff] %vm352_vm0, %v4922_v24  ;;  %v3611_v61 = vmul.f32 %v3608_v38, %v7235_v32  ;;  %vm4115_vm4 = vcmask (%p329_p8), 60416   ;;  %s7343_s20 = sld [smem:[#allocation22_spill]] (%p329_p8)  ;;  %s7344_s23 = sld [smem:[#allocation28_spill]] (%p329_p8) }
 0x17d   : >> { %v3617_v22 = vmul.f32 -3.0, %v3610_v52  ;;  %v3599_v48 = vadd.f32 %v3598_v39, %v3586_v10  ;;  %v3828_v13 = vmul.f32 %v3650_v9, %v7320_v37  ;;  %v3906_v51 = vmul.f32 %v7322_v19, %v6408_v21  ;;  %s4923_s1 = smov (%p329_p8), [#allocation14]  }
 0x17e   : >> { %4521 = vmatmul.mubr.f32.vlgmr.msra.gmra.mrb[6].mxu0 %v3676_v43  ;;  %v3673_v33 = vadd.f32 %v3671_v20, %v3665_v41  ;;  %v3670_v32 = vmul.f32 %v7325_v58, %v3640_v56  ;;  %v3668_v55 = vmul.f32 %v7327_v34, %v6824_v14  ;;  %v3907_v28 = vmul.f32 %v7329_v5, %v7320_v37  ;;  %s4818_s24 = sshll.u32 (%p329_p8), %s4923_s1, 4  ;;  %s4819_s24 = int_to_ptr.vmem [resolvable:$false] %s4818_s24 }
 0x17f   : >> { %4524 = vmatpush3.xpose.msra.mxu0 %v3615_v25  ;;  %4525 = vmatprep.mubr.f32.mxu0 %v6408_v21  ;;  %v3612_v8 = vadd.f32 %v3611_v61, %v3599_v48  ;;  %v3666_v36 = vmul.f32 %v7329_v5, %v3650_v9  ;;  %v1425_v35 = vstv %s971_s12  ;;  %v898_v56 = vstv %s420_s29  ;;  %s4820_s25 = scalar_lea.vmem (%p329_p8), %s4819_s24, 128 }
 0x180   : >> { %4528 = vmatprep.subr.mxu0 %v3616_v57  ;;  %v3672_v45 = vadd.f32 %v3670_v32, %v3668_v55  ;;  %v3985_v46 = vmul.f32 %v3673_v33, %v6408_v21  ;;  %v1954_v43 = vstv %s7334_s13  ;;  %v2483_v7 = vstv %s7335_s3 }
 0x181   : >> { %v3618_v26 = vmul.f32 -1.0, %v3612_v8  ;;  %s4260_s21 = sshll.u32 (%p329_p8), %s7341_s5, 6 }
 0x182   : >> { %v3674_v60 = vadd.f32 %v3672_v45, %v3666_v36  ;;  %v3012_v36 = vstv %s7336_s8  ;;  %v3541_v45 = vstv %s6603_s16  ;;  %s7345_s16 = scalar_lea.vmem (%p329_p8), [#allocation14], %s7342_s9  ;;  %s7348_s30 = sand.u32 (%p329_p8), 1, %s7343_s20  }
 0x183   : >> { %v904_v30 = vld [vmem:[#allocation2 + $0x8] sm:$0xff]  ;;  %v903_v38 = vld [vmem:[#allocation2] sm:$0xff]  ;;  %s7347_s7 = smov (%p329_p8), %s7345_s16  ;;  %s4118_s11 = scalar_lea.sflag (%p329_p8), [#allocation5], %s7348_s30 }
 0x184   : >> { %v3986_v12 = vmul.f32 %v3674_v60, %v7320_v37  ;;  %s4131_s14 = sshll.u32 (%p329_p8), %s7347_s7, 4  ;;  %p7349_p10 = scmp.ne.s32.totalorder (%p329_p8), %s7344_s23, 0  ;;  %s4132_s14 = int_to_ptr.vmem [resolvable:$true] %s4131_s14 }
 0x185   : > { %s4814_s2 = scalar_lea.vmem (%p329_p8), %s4132_s14, 64  ;;  %p4821_p9 = scmp.lt.s32.totalorder (%p329_p8), %s4132_s14, %s4819_s24 }
 0x186   : >> { %4526 = vmatmul.mubr.f32.vlgmr.msra.gmra.mrb[6].mxu0 %v7320_v37  ;;  %p4815_p13 = scmp.ne.s32.totalorder (%p329_p8), %s4132_s14, %s4814_s2  ;;  %p4822_p5 = scmp.lt.s32.totalorder (%p329_p8), %s4820_s25, %s4814_s2 }
 0x187   : >> { %4529 = vmatpush3.xpose.msra.mxu0 %v3616_v57  ;;  %4530 = vmatprep.mubr.f32.mxu0 %v3827_v50 }
 0x188   : >> { %4533 = vmatprep.subr.mxu0 %v3617_v22  ;;  %p4816_p6 = pnand (%p329_p8), %p4815_p13, %p7349_p10  ;;  %p4823_p11 = por (%p329_p8), %p4822_p5, %p4821_p9 }
 0x18a   : > { %p4817_p0 = pneg (%p329_p8), %p4816_p6 }
 0x18c   : > { %p4824_p12 = pnand (%p329_p8), %p4823_p11, %p4817_p0 }
 0x18e   : >> { %4531 = vmatmul.mubr.f32.vlgmr.msra.gmra.mrb[6].mxu0 %v3828_v13 }
 0x18f   : >> { %4534 = vmatpush3.xpose.msra.mxu0 %v3617_v22  ;;  %4535 = vmatprep.mubr.f32.mxu0 %v3906_v51 }
 0x190   : >> { %4538 = vmatprep.subr.mxu0 %v3618_v26 }
 0x195   : >> { %v1422_v21 = vpop.xlane.xlu1 %1421 }
 0x196   : >> { %4536 = vmatmul.mubr.f32.vlgmr.msra.gmra.mrb[6].mxu0 %v3907_v28  ;;  %v895_v37 = vpop.xlane.xlu0 %894  ;;  %v1426_v3 = vmul.f32 %v1425_v35, %v1422_v21 }
 0x197   : >> { %4539 = vmatpush3.xpose.msra.mxu0 %v3618_v26  ;;  %4540 = vmatprep.mubr.f32.mxu0 %v3985_v46  ;;  %v899_v15 = vmul.f32 %v898_v56, %v895_v37 }
 0x199   : >> { %v1424_v42 = vpop.xlane.xlu1 %1423 }
 0x19a   : >> { %v897_v0 = vpop.xlane.xlu0 %896  ;;  %v1427_v59 = vmul.f32 %v1425_v35, %v1424_v42 }
 0x19b   : >> { %v900_v31 = vmul.f32 %v898_v56, %v897_v0 }
 0x19e   : >> { %4541 = vmatmul.mubr.f32.vlgmr.msra.gmra.mrb[6].mxu0 %v3986_v12 }
 0x1a3   : >> { %v1953_v19 = vpop.xlane.xlu1 %1952 }
 0x1a4   : >> { %v1951_v41 = vpop.xlane.xlu0 %1950  ;;  %v1956_v57 = vmul.f32 %v1954_v43, %v1953_v19 }
 0x1a5   : >> { %v1955_v29 = vmul.f32 %v1954_v43, %v1951_v41 }
 0x1a7   : >> { %v2482_v62 = vpop.xlane.xlu1 %2481 }
 0x1a8   : >> { %v2480_v54 = vpop.xlane.xlu0 %2479  ;;  %v2485_v10 = vmul.f32 %v2483_v7, %v2482_v62 }
 0x1a9   : >> { %v2484_v50 = vmul.f32 %v2483_v7, %v2480_v54 }
 0x1b2   : >> { %v4377_v14 = vpop.f32.mrb[0].mxu1 }
 0x1b3   : >> { %v646_v17 = vpop.f32.mrb[1].mxu1 }
 0x1b5   : >> { %v3011_v5 = vpop.xlane.xlu1 %3010 }
 0x1b6   : >> { %v3014_v12 = vmul.f32 %v3012_v36, %v3011_v5 }
 0x1bc   : >> { %v3009_v28 = vpop.xlane.xlu0 %3008 }
 0x1be   : >> { %v3540_v46 = vpop.xlane.xlu1 %3539 }
 0x1c0   : >> { %v3538_v60 = vpop.xlane.xlu0 %3537 }
 0x1c1   : >> { %v3542_v37 = vmul.f32 %v3541_v45, %v3538_v60 }
 0x1e2   : >> { %v4392_v27 = vpop.f32.mrb[0].mxu0 }
 0x1e3   : >> { %v4543_v1 = vadd.f32 %v4392_v27, %v4377_v14  ;;  %v4417_v4 = vpop.f32.mrb[2].mxu1  ;;  %v881_v9 = vpop.f32.mrb[1].mxu0  ;;  %v3013_v14 = vmul.f32 %v3012_v36, %v3009_v28 }
 0x1e4   : >> { %v1429_v40 = vadd.f32 %v4417_v4, %v1427_v59  ;;  %v4544_v11 = vadd.f32 %v881_v9, %v646_v17  ;;  %v1408_v25 = vpop.f32.mrb[3].mxu1  ;;  %v3543_v17 = vmul.f32 %v3541_v45, %v3540_v46 }
 0x1e5   : >> { %v902_v18 = vadd.f32 %v4543_v1, %v900_v31  ;;  %v1428_v49 = vadd.f32 %v1426_v3, %v1408_v25  ;;  %v4070_v25 = vstv %s6651_s0  ;;  %s7346_s0 = sld [smem:[#allocation90_spill]] (%p329_p8) }
 0x1e6   : >> { %v901_v44 = vadd.f32 %v4544_v11, %v899_v15 }
 0x1e7   : >> { %v906_v53 = vadd.f32 %v904_v30, %v902_v18  ;;  %v4069_v18 = vpop.xlane.xlu1 %4068 }
 0x1e8   : >> { %v905_v23 = vadd.f32 %v903_v38, %v901_v44  ;;  %v4067_v38 = vpop.xlane.xlu0 %4066 }
 0x1e9   : >> { %908 = vst.msk [vmem:[#allocation2 + $0x8] sm:$0xff] %vm352_vm0, %v906_v53  ;;  %v4071_v44 = vmul.f32 %v4070_v25, %v4067_v38 }
 0x1ea   : >> { %907 = vst.msk [vmem:[#allocation2] sm:$0xff] %vm352_vm0, %v905_v23 }
 0x1eb   : > { %s6917_s22 = scalar_lea.hbm (%p329_p8), %s7346_s0, %s4260_s21 }
 0x1f0   : >> { %v1431_v47 = vld [vmem:[#allocation2 + $0x8] sm:$0xff] }
 0x1f1   : >> { %v1433_v63 = vadd.f32 %v1431_v47, %v1429_v40  ;;  %v1430_v16 = vld [vmem:[#allocation2] sm:$0xff] }
 0x1f2   : >> { %v1432_v2 = vadd.f32 %v1430_v16, %v1428_v49  ;;  %v4072_v49 = vmul.f32 %v4070_v25, %v4069_v18 }
 0x1f3   : >> { %1435 = vst.msk [vmem:[#allocation2 + $0x8] sm:$0xff] %vm352_vm0, %v1433_v63 }
 0x1f4   : >> { %1434 = vst.msk [vmem:[#allocation2] sm:$0xff] %vm352_vm0, %v1432_v2 }
 0x1fa   : >> { %v1960_v33 = vld [vmem:[#allocation2 + $0x8] sm:$0xff] }
 0x1fb   : >> { %v1959_v61 = vld [vmem:[#allocation2] sm:$0xff] }
 0x21d   : >> { %v4442_v20 = vpop.f32.mrb[2].mxu0 }
 0x21e   : >> { %v1958_v52 = vadd.f32 %v4442_v20, %v1956_v57  ;;  %v1937_v39 = vpop.f32.mrb[3].mxu0 }
 0x21f   : >> { %v1957_v24 = vadd.f32 %v1955_v29, %v1937_v39 }
 0x220   : >> { %v1962_v22 = vadd.f32 %v1960_v33, %v1958_v52  ;;  %v4467_v48 = vpop.f32.mrb[4].mxu1 }
 0x221   : >> { %v2487_v8 = vadd.f32 %v4467_v48, %v2485_v10  ;;  %v1961_v13 = vadd.f32 %v1959_v61, %v1957_v24  ;;  %v2466_v26 = vpop.f32.mrb[5].mxu1  ;;  %v4110_v48 = vstv %s7337_s4 }
 0x222   : >> { %1964 = vst.msk [vmem:[#allocation2 + $0x8] sm:$0xff] %vm352_vm0, %v1962_v22  ;;  %v2486_v51 = vadd.f32 %v2484_v50, %v2466_v26 }
 0x223   : >> { %1963 = vst.msk [vmem:[#allocation2] sm:$0xff] %vm352_vm0, %v1961_v13  ;;  %v7338_v13 = vld [vmem:[#allocation41_spill] sm:$0xff] }
 0x224   : >> { %vm4111_vm1 = vcmp.eq.s32.totalorder %v7338_v13, %v4110_v48 }
 0x229   : >> { %v2489_v58 = vld [vmem:[#allocation2 + $0x8] sm:$0xff] }
 0x22a   : >> { %v2491_v32 = vadd.f32 %v2489_v58, %v2487_v8  ;;  %v2488_v34 = vld [vmem:[#allocation2] sm:$0xff] }
 0x22b   : >> { %v2490_v55 = vadd.f32 %v2488_v34, %v2486_v51 }
 0x22c   : >> { %2493 = vst.msk [vmem:[#allocation2 + $0x8] sm:$0xff] %vm352_vm0, %v2491_v32  ;;  %v7339_v32 = vld [vmem:[#allocation44_spill] sm:$0xff] }
 0x22d   : >> { %2492 = vst.msk [vmem:[#allocation2] sm:$0xff] %vm352_vm0, %v2490_v55 }
 0x233   : >> { %v3018_v56 = vld [vmem:[#allocation2 + $0x8] sm:$0xff] }
 0x234   : >> { %v3017_v1 = vld [vmem:[#allocation2] sm:$0xff] }
 0x24d   : >> { %v4492_v21 = vpop.f32.mrb[4].mxu0  ;;  %v4517_v35 = vpop.f32.mrb[6].mxu1 }
 0x24e   : >> { %v3016_v42 = vadd.f32 %v4492_v21, %v3014_v12  ;;  %v2995_v0 = vpop.f32.mrb[5].mxu0  ;;  %v3545_v59 = vadd.f32 %v4517_v35, %v3543_v17  ;;  %v3524_v3 = vpop.f32.mrb[7].mxu1 }
 0x24f   : >> { %v3015_v27 = vadd.f32 %v3013_v14, %v2995_v0  ;;  %v3544_v4 = vadd.f32 %v3542_v37, %v3524_v3 }
 0x250   : >> { %v3020_v31 = vadd.f32 %v3018_v56, %v3016_v42 }
 0x251   : >> { %v3019_v9 = vadd.f32 %v3017_v1, %v3015_v27 }
 0x252   : >> { %3022 = vst.msk [vmem:[#allocation2 + $0x8] sm:$0xff] %vm352_vm0, %v3020_v31 }
 0x253   : >> { %3021 = vst.msk [vmem:[#allocation2] sm:$0xff] %vm352_vm0, %v3019_v9 }
 0x259   : >> { %v3547_v15 = vld [vmem:[#allocation2 + $0x8] sm:$0xff] }
 0x25a   : >> { %v3549_v30 = vadd.f32 %v3547_v15, %v3545_v59  ;;  %v3546_v40 = vld [vmem:[#allocation2] sm:$0xff] }
 0x25b   : >> { %v3548_v11 = vadd.f32 %v3546_v40, %v3544_v4 }
 0x25c   : >> { %3551 = vst.msk [vmem:[#allocation2 + $0x8] sm:$0xff] %vm352_vm0, %v3549_v30 }
 0x25d   : >> { %3550 = vst.msk [vmem:[#allocation2] sm:$0xff] %vm352_vm0, %v3548_v11 }
 0x263   : >> { %v4076_v63 = vld [vmem:[#allocation2 + $0x8] sm:$0xff] }
 0x264   : >> { %v4075_v19 = vld [vmem:[#allocation2] sm:$0xff] }
 0x271   : >> { %v4542_v53 = vpop.f32.mrb[6].mxu0 }
 0x272   : >> { %v4074_v23 = vadd.f32 %v4542_v53, %v4072_v49  ;;  %v4053_v47 = vpop.f32.mrb[7].mxu0 }
 0x273   : >> { %v4073_v16 = vadd.f32 %v4071_v44, %v4053_v47 }
 0x274   : >> { %v4078_v2 = vadd.f32 %v4076_v63, %v4074_v23 }
 0x275   : >> { %v4077_v41 = vadd.f32 %v4075_v19, %v4073_v16 }
 0x276   : >> { %4080 = vst.msk [vmem:[#allocation2 + $0x8] sm:$0xff] %vm352_vm0, %v4078_v2 }
 0x277   : >> { %4079 = vst.msk [vmem:[#allocation2] sm:$0xff] %vm352_vm0, %v4077_v41 }
 0x27d   : >> { %v4082_v43 = vld [vmem:[#allocation2 + $0x8] sm:$0xff] }
 0x27e   : >> { %v4084_v57 = vmul.f32 0.33333334, %v4082_v43  ;;  %v4081_v7 = vld [vmem:[#allocation2] sm:$0xff] }
 0x27f   : >> { %v4083_v62 = vmul.f32 0.33333334, %v4081_v7 }
 0x280   : >> { %v4094_v29 = vsel %vm352_vm0, %v4084_v57, inf }
 0x281   : >> { %v4093_v54 = vsel %vm352_vm0, %v4083_v62, inf }
 0x282   : >> { %v4095_v20 = vmin.f32 %v4093_v54, %v4094_v29 }
 0x284   : >> { %v4096_v52 = vrot.slane %v4095_v20, 4 }
 0x286   : >> { %v4097_v39 = vmin.f32 %v4095_v20, %v4096_v52 }
 0x288   : >> { %v4098_v10 = vrot.slane %v4097_v39, 2 }
 0x28a   : >> { %v4099_v33 = vmin.f32 %v4097_v39, %v4098_v10 }
 0x28c   : >> { %v4100_v24 = vrot.slane %v4099_v33, 1 }
 0x28e   : >> { %v4101_v50 = vmin.f32 %v4099_v33, %v4100_v24 }
 0x290   : >> { %v4102_v22 = vmax.f32 %v4101_v50, 0.0 }
 0x292   : >> { %4713 = vrsqrt.f32 %v4102_v22  ;;  %vm4105_vm2 = vcmp.eq.f32.partialorder %v4102_v22, inf  ;;  %v4108_v26 = vand.u32 2147483648, %v4102_v22  ;;  %vm4107_vm3 = vcmp.eq.f32.partialorder %v4102_v22, 0.0 }
 0x29c   : >> { %v4714_v61 = vpop.eup %4713  ;;  %331 = sbr.rel (!%p329_p8) target bundleno = 167 (0xa7), region = 112 }
 0x29d   : >> { %v4104_v8 = vmul.f32 %v4714_v61, %v4102_v22 }
 0x29f   : >> { %v4106_v51 = vsel %vm4105_vm2, %v4102_v22, %v4104_v8 }
 0x2a0   : >> { %v4109_v58 = vsel %vm4107_vm3, %v4108_v26, %v4106_v51 }
 0x2a1   : >> { %v4114_v34 = vsel %vm4111_vm1, %v4109_v58, %v7339_v32  }
 0x2a2   : >> { %v7340_v21 = vmov %v4114_v34  ;;  %4116 = vst.msk [vmem:[%s7345_s16] sm:$0xf] (%p329_p8), %vm4115_vm4, %v4114_v34 }
 0x2a3   : > { %4827 = shalt.err (!%p4824_p12)
}
 0x2a4   : > { %s4828_s27 = scalar_lea.hbm %s6917_s22, 64  ;;  %s4832_s26 = scalar_lea.hbm %s7346_s0, 128 }
 0x2a5   : > { %p4829_p1 = scmp.ne.s32.totalorder %s6917_s22, %s4828_s27  ;;  %p4833_p4 = scmp.lt.u32.totalorder %s6917_s22, %s7346_s0 }
 0x2a6   : > { %p4834_p7 = scmp.lt.u32.totalorder %s4832_s26, %s4828_s27  ;;  %p4836_p13 = scmp.lt.u32.totalorder %s4828_s27, %s6917_s22 }
 0x2a7   : > { %p4830_p2 = pnand %p4829_p1, %p7349_p10 }
 0x2a8   : > { %p4835_p8 = por %p4834_p7, %p4833_p4 }
 0x2a9   : > { %p4831_p3 = pneg %p4830_p2 }
 0x2aa   : > { %p4837_p6 = por %p4836_p13, %p4835_p8 }
 0x2ac   : > { %p4838_p0 = pnand %p4837_p6, %p4831_p3 }
 0x2ae   : > { %4841 = shalt.err (!%p4838_p0)
}
 0x2af   : > { %4621 = dma.vmem_to_hbm [thread:$0]  (%p7349_p10), %s4132_s14, 64, %s6917_s22, %s4118_s11  }
 0x2b0 PF: > { %s7350_s19 = sld [smem:[#allocation24_spill]]  ;;  %s7351_s12 = sld [smem:[#allocation21_spill]] }
 0x2b1   : > { %s7352_s29 = sld [smem:[#allocation29_spill]] }
 0x2b6   : > { %p4653_p9 = scmp.ge.s32.totalorder %s7350_s19, 2  ;;  %s4143_s13 = sand.u32 1, %s7351_s12  }
 0x2b7   : > { %p7353_p5 = scmp.ne.s32.totalorder %s7352_s29, 0  ;;  %s4144_s3 = scalar_lea.sflag [#allocation5], %s4143_s13 }
 0x2b9   : > { %p4640_p11 = pnand %p4653_p9, %p7353_p5 }
 0x2bb   : > { %4887 = dma.done.wait (!%p4640_p11), %s4144_s3, 64  }
 0x2bc   : > { %4889 = vsyncadd (!%p4640_p11), %s4144_s3, 4294967232  ;;  %s7354_s24 = sld [smem:[#allocation26_spill]]  ;;  %s7355_s21 = sld [smem:[#allocation22_spill]] }
 0x2bd   : > { %s7356_s22 = sld [smem:[#allocation23_spill]]  ;;  %s7357_s23 = sld [smem:[#allocation27_spill]] }
 0x2c2   : > { %p21_p12 = scmp.ge.s32.totalorder %s7354_s24, 4  }
 0x2c4   :  { %23 = sbr.rel (!%p21_p12) target bundleno = 16 (0x10), region = 123 }
 0x2cb   :  { %4149 = vsyncpa [#allocation4], 1 }
 0x2cc   :  { %4151 = vsyncpa [#allocation4 + $0x1], 1 }
 0x2cd   :  { %4152 = vsyncpa [#allocation13], 1 }
 0x2ce   :  { %4153 = vsyncpa [#allocation5], 1 }
 0x2cf   :  { %4155 = vsyncpa [#allocation5 + $0x1], 1 }
 0x2d0   :  { %4156 = vsyncpa [#allocation6], 1 }
 0x2d1   :  { %4158 = vsyncpa [#allocation6 + $0x1], 1 }
 0x2d2   :  { %4159 = vsyncpa [#allocation7], 1 }
 0x2d3   :  { %4161 = vsyncpa [#allocation7 + $0x1], 1 }
 0x2d4   :  { %4162 = vsyncpa [#allocation10], 1 }

</bundles_post_ra>
